<compile_context>
chip_gen: v7x
topology: tpu7x:2x2x1
jax: 0.10.0
libtpu: 0.0.40
codegen_flags: <defaults>
</compile_context>

<pallas_src>
import functools
import math

import jax
import jax.numpy as jnp
import numpy as np
from jax.experimental import pallas as pl
from jax.experimental.pallas import tpu as pltpu

HEAD_PAD = 128  # lane-dense padded width for the fused classification/regression head output


# ----------------------------------------------------------------------------
# In-kernel math helpers (pure jnp -> lowered by Mosaic)
# ----------------------------------------------------------------------------
def _layer_norm(x, g, b, eps=1e-5):
    mu = jnp.mean(x, axis=-1, keepdims=True)
    xc = x - mu
    var = jnp.mean(xc * xc, axis=-1, keepdims=True)
    return xc * jax.lax.rsqrt(var + eps) * g + b


def _attention(xq_bf, xkv_bf, num_heads, wq, bq, wk, wv, wo, bo):
    """Head-batched multi-head attention.

    xq_bf: (Sq, E) bf16, xkv_bf: (Skv, E) bf16.
    wq/wk/wv/wo: (E, E) bf16 (wq pre-scaled by 1/sqrt(D)).
    bq: (1, E) f32 (pre-scaled).  bk dropped; bv folded into bo.  bo: (1, E) f32.
    Elementwise math (bias add, softmax, norm) stays f32; MXU operands are bf16
    with f32 accumulation.
    """
    Skv = xkv_bf.shape[0]
    E = wq.shape[0]
    D = E // num_heads

    # Packed 32-lane projections (one matmul each, not per-head).
    q = jnp.dot(xq_bf, wq, preferred_element_type=jnp.float32) + bq   # (Sq, E)
    k = jnp.dot(xkv_bf, wk, preferred_element_type=jnp.float32)       # (Skv, E)
    v = jnp.dot(xkv_bf, wv, preferred_element_type=jnp.float32)       # (Skv, E)

    # Head split: static lane slices stacked on a new leading (batch) axis -> (H, S, D).
    qh = jnp.stack([q[:, h * D:(h + 1) * D] for h in range(num_heads)],
                   axis=0).astype(jnp.bfloat16)
    kh = jnp.stack([k[:, h * D:(h + 1) * D] for h in range(num_heads)],
                   axis=0).astype(jnp.bfloat16)
    vh = jnp.stack([v[:, h * D:(h + 1) * D] for h in range(num_heads)],
                   axis=0).astype(jnp.bfloat16)

    # One head-batched score einsum + softmax (f32) + one head-batched PV einsum.
    s = jnp.einsum('hsd,hmd->hsm', qh, kh,
                   preferred_element_type=jnp.float32)                 # (H, Sq, Skv)
    s = s - jnp.max(s, axis=-1, keepdims=True)
    p = jnp.exp(s)
    p = p * pl.reciprocal(jnp.sum(p, axis=-1, keepdims=True), approx=True)
    o = jnp.einsum('hsm,hmd->hsd', p.astype(jnp.bfloat16), vh,
                   preferred_element_type=jnp.float32)                 # (H, Sq, D)

    # Merge heads along lanes, then ONE (E, E) output projection.
    o = jnp.concatenate([o[h] for h in range(num_heads)], axis=-1)     # (Sq, E)
    return jnp.dot(o.astype(jnp.bfloat16), wo,
                   preferred_element_type=jnp.float32) + bo


# ----------------------------------------------------------------------------
# Fused Pallas kernel: all decoder layers + heads, one grid step per batch element
# ----------------------------------------------------------------------------
def fused_decoder_kernel(x0_ref, mem_ref,
                         sa_wq, sa_bq, sa_wk, sa_wv, sa_wo, sa_bo, ln1g, ln1b,
                         ca_wq, ca_bq, ca_wk, ca_wv, ca_wo, ca_bo, ln2g, ln2b,
                         w1, b1, w2, b2, ln3g, ln3b,
                         head_w, head_b,
                         out_ref, *, num_heads, num_layers):
    _, S, E = x0_ref.shape
    M = mem_ref.shape[1]
    x = x0_ref[...].reshape(S, E)                       # shared decoder query + pos enc (f32)
    mem_bf = mem_ref[...].reshape(M, E).astype(jnp.bfloat16)

    # TODO(synk): dropout layers are identity here (eval-mode semantics), as in module.eval().
    for l in range(num_layers):                          # static unroll (small L, weights resident)
        # --- self-attention block (post-LayerNorm) ---
        x_bf = x.astype(jnp.bfloat16)
        sa = _attention(x_bf, x_bf, num_heads,
                        sa_wq[l], sa_bq[l], sa_wk[l], sa_wv[l], sa_wo[l], sa_bo[l])
        x = _layer_norm(x + sa, ln1g[l], ln1b[l])
        # --- cross-attention block ---
        ca = _attention(x.astype(jnp.bfloat16), mem_bf, num_heads,
                        ca_wq[l], ca_bq[l], ca_wk[l], ca_wv[l], ca_wo[l], ca_bo[l])
        x = _layer_norm(x + ca, ln2g[l], ln2b[l])
        # --- feed-forward block (ReLU, PyTorch default) ---
        hidden = jnp.maximum(
            jnp.dot(x.astype(jnp.bfloat16), w1[l],
                    preferred_element_type=jnp.float32) + b1[l], 0.0)
        ff = jnp.dot(hidden.astype(jnp.bfloat16), w2[l],
                     preferred_element_type=jnp.float32) + b2[l]
        x = _layer_norm(x + ff, ln3g[l], ln3b[l])

    # Lane-dense padded head output: (S, 128); cols 0/1 are cls/reg, rest zero.
    head = (jnp.dot(x.astype(jnp.bfloat16), head_w[...],
                    preferred_element_type=jnp.float32) + head_b[...])
    out_ref[...] = head.reshape(1, S, HEAD_PAD)


# ----------------------------------------------------------------------------
# Trace-time weight preparation (outside the kernel)
# ----------------------------------------------------------------------------
def _prepare_fused_weights(params):
    """Packed (E,E) attention weights, folded scales/biases, bf16 MXU operands."""
    H = params["num_heads"]
    E = params["decoder_query"].shape[-1]
    D = E // H
    scale = 1.0 / math.sqrt(D)

    acc = [[] for _ in range(22)]
    for lp in params["layers"]:
        (sa_w, sa_b, sa_ow, sa_ob, ln1g, ln1b,
         ca_w, ca_b, ca_ow, ca_ob, ln2g, ln2b,
         w1, b1, w2, b2, ln3g, ln3b) = lp
        # query scale folded into wq/bq; bk dropped (softmax shift invariance);
        # bv folded into the output-projection bias (softmax rows sum to 1).
        sa_wq, sa_bq = sa_w[:, :E] * scale, sa_b[:, :E] * scale
        sa_wk, sa_wv = sa_w[:, E:2 * E], sa_w[:, 2 * E:]
        sa_bo = sa_ob + jnp.dot(sa_b[:, 2 * E:], sa_ow)
        ca_wq, ca_bq = ca_w[:, :E] * scale, ca_b[:, :E] * scale
        ca_wk, ca_wv = ca_w[:, E:2 * E], ca_w[:, 2 * E:]
        ca_bo = ca_ob + jnp.dot(ca_b[:, 2 * E:], ca_ow)
        per_layer = (sa_wq, sa_bq, sa_wk, sa_wv, sa_ow, sa_bo, ln1g, ln1b,
                     ca_wq, ca_bq, ca_wk, ca_wv, ca_ow, ca_bo, ln2g, ln2b,
                     w1, b1, w2, b2, ln3g, ln3b)
        for dst, src in zip(acc, per_layer):
            dst.append(src)
    stacked = [jnp.stack(a, axis=0) for a in acc]

    # MXU weights -> bf16 (accumulation stays f32); biases & LayerNorm params stay f32.
    matmul_idx = {0, 2, 3, 4, 8, 10, 11, 12, 16, 18}
    stacked = [w.astype(jnp.bfloat16) if i in matmul_idx else w
               for i, w in enumerate(stacked)]

    E2 = params["head_w"].shape[1]
    head_w = jnp.zeros((E, HEAD_PAD), jnp.float32).at[:, :E2].set(
        params["head_w"]).astype(jnp.bfloat16)
    head_b = jnp.zeros((1, HEAD_PAD), jnp.float32).at[:, :E2].set(params["head_b"])
    return stacked + [head_w, head_b]


# ----------------------------------------------------------------------------
# Forward wrapper (one pallas_call, grid over the batch)
# ----------------------------------------------------------------------------
def multi_task_translation_decoder(encoder_latent, params):
    B, M, E = encoder_latent.shape
    S = params["decoder_query"].shape[1]
    H = params["num_heads"]
    L = len(params["layers"])

    dec_in = params["decoder_query"] + params["pos_enc"]   # (1, S, E); broadcast via index_map
    fused_weights = _prepare_fused_weights(params)

    def _replicated_spec(arr):
        zeros = (0,) * arr.ndim
        return pl.BlockSpec(arr.shape, lambda b, _z=zeros: _z)

    in_specs = ([pl.BlockSpec((1, S, E), lambda b: (0, 0, 0)),   # shared decoder query
                 pl.BlockSpec((1, M, E), lambda b: (b, 0, 0))]   # per-batch encoder memory
                + [_replicated_spec(w) for w in fused_weights])  # weights: resident, fetched once
    out_spec = pl.BlockSpec((1, S, HEAD_PAD), lambda b: (b, 0, 0))

    kernel = functools.partial(fused_decoder_kernel, num_heads=H, num_layers=L)
    out = pl.pallas_call(
        kernel,
        out_shape=jax.ShapeDtypeStruct((B, S, HEAD_PAD), jnp.float32),
        grid_spec=pltpu.PrefetchScalarGridSpec(
            num_scalar_prefetch=0, grid=(B,),
            in_specs=in_specs, out_specs=out_spec),
        compiler_params=pltpu.CompilerParams(dimension_semantics=("parallel",)),
    )(dec_in, encoder_latent, *fused_weights)

    cls = out[..., 0]
    reg = jnp.maximum(out[..., 1], 0.0)   # F.relu on the regression head
    return cls, reg


# ----------------------------------------------------------------------------
# Parameter construction (PyTorch-equivalent packed layout, y = x @ W + b)
# ----------------------------------------------------------------------------
def get_sinusoidal_encoding(seq_len, d_model):
    pos = np.arange(seq_len, dtype=np.float32)[:, None]
    i = np.arange(d_model // 2, dtype=np.float32)[None, :]
    angle = pos / np.power(10000.0, (2.0 * i) / d_model)
    pe = np.zeros((seq_len, d_model), np.float32)
    pe[:, 0::2] = np.sin(angle)
    pe[:, 1::2] = np.cos(angle)
    return jnp.asarray(pe)


def init_params(key, seq_len, embed_dim, num_heads, num_layers, ff_dim):
    n_keys = 2 + num_layers * 6
    keys = iter(jax.random.split(key, n_keys))
    s_e = 1.0 / math.sqrt(embed_dim)
    s_f = 1.0 / math.sqrt(ff_dim)

    params = {
        "num_heads": num_heads,
        "decoder_query": jax.random.normal(next(keys), (1, seq_len, embed_dim), jnp.float32),
        "pos_enc": get_sinusoidal_encoding(seq_len, embed_dim)[None],
    }
    layers = []
    for _ in range(num_layers):
        sa_w = jax.random.normal(next(keys), (embed_dim, 3 * embed_dim), jnp.float32) * s_e
        sa_b = jnp.zeros((1, 3 * embed_dim), jnp.float32)
        sa_ow = jax.random.normal(next(keys), (embed_dim, embed_dim), jnp.float32) * s_e
        sa_ob = jnp.zeros((1, embed_dim), jnp.float32)
        ln1g = jnp.ones((1, embed_dim), jnp.float32)
        ln1b = jnp.zeros((1, embed_dim), jnp.float32)
        ca_w = jax.random.normal(next(keys), (embed_dim, 3 * embed_dim), jnp.float32) * s_e
        ca_b = jnp.zeros((1, 3 * embed_dim), jnp.float32)
        ca_ow = jax.random.normal(next(keys), (embed_dim, embed_dim), jnp.float32) * s_e
        ca_ob = jnp.zeros((1, embed_dim), jnp.float32)
        ln2g = jnp.ones((1, embed_dim), jnp.float32)
        ln2b = jnp.zeros((1, embed_dim), jnp.float32)
        w1 = jax.random.normal(next(keys), (embed_dim, ff_dim), jnp.float32) * s_e
        b1 = jnp.zeros((1, ff_dim), jnp.float32)
        w2 = jax.random.normal(next(keys), (ff_dim, embed_dim), jnp.float32) * s_f
        b2 = jnp.zeros((1, embed_dim), jnp.float32)
        ln3g = jnp.ones((1, embed_dim), jnp.float32)
        ln3b = jnp.zeros((1, embed_dim), jnp.float32)
        layers.append((sa_w, sa_b, sa_ow, sa_ob, ln1g, ln1b,
                       ca_w, ca_b, ca_ow, ca_ob, ln2g, ln2b,
                       w1, b1, w2, b2, ln3g, ln3b))
    params["layers"] = layers
    head_key = next(keys)
    # column 0 = classification head weights, column 1 = regression head weights
    params["head_w"] = jax.random.normal(head_key, (embed_dim, 2), jnp.float32) * s_e
    params["head_b"] = jnp.zeros((1, 2), jnp.float32)
    return params


# ----------------------------------------------------------------------------
# Pure-JAX f32 reference (independent per-head formulation, packed weights)
# ----------------------------------------------------------------------------
def _mha_ref(q_in, kv_in, w_in, b_in, w_out, b_out, num_heads):
    E = q_in.shape[-1]
    D = E // num_heads
    q = jnp.dot(q_in, w_in[:, :E]) + b_in[:, :E]
    k = jnp.dot(kv_in, w_in[:, E:2 * E]) + b_in[:, E:2 * E]
    v = jnp.dot(kv_in, w_in[:, 2 * E:]) + b_in[:, 2 * E:]
    scale = 1.0 / math.sqrt(D)
    heads = []
    for h in range(num_heads):
        qh = q[:, h * D:(h + 1) * D] * scale
        kh = k[:, h * D:(h + 1) * D]
        vh = v[:, h * D:(h + 1) * D]
        s = qh @ kh.T
        s = s - jnp.max(s, axis=-1, keepdims=True)
        p = jnp.exp(s)
        p = p / jnp.sum(p, axis=-1, keepdims=True)
        heads.append(p @ vh)
    o = jnp.concatenate(heads, axis=-1)
    return o @ w_out + b_out


def _decoder_layer_ref(x, mem, lp, num_heads):
    (sa_w, sa_b, sa_ow, sa_ob, ln1g, ln1b,
     ca_w, ca_b, ca_ow, ca_ob, ln2g, ln2b,
     w1, b1, w2, b2, ln3g, ln3b) = lp
    sa = _mha_ref(x, x, sa_w, sa_b, sa_ow, sa_ob, num_heads)
    x = _layer_norm(x + sa, ln1g, ln1b)
    ca = _mha_ref(x, mem, ca_w, ca_b, ca_ow, ca_ob, num_heads)
    x = _layer_norm(x + ca, ln2g, ln2b)
    h = jnp.maximum(jnp.dot(x, w1) + b1, 0.0)
    ff = jnp.dot(h, w2) + b2
    return _layer_norm(x + ff, ln3g, ln3b)


def ref_forward(encoder_latent, params):
    B = encoder_latent.shape[0]
    dec_in = params["decoder_query"] + params["pos_enc"]
    x0 = jnp.broadcast_to(dec_in, (B,) + dec_in.shape[1:])

    def per_batch(xb, mb):
        x = xb
        for lp in params["layers"]:
            x = _decoder_layer_ref(x, mb, lp, params["num_heads"])
        out = jnp.dot(x, params["head_w"]) + params["head_b"]
        return out[:, 0], jnp.maximum(out[:, 1], 0.0)

    return jax.vmap(per_batch)(x0, encoder_latent)


# ----------------------------------------------------------------------------
if __name__ == "__main__":
    SEQ_LEN, EMBED_DIM, NUM_HEADS, NUM_LAYERS, FF_DIM = 8, 32, 4, 2, 64
    BATCH, MEM_LEN = 2, 16

    root = jax.random.PRNGKey(0)
    k_enc, k_par = jax.random.split(root)
    encoder_latent = jax.random.normal(k_enc, (BATCH, MEM_LEN, EMBED_DIM), jnp.float32)
    params = init_params(k_par, SEQ_LEN, EMBED_DIM, NUM_HEADS, NUM_LAYERS, FF_DIM)

    cls_out, reg_out = multi_task_translation_decoder(encoder_latent, params)
    jax.block_until_ready((cls_out, reg_out))

    assert cls_out.shape == (BATCH, SEQ_LEN) and reg_out.shape == (BATCH, SEQ_LEN)
    assert bool(jnp.all(jnp.isfinite(cls_out))) and bool(jnp.all(jnp.isfinite(reg_out)))
    assert bool(jnp.all(reg_out >= 0.0))

    # bf16 MXU operands (f32 accumulation) + approx reciprocal => compare at a
    # slightly looser tolerance than the pure-f32 reference.
    ref_cls, ref_reg = ref_forward(encoder_latent, params)
    np.testing.assert_allclose(np.asarray(cls_out), np.asarray(ref_cls), atol=3e-2, rtol=3e-2)
    np.testing.assert_allclose(np.asarray(reg_out), np.asarray(ref_reg), atol=3e-2, rtol=3e-2)

    print("KERNEL_OK")
</pallas_src>

<mosaic_0001>
module attributes {stable_mosaic.version = 11 : i64} {
  func.func @fused_decoder_kernel(%arg0: i32, %arg1: memref<1x8x32xf32, #tpu.memory_space<vmem>>, %arg2: memref<1x16x32xf32, #tpu.memory_space<vmem>>, %arg3: memref<2x32x32xbf16, #tpu.memory_space<vmem>>, %arg4: memref<2x1x32xf32, #tpu.memory_space<vmem>>, %arg5: memref<2x32x32xbf16, #tpu.memory_space<vmem>>, %arg6: memref<2x32x32xbf16, #tpu.memory_space<vmem>>, %arg7: memref<2x32x32xbf16, #tpu.memory_space<vmem>>, %arg8: memref<2x1x32xf32, #tpu.memory_space<vmem>>, %arg9: memref<2x1x32xf32, #tpu.memory_space<vmem>>, %arg10: memref<2x1x32xf32, #tpu.memory_space<vmem>>, %arg11: memref<2x32x32xbf16, #tpu.memory_space<vmem>>, %arg12: memref<2x1x32xf32, #tpu.memory_space<vmem>>, %arg13: memref<2x32x32xbf16, #tpu.memory_space<vmem>>, %arg14: memref<2x32x32xbf16, #tpu.memory_space<vmem>>, %arg15: memref<2x32x32xbf16, #tpu.memory_space<vmem>>, %arg16: memref<2x1x32xf32, #tpu.memory_space<vmem>>, %arg17: memref<2x1x32xf32, #tpu.memory_space<vmem>>, %arg18: memref<2x1x32xf32, #tpu.memory_space<vmem>>, %arg19: memref<2x32x64xbf16, #tpu.memory_space<vmem>>, %arg20: memref<2x1x64xf32, #tpu.memory_space<vmem>>, %arg21: memref<2x64x32xbf16, #tpu.memory_space<vmem>>, %arg22: memref<2x1x32xf32, #tpu.memory_space<vmem>>, %arg23: memref<2x1x32xf32, #tpu.memory_space<vmem>>, %arg24: memref<2x1x32xf32, #tpu.memory_space<vmem>>, %arg25: memref<32x128xbf16, #tpu.memory_space<vmem>>, %arg26: memref<1x128xf32, #tpu.memory_space<vmem>>, %arg27: memref<1x8x128xf32, #tpu.memory_space<vmem>>) attributes {dimension_semantics = [#tpu.dimension_semantics<parallel>], iteration_bounds = array<i64: 2>, scalar_prefetch = 0 : i64, scratch_operands = 0 : i64, tpu.core_type = #tpu.core_type<tc>, window_params = [{pipeline_mode = #tpu.pipeline_mode<synchronous>, transform_indices = @transform_0, window_bounds = array<i64: 1, 8, 32>}, {transform_indices = @transform_1, window_bounds = array<i64: 1, 16, 32>}, {pipeline_mode = #tpu.pipeline_mode<synchronous>, transform_indices = @transform_2, window_bounds = array<i64: 2, 32, 32>}, {pipeline_mode = #tpu.pipeline_mode<synchronous>, transform_indices = @transform_3, window_bounds = array<i64: 2, 1, 32>}, {pipeline_mode = #tpu.pipeline_mode<synchronous>, transform_indices = @transform_4, window_bounds = array<i64: 2, 32, 32>}, {pipeline_mode = #tpu.pipeline_mode<synchronous>, transform_indices = @transform_5, window_bounds = array<i64: 2, 32, 32>}, {pipeline_mode = #tpu.pipeline_mode<synchronous>, transform_indices = @transform_6, window_bounds = array<i64: 2, 32, 32>}, {pipeline_mode = #tpu.pipeline_mode<synchronous>, transform_indices = @transform_7, window_bounds = array<i64: 2, 1, 32>}, {pipeline_mode = #tpu.pipeline_mode<synchronous>, transform_indices = @transform_8, window_bounds = array<i64: 2, 1, 32>}, {pipeline_mode = #tpu.pipeline_mode<synchronous>, transform_indices = @transform_9, window_bounds = array<i64: 2, 1, 32>}, {pipeline_mode = #tpu.pipeline_mode<synchronous>, transform_indices = @transform_10, window_bounds = array<i64: 2, 32, 32>}, {pipeline_mode = #tpu.pipeline_mode<synchronous>, transform_indices = @transform_11, window_bounds = array<i64: 2, 1, 32>}, {pipeline_mode = #tpu.pipeline_mode<synchronous>, transform_indices = @transform_12, window_bounds = array<i64: 2, 32, 32>}, {pipeline_mode = #tpu.pipeline_mode<synchronous>, transform_indices = @transform_13, window_bounds = array<i64: 2, 32, 32>}, {pipeline_mode = #tpu.pipeline_mode<synchronous>, transform_indices = @transform_14, window_bounds = array<i64: 2, 32, 32>}, {pipeline_mode = #tpu.pipeline_mode<synchronous>, transform_indices = @transform_15, window_bounds = array<i64: 2, 1, 32>}, {pipeline_mode = #tpu.pipeline_mode<synchronous>, transform_indices = @transform_16, window_bounds = array<i64: 2, 1, 32>}, {pipeline_mode = #tpu.pipeline_mode<synchronous>, transform_indices = @transform_17, window_bounds = array<i64: 2, 1, 32>}, {pipeline_mode = #tpu.pipeline_mode<synchronous>, transform_indices = @transform_18, window_bounds = array<i64: 2, 32, 64>}, {pipeline_mode = #tpu.pipeline_mode<synchronous>, transform_indices = @transform_19, window_bounds = array<i64: 2, 1, 64>}, {pipeline_mode = #tpu.pipeline_mode<synchronous>, transform_indices = @transform_20, window_bounds = array<i64: 2, 64, 32>}, {pipeline_mode = #tpu.pipeline_mode<synchronous>, transform_indices = @transform_21, window_bounds = array<i64: 2, 1, 32>}, {pipeline_mode = #tpu.pipeline_mode<synchronous>, transform_indices = @transform_22, window_bounds = array<i64: 2, 1, 32>}, {pipeline_mode = #tpu.pipeline_mode<synchronous>, transform_indices = @transform_23, window_bounds = array<i64: 2, 1, 32>}, {pipeline_mode = #tpu.pipeline_mode<synchronous>, transform_indices = @transform_24, window_bounds = array<i64: 32, 128>}, {pipeline_mode = #tpu.pipeline_mode<synchronous>, transform_indices = @transform_25, window_bounds = array<i64: 1, 128>}, {transform_indices = @transform_26, window_bounds = array<i64: 1, 8, 128>}]} {
    %c0 = arith.constant 0 : index
    %c0_0 = arith.constant 0 : index
    %c0_1 = arith.constant 0 : index
    %0 = vector.load %arg1[%c0, %c0_0, %c0_1] : memref<1x8x32xf32, #tpu.memory_space<vmem>>, vector<1x8x32xf32>
    %1 = vector.shape_cast %0 : vector<1x8x32xf32> to vector<8x32xf32>
    %c0_2 = arith.constant 0 : index
    %c0_3 = arith.constant 0 : index
    %c0_4 = arith.constant 0 : index
    %2 = vector.load %arg2[%c0_2, %c0_3, %c0_4] : memref<1x16x32xf32, #tpu.memory_space<vmem>>, vector<1x16x32xf32>
    %3 = vector.shape_cast %2 : vector<1x16x32xf32> to vector<16x32xf32>
    %4 = arith.truncf %3 : vector<16x32xf32> to vector<16x32xbf16>
    %5 = arith.truncf %1 : vector<8x32xf32> to vector<8x32xbf16>
    %c0_5 = arith.constant 0 : index
    %c0_6 = arith.constant 0 : index
    %c0_7 = arith.constant 0 : index
    %6 = vector.load %arg3[%c0_5, %c0_6, %c0_7] : memref<2x32x32xbf16, #tpu.memory_space<vmem>>, vector<1x32x32xbf16>
    %7 = vector.shape_cast %6 : vector<1x32x32xbf16> to vector<32x32xbf16>
    %c0_8 = arith.constant 0 : index
    %c0_9 = arith.constant 0 : index
    %c0_10 = arith.constant 0 : index
    %8 = vector.load %arg4[%c0_8, %c0_9, %c0_10] : memref<2x1x32xf32, #tpu.memory_space<vmem>>, vector<1x1x32xf32>
    %9 = vector.shape_cast %8 : vector<1x1x32xf32> to vector<1x32xf32>
    %c0_11 = arith.constant 0 : index
    %c0_12 = arith.constant 0 : index
    %c0_13 = arith.constant 0 : index
    %10 = vector.load %arg5[%c0_11, %c0_12, %c0_13] : memref<2x32x32xbf16, #tpu.memory_space<vmem>>, vector<1x32x32xbf16>
    %11 = vector.shape_cast %10 : vector<1x32x32xbf16> to vector<32x32xbf16>
    %c0_14 = arith.constant 0 : index
    %c0_15 = arith.constant 0 : index
    %c0_16 = arith.constant 0 : index
    %12 = vector.load %arg6[%c0_14, %c0_15, %c0_16] : memref<2x32x32xbf16, #tpu.memory_space<vmem>>, vector<1x32x32xbf16>
    %13 = vector.shape_cast %12 : vector<1x32x32xbf16> to vector<32x32xbf16>
    %c0_17 = arith.constant 0 : index
    %c0_18 = arith.constant 0 : index
    %c0_19 = arith.constant 0 : index
    %14 = vector.load %arg7[%c0_17, %c0_18, %c0_19] : memref<2x32x32xbf16, #tpu.memory_space<vmem>>, vector<1x32x32xbf16>
    %15 = vector.shape_cast %14 : vector<1x32x32xbf16> to vector<32x32xbf16>
    %c0_20 = arith.constant 0 : index
    %c0_21 = arith.constant 0 : index
    %c0_22 = arith.constant 0 : index
    %16 = vector.load %arg8[%c0_20, %c0_21, %c0_22] : memref<2x1x32xf32, #tpu.memory_space<vmem>>, vector<1x1x32xf32>
    %17 = vector.shape_cast %16 : vector<1x1x32xf32> to vector<1x32xf32>
    %cst = arith.constant dense<0.000000e+00> : vector<8x32xf32>
    %18 = tpu.matmul %5, %7, %cst {dimension_numbers = #tpu.dot_dimension_numbers<[1], [0], [0], [1], [0, 0, 1, 1], [], []>} : vector<8x32xbf16>, vector<32x32xbf16>, vector<8x32xf32> -> vector<8x32xf32>
    %19 = vector.broadcast %9 : vector<1x32xf32> to vector<8x32xf32>
    %20 = arith.addf %18, %19 : vector<8x32xf32>
    %cst_23 = arith.constant dense<0.000000e+00> : vector<8x32xf32>
    %21 = tpu.matmul %5, %11, %cst_23 {dimension_numbers = #tpu.dot_dimension_numbers<[1], [0], [0], [1], [0, 0, 1, 1], [], []>} : vector<8x32xbf16>, vector<32x32xbf16>, vector<8x32xf32> -> vector<8x32xf32>
    %cst_24 = arith.constant dense<0.000000e+00> : vector<8x32xf32>
    %22 = tpu.matmul %5, %13, %cst_24 {dimension_numbers = #tpu.dot_dimension_numbers<[1], [0], [0], [1], [0, 0, 1, 1], [], []>} : vector<8x32xbf16>, vector<32x32xbf16>, vector<8x32xf32> -> vector<8x32xf32>
    %23 = vector.extract_strided_slice %20 {offsets = [0, 0], sizes = [8, 8], strides = [1, 1]} : vector<8x32xf32> to vector<8x8xf32>
    %24 = vector.extract_strided_slice %20 {offsets = [0, 8], sizes = [8, 8], strides = [1, 1]} : vector<8x32xf32> to vector<8x8xf32>
    %25 = vector.extract_strided_slice %20 {offsets = [0, 16], sizes = [8, 8], strides = [1, 1]} : vector<8x32xf32> to vector<8x8xf32>
    %26 = vector.extract_strided_slice %20 {offsets = [0, 24], sizes = [8, 8], strides = [1, 1]} : vector<8x32xf32> to vector<8x8xf32>
    %27 = vector.shape_cast %23 : vector<8x8xf32> to vector<1x8x8xf32>
    %28 = vector.shape_cast %24 : vector<8x8xf32> to vector<1x8x8xf32>
    %29 = vector.shape_cast %25 : vector<8x8xf32> to vector<1x8x8xf32>
    %30 = vector.shape_cast %26 : vector<8x8xf32> to vector<1x8x8xf32>
    %31 = tpu.concatenate %27, %28, %29, %30 in 0 : vector<1x8x8xf32>, vector<1x8x8xf32>, vector<1x8x8xf32>, vector<1x8x8xf32> -> vector<4x8x8xf32>
    %32 = arith.truncf %31 : vector<4x8x8xf32> to vector<4x8x8xbf16>
    %33 = vector.extract_strided_slice %21 {offsets = [0, 0], sizes = [8, 8], strides = [1, 1]} : vector<8x32xf32> to vector<8x8xf32>
    %34 = vector.extract_strided_slice %21 {offsets = [0, 8], sizes = [8, 8], strides = [1, 1]} : vector<8x32xf32> to vector<8x8xf32>
    %35 = vector.extract_strided_slice %21 {offsets = [0, 16], sizes = [8, 8], strides = [1, 1]} : vector<8x32xf32> to vector<8x8xf32>
    %36 = vector.extract_strided_slice %21 {offsets = [0, 24], sizes = [8, 8], strides = [1, 1]} : vector<8x32xf32> to vector<8x8xf32>
    %37 = vector.shape_cast %33 : vector<8x8xf32> to vector<1x8x8xf32>
    %38 = vector.shape_cast %34 : vector<8x8xf32> to vector<1x8x8xf32>
    %39 = vector.shape_cast %35 : vector<8x8xf32> to vector<1x8x8xf32>
    %40 = vector.shape_cast %36 : vector<8x8xf32> to vector<1x8x8xf32>
    %41 = tpu.concatenate %37, %38, %39, %40 in 0 : vector<1x8x8xf32>, vector<1x8x8xf32>, vector<1x8x8xf32>, vector<1x8x8xf32> -> vector<4x8x8xf32>
    %42 = arith.truncf %41 : vector<4x8x8xf32> to vector<4x8x8xbf16>
    %43 = vector.extract_strided_slice %22 {offsets = [0, 0], sizes = [8, 8], strides = [1, 1]} : vector<8x32xf32> to vector<8x8xf32>
    %44 = vector.extract_strided_slice %22 {offsets = [0, 8], sizes = [8, 8], strides = [1, 1]} : vector<8x32xf32> to vector<8x8xf32>
    %45 = vector.extract_strided_slice %22 {offsets = [0, 16], sizes = [8, 8], strides = [1, 1]} : vector<8x32xf32> to vector<8x8xf32>
    %46 = vector.extract_strided_slice %22 {offsets = [0, 24], sizes = [8, 8], strides = [1, 1]} : vector<8x32xf32> to vector<8x8xf32>
    %47 = vector.shape_cast %43 : vector<8x8xf32> to vector<1x8x8xf32>
    %48 = vector.shape_cast %44 : vector<8x8xf32> to vector<1x8x8xf32>
    %49 = vector.shape_cast %45 : vector<8x8xf32> to vector<1x8x8xf32>
    %50 = vector.shape_cast %46 : vector<8x8xf32> to vector<1x8x8xf32>
    %51 = tpu.concatenate %47, %48, %49, %50 in 0 : vector<1x8x8xf32>, vector<1x8x8xf32>, vector<1x8x8xf32>, vector<1x8x8xf32> -> vector<4x8x8xf32>
    %52 = arith.truncf %51 : vector<4x8x8xf32> to vector<4x8x8xbf16>
    "tpu.trace_start"() <{level = 10 : i32, message = "hsd,hmd->hsm"}> : () -> ()
    %cst_25 = arith.constant dense<0.000000e+00> : vector<4x8x8xf32>
    %53 = tpu.matmul %32, %42, %cst_25 {dimension_numbers = #tpu.dot_dimension_numbers<[2], [2], [1], [1], [0, 0, 0, 1, 1, 1], [0], [0]>} : vector<4x8x8xbf16>, vector<4x8x8xbf16>, vector<4x8x8xf32> -> vector<4x8x8xf32>
    "tpu.trace_stop"() : () -> ()
    %cst_26 = arith.constant dense<0xFF800000> : vector<4x8xf32>
    %54 = vector.multi_reduction <maximumf>, %53, %cst_26 [2] : vector<4x8x8xf32> to vector<4x8xf32>
    %55 = vector.shape_cast %54 : vector<4x8xf32> to vector<4x8x1xf32>
    %56 = vector.broadcast %55 : vector<4x8x1xf32> to vector<4x8x8xf32>
    %57 = arith.subf %53, %56 : vector<4x8x8xf32>
    %58 = math.exp %57 : vector<4x8x8xf32>
    %cst_27 = arith.constant dense<0.000000e+00> : vector<4x8xf32>
    %59 = vector.multi_reduction <add>, %58, %cst_27 [2] : vector<4x8x8xf32> to vector<4x8xf32>
    %60 = vector.shape_cast %59 : vector<4x8xf32> to vector<4x8x1xf32>
    %61 = tpu.reciprocal %60 {approx = true} : vector<4x8x1xf32> -> vector<4x8x1xf32>
    %62 = vector.broadcast %61 : vector<4x8x1xf32> to vector<4x8x8xf32>
    %63 = arith.mulf %58, %62 : vector<4x8x8xf32>
    %64 = arith.truncf %63 : vector<4x8x8xf32> to vector<4x8x8xbf16>
    "tpu.trace_start"() <{level = 10 : i32, message = "hsm,hmd->hsd"}> : () -> ()
    %cst_28 = arith.constant dense<0.000000e+00> : vector<4x8x8xf32>
    %65 = tpu.matmul %64, %52, %cst_28 {dimension_numbers = #tpu.dot_dimension_numbers<[2], [1], [1], [2], [0, 0, 0, 1, 1, 2], [0], [0]>} : vector<4x8x8xbf16>, vector<4x8x8xbf16>, vector<4x8x8xf32> -> vector<4x8x8xf32>
    "tpu.trace_stop"() : () -> ()
    %66 = vector.extract_strided_slice %65 {offsets = [0, 0, 0], sizes = [1, 8, 8], strides = [1, 1, 1]} : vector<4x8x8xf32> to vector<1x8x8xf32>
    %67 = vector.shape_cast %66 : vector<1x8x8xf32> to vector<8x8xf32>
    %68 = vector.extract_strided_slice %65 {offsets = [1, 0, 0], sizes = [1, 8, 8], strides = [1, 1, 1]} : vector<4x8x8xf32> to vector<1x8x8xf32>
    %69 = vector.shape_cast %68 : vector<1x8x8xf32> to vector<8x8xf32>
    %70 = vector.extract_strided_slice %65 {offsets = [2, 0, 0], sizes = [1, 8, 8], strides = [1, 1, 1]} : vector<4x8x8xf32> to vector<1x8x8xf32>
    %71 = vector.shape_cast %70 : vector<1x8x8xf32> to vector<8x8xf32>
    %72 = vector.extract_strided_slice %65 {offsets = [3, 0, 0], sizes = [1, 8, 8], strides = [1, 1, 1]} : vector<4x8x8xf32> to vector<1x8x8xf32>
    %73 = vector.shape_cast %72 : vector<1x8x8xf32> to vector<8x8xf32>
    %74 = tpu.concatenate %67, %69, %71, %73 in 1 : vector<8x8xf32>, vector<8x8xf32>, vector<8x8xf32>, vector<8x8xf32> -> vector<8x32xf32>
    %75 = arith.truncf %74 : vector<8x32xf32> to vector<8x32xbf16>
    %cst_29 = arith.constant dense<0.000000e+00> : vector<8x32xf32>
    %76 = tpu.matmul %75, %15, %cst_29 {dimension_numbers = #tpu.dot_dimension_numbers<[1], [0], [0], [1], [0, 0, 1, 1], [], []>} : vector<8x32xbf16>, vector<32x32xbf16>, vector<8x32xf32> -> vector<8x32xf32>
    %77 = vector.broadcast %17 : vector<1x32xf32> to vector<8x32xf32>
    %78 = arith.addf %76, %77 : vector<8x32xf32>
    %79 = arith.addf %1, %78 : vector<8x32xf32>
    %c0_30 = arith.constant 0 : index
    %c0_31 = arith.constant 0 : index
    %c0_32 = arith.constant 0 : index
    %80 = vector.load %arg9[%c0_30, %c0_31, %c0_32] : memref<2x1x32xf32, #tpu.memory_space<vmem>>, vector<1x1x32xf32>
    %81 = vector.shape_cast %80 : vector<1x1x32xf32> to vector<1x32xf32>
    %c0_33 = arith.constant 0 : index
    %c0_34 = arith.constant 0 : index
    %c0_35 = arith.constant 0 : index
    %82 = vector.load %arg10[%c0_33, %c0_34, %c0_35] : memref<2x1x32xf32, #tpu.memory_space<vmem>>, vector<1x1x32xf32>
    %83 = vector.shape_cast %82 : vector<1x1x32xf32> to vector<1x32xf32>
    %cst_36 = arith.constant dense<0.000000e+00> : vector<8xf32>
    %84 = vector.multi_reduction <add>, %79, %cst_36 [1] : vector<8x32xf32> to vector<8xf32>
    %85 = vector.shape_cast %84 : vector<8xf32> to vector<8x1xf32>
    %cst_37 = arith.constant 3.200000e+01 : f32
    %86 = vector.broadcast %cst_37 : f32 to vector<8x1xf32>
    %87 = arith.divf %85, %86 : vector<8x1xf32>
    %88 = vector.broadcast %87 : vector<8x1xf32> to vector<8x32xf32>
    %89 = arith.subf %79, %88 : vector<8x32xf32>
    %90 = arith.mulf %89, %89 : vector<8x32xf32>
    %cst_38 = arith.constant dense<0.000000e+00> : vector<8xf32>
    %91 = vector.multi_reduction <add>, %90, %cst_38 [1] : vector<8x32xf32> to vector<8xf32>
    %92 = vector.shape_cast %91 : vector<8xf32> to vector<8x1xf32>
    %cst_39 = arith.constant 3.200000e+01 : f32
    %93 = vector.broadcast %cst_39 : f32 to vector<8x1xf32>
    %94 = arith.divf %92, %93 : vector<8x1xf32>
    %cst_40 = arith.constant 9.99999974E-6 : f32
    %95 = vector.broadcast %cst_40 : f32 to vector<8x1xf32>
    %96 = arith.addf %94, %95 : vector<8x1xf32>
    %97 = math.rsqrt %96 : vector<8x1xf32>
    %98 = vector.broadcast %97 : vector<8x1xf32> to vector<8x32xf32>
    %99 = arith.mulf %89, %98 : vector<8x32xf32>
    %100 = vector.broadcast %81 : vector<1x32xf32> to vector<8x32xf32>
    %101 = arith.mulf %99, %100 : vector<8x32xf32>
    %102 = vector.broadcast %83 : vector<1x32xf32> to vector<8x32xf32>
    %103 = arith.addf %101, %102 : vector<8x32xf32>
    %104 = arith.truncf %103 : vector<8x32xf32> to vector<8x32xbf16>
    %c0_41 = arith.constant 0 : index
    %c0_42 = arith.constant 0 : index
    %c0_43 = arith.constant 0 : index
    %105 = vector.load %arg11[%c0_41, %c0_42, %c0_43] : memref<2x32x32xbf16, #tpu.memory_space<vmem>>, vector<1x32x32xbf16>
    %106 = vector.shape_cast %105 : vector<1x32x32xbf16> to vector<32x32xbf16>
    %c0_44 = arith.constant 0 : index
    %c0_45 = arith.constant 0 : index
    %c0_46 = arith.constant 0 : index
    %107 = vector.load %arg12[%c0_44, %c0_45, %c0_46] : memref<2x1x32xf32, #tpu.memory_space<vmem>>, vector<1x1x32xf32>
    %108 = vector.shape_cast %107 : vector<1x1x32xf32> to vector<1x32xf32>
    %c0_47 = arith.constant 0 : index
    %c0_48 = arith.constant 0 : index
    %c0_49 = arith.constant 0 : index
    %109 = vector.load %arg13[%c0_47, %c0_48, %c0_49] : memref<2x32x32xbf16, #tpu.memory_space<vmem>>, vector<1x32x32xbf16>
    %110 = vector.shape_cast %109 : vector<1x32x32xbf16> to vector<32x32xbf16>
    %c0_50 = arith.constant 0 : index
    %c0_51 = arith.constant 0 : index
    %c0_52 = arith.constant 0 : index
    %111 = vector.load %arg14[%c0_50, %c0_51, %c0_52] : memref<2x32x32xbf16, #tpu.memory_space<vmem>>, vector<1x32x32xbf16>
    %112 = vector.shape_cast %111 : vector<1x32x32xbf16> to vector<32x32xbf16>
    %c0_53 = arith.constant 0 : index
    %c0_54 = arith.constant 0 : index
    %c0_55 = arith.constant 0 : index
    %113 = vector.load %arg15[%c0_53, %c0_54, %c0_55] : memref<2x32x32xbf16, #tpu.memory_space<vmem>>, vector<1x32x32xbf16>
    %114 = vector.shape_cast %113 : vector<1x32x32xbf16> to vector<32x32xbf16>
    %c0_56 = arith.constant 0 : index
    %c0_57 = arith.constant 0 : index
    %c0_58 = arith.constant 0 : index
    %115 = vector.load %arg16[%c0_56, %c0_57, %c0_58] : memref<2x1x32xf32, #tpu.memory_space<vmem>>, vector<1x1x32xf32>
    %116 = vector.shape_cast %115 : vector<1x1x32xf32> to vector<1x32xf32>
    %cst_59 = arith.constant dense<0.000000e+00> : vector<8x32xf32>
    %117 = tpu.matmul %104, %106, %cst_59 {dimension_numbers = #tpu.dot_dimension_numbers<[1], [0], [0], [1], [0, 0, 1, 1], [], []>} : vector<8x32xbf16>, vector<32x32xbf16>, vector<8x32xf32> -> vector<8x32xf32>
    %118 = vector.broadcast %108 : vector<1x32xf32> to vector<8x32xf32>
    %119 = arith.addf %117, %118 : vector<8x32xf32>
    %cst_60 = arith.constant dense<0.000000e+00> : vector<16x32xf32>
    %120 = tpu.matmul %4, %110, %cst_60 {dimension_numbers = #tpu.dot_dimension_numbers<[1], [0], [0], [1], [0, 0, 1, 1], [], []>} : vector<16x32xbf16>, vector<32x32xbf16>, vector<16x32xf32> -> vector<16x32xf32>
    %cst_61 = arith.constant dense<0.000000e+00> : vector<16x32xf32>
    %121 = tpu.matmul %4, %112, %cst_61 {dimension_numbers = #tpu.dot_dimension_numbers<[1], [0], [0], [1], [0, 0, 1, 1], [], []>} : vector<16x32xbf16>, vector<32x32xbf16>, vector<16x32xf32> -> vector<16x32xf32>
    %122 = vector.extract_strided_slice %119 {offsets = [0, 0], sizes = [8, 8], strides = [1, 1]} : vector<8x32xf32> to vector<8x8xf32>
    %123 = vector.extract_strided_slice %119 {offsets = [0, 8], sizes = [8, 8], strides = [1, 1]} : vector<8x32xf32> to vector<8x8xf32>
    %124 = vector.extract_strided_slice %119 {offsets = [0, 16], sizes = [8, 8], strides = [1, 1]} : vector<8x32xf32> to vector<8x8xf32>
    %125 = vector.extract_strided_slice %119 {offsets = [0, 24], sizes = [8, 8], strides = [1, 1]} : vector<8x32xf32> to vector<8x8xf32>
    %126 = vector.shape_cast %122 : vector<8x8xf32> to vector<1x8x8xf32>
    %127 = vector.shape_cast %123 : vector<8x8xf32> to vector<1x8x8xf32>
    %128 = vector.shape_cast %124 : vector<8x8xf32> to vector<1x8x8xf32>
    %129 = vector.shape_cast %125 : vector<8x8xf32> to vector<1x8x8xf32>
    %130 = tpu.concatenate %126, %127, %128, %129 in 0 : vector<1x8x8xf32>, vector<1x8x8xf32>, vector<1x8x8xf32>, vector<1x8x8xf32> -> vector<4x8x8xf32>
    %131 = arith.truncf %130 : vector<4x8x8xf32> to vector<4x8x8xbf16>
    %132 = vector.extract_strided_slice %120 {offsets = [0, 0], sizes = [16, 8], strides = [1, 1]} : vector<16x32xf32> to vector<16x8xf32>
    %133 = vector.extract_strided_slice %120 {offsets = [0, 8], sizes = [16, 8], strides = [1, 1]} : vector<16x32xf32> to vector<16x8xf32>
    %134 = vector.extract_strided_slice %120 {offsets = [0, 16], sizes = [16, 8], strides = [1, 1]} : vector<16x32xf32> to vector<16x8xf32>
    %135 = vector.extract_strided_slice %120 {offsets = [0, 24], sizes = [16, 8], strides = [1, 1]} : vector<16x32xf32> to vector<16x8xf32>
    %136 = vector.shape_cast %132 : vector<16x8xf32> to vector<1x16x8xf32>
    %137 = vector.shape_cast %133 : vector<16x8xf32> to vector<1x16x8xf32>
    %138 = vector.shape_cast %134 : vector<16x8xf32> to vector<1x16x8xf32>
    %139 = vector.shape_cast %135 : vector<16x8xf32> to vector<1x16x8xf32>
    %140 = tpu.concatenate %136, %137, %138, %139 in 0 : vector<1x16x8xf32>, vector<1x16x8xf32>, vector<1x16x8xf32>, vector<1x16x8xf32> -> vector<4x16x8xf32>
    %141 = arith.truncf %140 : vector<4x16x8xf32> to vector<4x16x8xbf16>
    %142 = vector.extract_strided_slice %121 {offsets = [0, 0], sizes = [16, 8], strides = [1, 1]} : vector<16x32xf32> to vector<16x8xf32>
    %143 = vector.extract_strided_slice %121 {offsets = [0, 8], sizes = [16, 8], strides = [1, 1]} : vector<16x32xf32> to vector<16x8xf32>
    %144 = vector.extract_strided_slice %121 {offsets = [0, 16], sizes = [16, 8], strides = [1, 1]} : vector<16x32xf32> to vector<16x8xf32>
    %145 = vector.extract_strided_slice %121 {offsets = [0, 24], sizes = [16, 8], strides = [1, 1]} : vector<16x32xf32> to vector<16x8xf32>
    %146 = vector.shape_cast %142 : vector<16x8xf32> to vector<1x16x8xf32>
    %147 = vector.shape_cast %143 : vector<16x8xf32> to vector<1x16x8xf32>
    %148 = vector.shape_cast %144 : vector<16x8xf32> to vector<1x16x8xf32>
    %149 = vector.shape_cast %145 : vector<16x8xf32> to vector<1x16x8xf32>
    %150 = tpu.concatenate %146, %147, %148, %149 in 0 : vector<1x16x8xf32>, vector<1x16x8xf32>, vector<1x16x8xf32>, vector<1x16x8xf32> -> vector<4x16x8xf32>
    %151 = arith.truncf %150 : vector<4x16x8xf32> to vector<4x16x8xbf16>
    "tpu.trace_start"() <{level = 10 : i32, message = "hsd,hmd->hsm"}> : () -> ()
    %cst_62 = arith.constant dense<0.000000e+00> : vector<4x8x16xf32>
    %152 = tpu.matmul %131, %141, %cst_62 {dimension_numbers = #tpu.dot_dimension_numbers<[2], [2], [1], [1], [0, 0, 0, 1, 1, 1], [0], [0]>} : vector<4x8x8xbf16>, vector<4x16x8xbf16>, vector<4x8x16xf32> -> vector<4x8x16xf32>
    "tpu.trace_stop"() : () -> ()
    %cst_63 = arith.constant dense<0xFF800000> : vector<4x8xf32>
    %153 = vector.multi_reduction <maximumf>, %152, %cst_63 [2] : vector<4x8x16xf32> to vector<4x8xf32>
    %154 = vector.shape_cast %153 : vector<4x8xf32> to vector<4x8x1xf32>
    %155 = vector.broadcast %154 : vector<4x8x1xf32> to vector<4x8x16xf32>
    %156 = arith.subf %152, %155 : vector<4x8x16xf32>
    %157 = math.exp %156 : vector<4x8x16xf32>
    %cst_64 = arith.constant dense<0.000000e+00> : vector<4x8xf32>
    %158 = vector.multi_reduction <add>, %157, %cst_64 [2] : vector<4x8x16xf32> to vector<4x8xf32>
    %159 = vector.shape_cast %158 : vector<4x8xf32> to vector<4x8x1xf32>
    %160 = tpu.reciprocal %159 {approx = true} : vector<4x8x1xf32> -> vector<4x8x1xf32>
    %161 = vector.broadcast %160 : vector<4x8x1xf32> to vector<4x8x16xf32>
    %162 = arith.mulf %157, %161 : vector<4x8x16xf32>
    %163 = arith.truncf %162 : vector<4x8x16xf32> to vector<4x8x16xbf16>
    "tpu.trace_start"() <{level = 10 : i32, message = "hsm,hmd->hsd"}> : () -> ()
    %cst_65 = arith.constant dense<0.000000e+00> : vector<4x8x8xf32>
    %164 = tpu.matmul %163, %151, %cst_65 {dimension_numbers = #tpu.dot_dimension_numbers<[2], [1], [1], [2], [0, 0, 0, 1, 1, 2], [0], [0]>} : vector<4x8x16xbf16>, vector<4x16x8xbf16>, vector<4x8x8xf32> -> vector<4x8x8xf32>
    "tpu.trace_stop"() : () -> ()
    %165 = vector.extract_strided_slice %164 {offsets = [0, 0, 0], sizes = [1, 8, 8], strides = [1, 1, 1]} : vector<4x8x8xf32> to vector<1x8x8xf32>
    %166 = vector.shape_cast %165 : vector<1x8x8xf32> to vector<8x8xf32>
    %167 = vector.extract_strided_slice %164 {offsets = [1, 0, 0], sizes = [1, 8, 8], strides = [1, 1, 1]} : vector<4x8x8xf32> to vector<1x8x8xf32>
    %168 = vector.shape_cast %167 : vector<1x8x8xf32> to vector<8x8xf32>
    %169 = vector.extract_strided_slice %164 {offsets = [2, 0, 0], sizes = [1, 8, 8], strides = [1, 1, 1]} : vector<4x8x8xf32> to vector<1x8x8xf32>
    %170 = vector.shape_cast %169 : vector<1x8x8xf32> to vector<8x8xf32>
    %171 = vector.extract_strided_slice %164 {offsets = [3, 0, 0], sizes = [1, 8, 8], strides = [1, 1, 1]} : vector<4x8x8xf32> to vector<1x8x8xf32>
    %172 = vector.shape_cast %171 : vector<1x8x8xf32> to vector<8x8xf32>
    %173 = tpu.concatenate %166, %168, %170, %172 in 1 : vector<8x8xf32>, vector<8x8xf32>, vector<8x8xf32>, vector<8x8xf32> -> vector<8x32xf32>
    %174 = arith.truncf %173 : vector<8x32xf32> to vector<8x32xbf16>
    %cst_66 = arith.constant dense<0.000000e+00> : vector<8x32xf32>
    %175 = tpu.matmul %174, %114, %cst_66 {dimension_numbers = #tpu.dot_dimension_numbers<[1], [0], [0], [1], [0, 0, 1, 1], [], []>} : vector<8x32xbf16>, vector<32x32xbf16>, vector<8x32xf32> -> vector<8x32xf32>
    %176 = vector.broadcast %116 : vector<1x32xf32> to vector<8x32xf32>
    %177 = arith.addf %175, %176 : vector<8x32xf32>
    %178 = arith.addf %103, %177 : vector<8x32xf32>
    %c0_67 = arith.constant 0 : index
    %c0_68 = arith.constant 0 : index
    %c0_69 = arith.constant 0 : index
    %179 = vector.load %arg17[%c0_67, %c0_68, %c0_69] : memref<2x1x32xf32, #tpu.memory_space<vmem>>, vector<1x1x32xf32>
    %180 = vector.shape_cast %179 : vector<1x1x32xf32> to vector<1x32xf32>
    %c0_70 = arith.constant 0 : index
    %c0_71 = arith.constant 0 : index
    %c0_72 = arith.constant 0 : index
    %181 = vector.load %arg18[%c0_70, %c0_71, %c0_72] : memref<2x1x32xf32, #tpu.memory_space<vmem>>, vector<1x1x32xf32>
    %182 = vector.shape_cast %181 : vector<1x1x32xf32> to vector<1x32xf32>
    %cst_73 = arith.constant dense<0.000000e+00> : vector<8xf32>
    %183 = vector.multi_reduction <add>, %178, %cst_73 [1] : vector<8x32xf32> to vector<8xf32>
    %184 = vector.shape_cast %183 : vector<8xf32> to vector<8x1xf32>
    %cst_74 = arith.constant 3.200000e+01 : f32
    %185 = vector.broadcast %cst_74 : f32 to vector<8x1xf32>
    %186 = arith.divf %184, %185 : vector<8x1xf32>
    %187 = vector.broadcast %186 : vector<8x1xf32> to vector<8x32xf32>
    %188 = arith.subf %178, %187 : vector<8x32xf32>
    %189 = arith.mulf %188, %188 : vector<8x32xf32>
    %cst_75 = arith.constant dense<0.000000e+00> : vector<8xf32>
    %190 = vector.multi_reduction <add>, %189, %cst_75 [1] : vector<8x32xf32> to vector<8xf32>
    %191 = vector.shape_cast %190 : vector<8xf32> to vector<8x1xf32>
    %cst_76 = arith.constant 3.200000e+01 : f32
    %192 = vector.broadcast %cst_76 : f32 to vector<8x1xf32>
    %193 = arith.divf %191, %192 : vector<8x1xf32>
    %cst_77 = arith.constant 9.99999974E-6 : f32
    %194 = vector.broadcast %cst_77 : f32 to vector<8x1xf32>
    %195 = arith.addf %193, %194 : vector<8x1xf32>
    %196 = math.rsqrt %195 : vector<8x1xf32>
    %197 = vector.broadcast %196 : vector<8x1xf32> to vector<8x32xf32>
    %198 = arith.mulf %188, %197 : vector<8x32xf32>
    %199 = vector.broadcast %180 : vector<1x32xf32> to vector<8x32xf32>
    %200 = arith.mulf %198, %199 : vector<8x32xf32>
    %201 = vector.broadcast %182 : vector<1x32xf32> to vector<8x32xf32>
    %202 = arith.addf %200, %201 : vector<8x32xf32>
    %203 = arith.truncf %202 : vector<8x32xf32> to vector<8x32xbf16>
    %c0_78 = arith.constant 0 : index
    %c0_79 = arith.constant 0 : index
    %c0_80 = arith.constant 0 : index
    %204 = vector.load %arg19[%c0_78, %c0_79, %c0_80] : memref<2x32x64xbf16, #tpu.memory_space<vmem>>, vector<1x32x64xbf16>
    %205 = vector.shape_cast %204 : vector<1x32x64xbf16> to vector<32x64xbf16>
    %cst_81 = arith.constant dense<0.000000e+00> : vector<8x64xf32>
    %206 = tpu.matmul %203, %205, %cst_81 {dimension_numbers = #tpu.dot_dimension_numbers<[1], [0], [0], [1], [0, 0, 1, 1], [], []>} : vector<8x32xbf16>, vector<32x64xbf16>, vector<8x64xf32> -> vector<8x64xf32>
    %c0_82 = arith.constant 0 : index
    %c0_83 = arith.constant 0 : index
    %c0_84 = arith.constant 0 : index
    %207 = vector.load %arg20[%c0_82, %c0_83, %c0_84] : memref<2x1x64xf32, #tpu.memory_space<vmem>>, vector<1x1x64xf32>
    %208 = vector.shape_cast %207 : vector<1x1x64xf32> to vector<1x64xf32>
    %209 = vector.broadcast %208 : vector<1x64xf32> to vector<8x64xf32>
    %210 = arith.addf %206, %209 : vector<8x64xf32>
    %cst_85 = arith.constant 0.000000e+00 : f32
    %211 = vector.broadcast %cst_85 : f32 to vector<8x64xf32>
    %212 = arith.maximumf %210, %211 : vector<8x64xf32>
    %213 = arith.truncf %212 : vector<8x64xf32> to vector<8x64xbf16>
    %c0_86 = arith.constant 0 : index
    %c0_87 = arith.constant 0 : index
    %c0_88 = arith.constant 0 : index
    %214 = vector.load %arg21[%c0_86, %c0_87, %c0_88] : memref<2x64x32xbf16, #tpu.memory_space<vmem>>, vector<1x64x32xbf16>
    %215 = vector.shape_cast %214 : vector<1x64x32xbf16> to vector<64x32xbf16>
    %cst_89 = arith.constant dense<0.000000e+00> : vector<8x32xf32>
    %216 = tpu.matmul %213, %215, %cst_89 {dimension_numbers = #tpu.dot_dimension_numbers<[1], [0], [0], [1], [0, 0, 1, 1], [], []>} : vector<8x64xbf16>, vector<64x32xbf16>, vector<8x32xf32> -> vector<8x32xf32>
    %c0_90 = arith.constant 0 : index
    %c0_91 = arith.constant 0 : index
    %c0_92 = arith.constant 0 : index
    %217 = vector.load %arg22[%c0_90, %c0_91, %c0_92] : memref<2x1x32xf32, #tpu.memory_space<vmem>>, vector<1x1x32xf32>
    %218 = vector.shape_cast %217 : vector<1x1x32xf32> to vector<1x32xf32>
    %219 = vector.broadcast %218 : vector<1x32xf32> to vector<8x32xf32>
    %220 = arith.addf %216, %219 : vector<8x32xf32>
    %221 = arith.addf %202, %220 : vector<8x32xf32>
    %c0_93 = arith.constant 0 : index
    %c0_94 = arith.constant 0 : index
    %c0_95 = arith.constant 0 : index
    %222 = vector.load %arg23[%c0_93, %c0_94, %c0_95] : memref<2x1x32xf32, #tpu.memory_space<vmem>>, vector<1x1x32xf32>
    %223 = vector.shape_cast %222 : vector<1x1x32xf32> to vector<1x32xf32>
    %c0_96 = arith.constant 0 : index
    %c0_97 = arith.constant 0 : index
    %c0_98 = arith.constant 0 : index
    %224 = vector.load %arg24[%c0_96, %c0_97, %c0_98] : memref<2x1x32xf32, #tpu.memory_space<vmem>>, vector<1x1x32xf32>
    %225 = vector.shape_cast %224 : vector<1x1x32xf32> to vector<1x32xf32>
    %cst_99 = arith.constant dense<0.000000e+00> : vector<8xf32>
    %226 = vector.multi_reduction <add>, %221, %cst_99 [1] : vector<8x32xf32> to vector<8xf32>
    %227 = vector.shape_cast %226 : vector<8xf32> to vector<8x1xf32>
    %cst_100 = arith.constant 3.200000e+01 : f32
    %228 = vector.broadcast %cst_100 : f32 to vector<8x1xf32>
    %229 = arith.divf %227, %228 : vector<8x1xf32>
    %230 = vector.broadcast %229 : vector<8x1xf32> to vector<8x32xf32>
    %231 = arith.subf %221, %230 : vector<8x32xf32>
    %232 = arith.mulf %231, %231 : vector<8x32xf32>
    %cst_101 = arith.constant dense<0.000000e+00> : vector<8xf32>
    %233 = vector.multi_reduction <add>, %232, %cst_101 [1] : vector<8x32xf32> to vector<8xf32>
    %234 = vector.shape_cast %233 : vector<8xf32> to vector<8x1xf32>
    %cst_102 = arith.constant 3.200000e+01 : f32
    %235 = vector.broadcast %cst_102 : f32 to vector<8x1xf32>
    %236 = arith.divf %234, %235 : vector<8x1xf32>
    %cst_103 = arith.constant 9.99999974E-6 : f32
    %237 = vector.broadcast %cst_103 : f32 to vector<8x1xf32>
    %238 = arith.addf %236, %237 : vector<8x1xf32>
    %239 = math.rsqrt %238 : vector<8x1xf32>
    %240 = vector.broadcast %239 : vector<8x1xf32> to vector<8x32xf32>
    %241 = arith.mulf %231, %240 : vector<8x32xf32>
    %242 = vector.broadcast %223 : vector<1x32xf32> to vector<8x32xf32>
    %243 = arith.mulf %241, %242 : vector<8x32xf32>
    %244 = vector.broadcast %225 : vector<1x32xf32> to vector<8x32xf32>
    %245 = arith.addf %243, %244 : vector<8x32xf32>
    %246 = arith.truncf %245 : vector<8x32xf32> to vector<8x32xbf16>
    %c1 = arith.constant 1 : index
    %c0_104 = arith.constant 0 : index
    %c0_105 = arith.constant 0 : index
    %247 = vector.load %arg3[%c1, %c0_104, %c0_105] : memref<2x32x32xbf16, #tpu.memory_space<vmem>>, vector<1x32x32xbf16>
    %248 = vector.shape_cast %247 : vector<1x32x32xbf16> to vector<32x32xbf16>
    %c1_106 = arith.constant 1 : index
    %c0_107 = arith.constant 0 : index
    %c0_108 = arith.constant 0 : index
    %249 = vector.load %arg4[%c1_106, %c0_107, %c0_108] : memref<2x1x32xf32, #tpu.memory_space<vmem>>, vector<1x1x32xf32>
    %250 = vector.shape_cast %249 : vector<1x1x32xf32> to vector<1x32xf32>
    %c1_109 = arith.constant 1 : index
    %c0_110 = arith.constant 0 : index
    %c0_111 = arith.constant 0 : index
    %251 = vector.load %arg5[%c1_109, %c0_110, %c0_111] : memref<2x32x32xbf16, #tpu.memory_space<vmem>>, vector<1x32x32xbf16>
    %252 = vector.shape_cast %251 : vector<1x32x32xbf16> to vector<32x32xbf16>
    %c1_112 = arith.constant 1 : index
    %c0_113 = arith.constant 0 : index
    %c0_114 = arith.constant 0 : index
    %253 = vector.load %arg6[%c1_112, %c0_113, %c0_114] : memref<2x32x32xbf16, #tpu.memory_space<vmem>>, vector<1x32x32xbf16>
    %254 = vector.shape_cast %253 : vector<1x32x32xbf16> to vector<32x32xbf16>
    %c1_115 = arith.constant 1 : index
    %c0_116 = arith.constant 0 : index
    %c0_117 = arith.constant 0 : index
    %255 = vector.load %arg7[%c1_115, %c0_116, %c0_117] : memref<2x32x32xbf16, #tpu.memory_space<vmem>>, vector<1x32x32xbf16>
    %256 = vector.shape_cast %255 : vector<1x32x32xbf16> to vector<32x32xbf16>
    %c1_118 = arith.constant 1 : index
    %c0_119 = arith.constant 0 : index
    %c0_120 = arith.constant 0 : index
    %257 = vector.load %arg8[%c1_118, %c0_119, %c0_120] : memref<2x1x32xf32, #tpu.memory_space<vmem>>, vector<1x1x32xf32>
    %258 = vector.shape_cast %257 : vector<1x1x32xf32> to vector<1x32xf32>
    %cst_121 = arith.constant dense<0.000000e+00> : vector<8x32xf32>
    %259 = tpu.matmul %246, %248, %cst_121 {dimension_numbers = #tpu.dot_dimension_numbers<[1], [0], [0], [1], [0, 0, 1, 1], [], []>} : vector<8x32xbf16>, vector<32x32xbf16>, vector<8x32xf32> -> vector<8x32xf32>
    %260 = vector.broadcast %250 : vector<1x32xf32> to vector<8x32xf32>
    %261 = arith.addf %259, %260 : vector<8x32xf32>
    %cst_122 = arith.constant dense<0.000000e+00> : vector<8x32xf32>
    %262 = tpu.matmul %246, %252, %cst_122 {dimension_numbers = #tpu.dot_dimension_numbers<[1], [0], [0], [1], [0, 0, 1, 1], [], []>} : vector<8x32xbf16>, vector<32x32xbf16>, vector<8x32xf32> -> vector<8x32xf32>
    %cst_123 = arith.constant dense<0.000000e+00> : vector<8x32xf32>
    %263 = tpu.matmul %246, %254, %cst_123 {dimension_numbers = #tpu.dot_dimension_numbers<[1], [0], [0], [1], [0, 0, 1, 1], [], []>} : vector<8x32xbf16>, vector<32x32xbf16>, vector<8x32xf32> -> vector<8x32xf32>
    %264 = vector.extract_strided_slice %261 {offsets = [0, 0], sizes = [8, 8], strides = [1, 1]} : vector<8x32xf32> to vector<8x8xf32>
    %265 = vector.extract_strided_slice %261 {offsets = [0, 8], sizes = [8, 8], strides = [1, 1]} : vector<8x32xf32> to vector<8x8xf32>
    %266 = vector.extract_strided_slice %261 {offsets = [0, 16], sizes = [8, 8], strides = [1, 1]} : vector<8x32xf32> to vector<8x8xf32>
    %267 = vector.extract_strided_slice %261 {offsets = [0, 24], sizes = [8, 8], strides = [1, 1]} : vector<8x32xf32> to vector<8x8xf32>
    %268 = vector.shape_cast %264 : vector<8x8xf32> to vector<1x8x8xf32>
    %269 = vector.shape_cast %265 : vector<8x8xf32> to vector<1x8x8xf32>
    %270 = vector.shape_cast %266 : vector<8x8xf32> to vector<1x8x8xf32>
    %271 = vector.shape_cast %267 : vector<8x8xf32> to vector<1x8x8xf32>
    %272 = tpu.concatenate %268, %269, %270, %271 in 0 : vector<1x8x8xf32>, vector<1x8x8xf32>, vector<1x8x8xf32>, vector<1x8x8xf32> -> vector<4x8x8xf32>
    %273 = arith.truncf %272 : vector<4x8x8xf32> to vector<4x8x8xbf16>
    %274 = vector.extract_strided_slice %262 {offsets = [0, 0], sizes = [8, 8], strides = [1, 1]} : vector<8x32xf32> to vector<8x8xf32>
    %275 = vector.extract_strided_slice %262 {offsets = [0, 8], sizes = [8, 8], strides = [1, 1]} : vector<8x32xf32> to vector<8x8xf32>
    %276 = vector.extract_strided_slice %262 {offsets = [0, 16], sizes = [8, 8], strides = [1, 1]} : vector<8x32xf32> to vector<8x8xf32>
    %277 = vector.extract_strided_slice %262 {offsets = [0, 24], sizes = [8, 8], strides = [1, 1]} : vector<8x32xf32> to vector<8x8xf32>
    %278 = vector.shape_cast %274 : vector<8x8xf32> to vector<1x8x8xf32>
    %279 = vector.shape_cast %275 : vector<8x8xf32> to vector<1x8x8xf32>
    %280 = vector.shape_cast %276 : vector<8x8xf32> to vector<1x8x8xf32>
    %281 = vector.shape_cast %277 : vector<8x8xf32> to vector<1x8x8xf32>
    %282 = tpu.concatenate %278, %279, %280, %281 in 0 : vector<1x8x8xf32>, vector<1x8x8xf32>, vector<1x8x8xf32>, vector<1x8x8xf32> -> vector<4x8x8xf32>
    %283 = arith.truncf %282 : vector<4x8x8xf32> to vector<4x8x8xbf16>
    %284 = vector.extract_strided_slice %263 {offsets = [0, 0], sizes = [8, 8], strides = [1, 1]} : vector<8x32xf32> to vector<8x8xf32>
    %285 = vector.extract_strided_slice %263 {offsets = [0, 8], sizes = [8, 8], strides = [1, 1]} : vector<8x32xf32> to vector<8x8xf32>
    %286 = vector.extract_strided_slice %263 {offsets = [0, 16], sizes = [8, 8], strides = [1, 1]} : vector<8x32xf32> to vector<8x8xf32>
    %287 = vector.extract_strided_slice %263 {offsets = [0, 24], sizes = [8, 8], strides = [1, 1]} : vector<8x32xf32> to vector<8x8xf32>
    %288 = vector.shape_cast %284 : vector<8x8xf32> to vector<1x8x8xf32>
    %289 = vector.shape_cast %285 : vector<8x8xf32> to vector<1x8x8xf32>
    %290 = vector.shape_cast %286 : vector<8x8xf32> to vector<1x8x8xf32>
    %291 = vector.shape_cast %287 : vector<8x8xf32> to vector<1x8x8xf32>
    %292 = tpu.concatenate %288, %289, %290, %291 in 0 : vector<1x8x8xf32>, vector<1x8x8xf32>, vector<1x8x8xf32>, vector<1x8x8xf32> -> vector<4x8x8xf32>
    %293 = arith.truncf %292 : vector<4x8x8xf32> to vector<4x8x8xbf16>
    "tpu.trace_start"() <{level = 10 : i32, message = "hsd,hmd->hsm"}> : () -> ()
    %cst_124 = arith.constant dense<0.000000e+00> : vector<4x8x8xf32>
    %294 = tpu.matmul %273, %283, %cst_124 {dimension_numbers = #tpu.dot_dimension_numbers<[2], [2], [1], [1], [0, 0, 0, 1, 1, 1], [0], [0]>} : vector<4x8x8xbf16>, vector<4x8x8xbf16>, vector<4x8x8xf32> -> vector<4x8x8xf32>
    "tpu.trace_stop"() : () -> ()
    %cst_125 = arith.constant dense<0xFF800000> : vector<4x8xf32>
    %295 = vector.multi_reduction <maximumf>, %294, %cst_125 [2] : vector<4x8x8xf32> to vector<4x8xf32>
    %296 = vector.shape_cast %295 : vector<4x8xf32> to vector<4x8x1xf32>
    %297 = vector.broadcast %296 : vector<4x8x1xf32> to vector<4x8x8xf32>
    %298 = arith.subf %294, %297 : vector<4x8x8xf32>
    %299 = math.exp %298 : vector<4x8x8xf32>
    %cst_126 = arith.constant dense<0.000000e+00> : vector<4x8xf32>
    %300 = vector.multi_reduction <add>, %299, %cst_126 [2] : vector<4x8x8xf32> to vector<4x8xf32>
    %301 = vector.shape_cast %300 : vector<4x8xf32> to vector<4x8x1xf32>
    %302 = tpu.reciprocal %301 {approx = true} : vector<4x8x1xf32> -> vector<4x8x1xf32>
    %303 = vector.broadcast %302 : vector<4x8x1xf32> to vector<4x8x8xf32>
    %304 = arith.mulf %299, %303 : vector<4x8x8xf32>
    %305 = arith.truncf %304 : vector<4x8x8xf32> to vector<4x8x8xbf16>
    "tpu.trace_start"() <{level = 10 : i32, message = "hsm,hmd->hsd"}> : () -> ()
    %cst_127 = arith.constant dense<0.000000e+00> : vector<4x8x8xf32>
    %306 = tpu.matmul %305, %293, %cst_127 {dimension_numbers = #tpu.dot_dimension_numbers<[2], [1], [1], [2], [0, 0, 0, 1, 1, 2], [0], [0]>} : vector<4x8x8xbf16>, vector<4x8x8xbf16>, vector<4x8x8xf32> -> vector<4x8x8xf32>
    "tpu.trace_stop"() : () -> ()
    %307 = vector.extract_strided_slice %306 {offsets = [0, 0, 0], sizes = [1, 8, 8], strides = [1, 1, 1]} : vector<4x8x8xf32> to vector<1x8x8xf32>
    %308 = vector.shape_cast %307 : vector<1x8x8xf32> to vector<8x8xf32>
    %309 = vector.extract_strided_slice %306 {offsets = [1, 0, 0], sizes = [1, 8, 8], strides = [1, 1, 1]} : vector<4x8x8xf32> to vector<1x8x8xf32>
    %310 = vector.shape_cast %309 : vector<1x8x8xf32> to vector<8x8xf32>
    %311 = vector.extract_strided_slice %306 {offsets = [2, 0, 0], sizes = [1, 8, 8], strides = [1, 1, 1]} : vector<4x8x8xf32> to vector<1x8x8xf32>
    %312 = vector.shape_cast %311 : vector<1x8x8xf32> to vector<8x8xf32>
    %313 = vector.extract_strided_slice %306 {offsets = [3, 0, 0], sizes = [1, 8, 8], strides = [1, 1, 1]} : vector<4x8x8xf32> to vector<1x8x8xf32>
    %314 = vector.shape_cast %313 : vector<1x8x8xf32> to vector<8x8xf32>
    %315 = tpu.concatenate %308, %310, %312, %314 in 1 : vector<8x8xf32>, vector<8x8xf32>, vector<8x8xf32>, vector<8x8xf32> -> vector<8x32xf32>
    %316 = arith.truncf %315 : vector<8x32xf32> to vector<8x32xbf16>
    %cst_128 = arith.constant dense<0.000000e+00> : vector<8x32xf32>
    %317 = tpu.matmul %316, %256, %cst_128 {dimension_numbers = #tpu.dot_dimension_numbers<[1], [0], [0], [1], [0, 0, 1, 1], [], []>} : vector<8x32xbf16>, vector<32x32xbf16>, vector<8x32xf32> -> vector<8x32xf32>
    %318 = vector.broadcast %258 : vector<1x32xf32> to vector<8x32xf32>
    %319 = arith.addf %317, %318 : vector<8x32xf32>
    %320 = arith.addf %245, %319 : vector<8x32xf32>
    %c1_129 = arith.constant 1 : index
    %c0_130 = arith.constant 0 : index
    %c0_131 = arith.constant 0 : index
    %321 = vector.load %arg9[%c1_129, %c0_130, %c0_131] : memref<2x1x32xf32, #tpu.memory_space<vmem>>, vector<1x1x32xf32>
    %322 = vector.shape_cast %321 : vector<1x1x32xf32> to vector<1x32xf32>
    %c1_132 = arith.constant 1 : index
    %c0_133 = arith.constant 0 : index
    %c0_134 = arith.constant 0 : index
    %323 = vector.load %arg10[%c1_132, %c0_133, %c0_134] : memref<2x1x32xf32, #tpu.memory_space<vmem>>, vector<1x1x32xf32>
    %324 = vector.shape_cast %323 : vector<1x1x32xf32> to vector<1x32xf32>
    %cst_135 = arith.constant dense<0.000000e+00> : vector<8xf32>
    %325 = vector.multi_reduction <add>, %320, %cst_135 [1] : vector<8x32xf32> to vector<8xf32>
    %326 = vector.shape_cast %325 : vector<8xf32> to vector<8x1xf32>
    %cst_136 = arith.constant 3.200000e+01 : f32
    %327 = vector.broadcast %cst_136 : f32 to vector<8x1xf32>
    %328 = arith.divf %326, %327 : vector<8x1xf32>
    %329 = vector.broadcast %328 : vector<8x1xf32> to vector<8x32xf32>
    %330 = arith.subf %320, %329 : vector<8x32xf32>
    %331 = arith.mulf %330, %330 : vector<8x32xf32>
    %cst_137 = arith.constant dense<0.000000e+00> : vector<8xf32>
    %332 = vector.multi_reduction <add>, %331, %cst_137 [1] : vector<8x32xf32> to vector<8xf32>
    %333 = vector.shape_cast %332 : vector<8xf32> to vector<8x1xf32>
    %cst_138 = arith.constant 3.200000e+01 : f32
    %334 = vector.broadcast %cst_138 : f32 to vector<8x1xf32>
    %335 = arith.divf %333, %334 : vector<8x1xf32>
    %cst_139 = arith.constant 9.99999974E-6 : f32
    %336 = vector.broadcast %cst_139 : f32 to vector<8x1xf32>
    %337 = arith.addf %335, %336 : vector<8x1xf32>
    %338 = math.rsqrt %337 : vector<8x1xf32>
    %339 = vector.broadcast %338 : vector<8x1xf32> to vector<8x32xf32>
    %340 = arith.mulf %330, %339 : vector<8x32xf32>
    %341 = vector.broadcast %322 : vector<1x32xf32> to vector<8x32xf32>
    %342 = arith.mulf %340, %341 : vector<8x32xf32>
    %343 = vector.broadcast %324 : vector<1x32xf32> to vector<8x32xf32>
    %344 = arith.addf %342, %343 : vector<8x32xf32>
    %345 = arith.truncf %344 : vector<8x32xf32> to vector<8x32xbf16>
    %c1_140 = arith.constant 1 : index
    %c0_141 = arith.constant 0 : index
    %c0_142 = arith.constant 0 : index
    %346 = vector.load %arg11[%c1_140, %c0_141, %c0_142] : memref<2x32x32xbf16, #tpu.memory_space<vmem>>, vector<1x32x32xbf16>
    %347 = vector.shape_cast %346 : vector<1x32x32xbf16> to vector<32x32xbf16>
    %c1_143 = arith.constant 1 : index
    %c0_144 = arith.constant 0 : index
    %c0_145 = arith.constant 0 : index
    %348 = vector.load %arg12[%c1_143, %c0_144, %c0_145] : memref<2x1x32xf32, #tpu.memory_space<vmem>>, vector<1x1x32xf32>
    %349 = vector.shape_cast %348 : vector<1x1x32xf32> to vector<1x32xf32>
    %c1_146 = arith.constant 1 : index
    %c0_147 = arith.constant 0 : index
    %c0_148 = arith.constant 0 : index
    %350 = vector.load %arg13[%c1_146, %c0_147, %c0_148] : memref<2x32x32xbf16, #tpu.memory_space<vmem>>, vector<1x32x32xbf16>
    %351 = vector.shape_cast %350 : vector<1x32x32xbf16> to vector<32x32xbf16>
    %c1_149 = arith.constant 1 : index
    %c0_150 = arith.constant 0 : index
    %c0_151 = arith.constant 0 : index
    %352 = vector.load %arg14[%c1_149, %c0_150, %c0_151] : memref<2x32x32xbf16, #tpu.memory_space<vmem>>, vector<1x32x32xbf16>
    %353 = vector.shape_cast %352 : vector<1x32x32xbf16> to vector<32x32xbf16>
    %c1_152 = arith.constant 1 : index
    %c0_153 = arith.constant 0 : index
    %c0_154 = arith.constant 0 : index
    %354 = vector.load %arg15[%c1_152, %c0_153, %c0_154] : memref<2x32x32xbf16, #tpu.memory_space<vmem>>, vector<1x32x32xbf16>
    %355 = vector.shape_cast %354 : vector<1x32x32xbf16> to vector<32x32xbf16>
    %c1_155 = arith.constant 1 : index
    %c0_156 = arith.constant 0 : index
    %c0_157 = arith.constant 0 : index
    %356 = vector.load %arg16[%c1_155, %c0_156, %c0_157] : memref<2x1x32xf32, #tpu.memory_space<vmem>>, vector<1x1x32xf32>
    %357 = vector.shape_cast %356 : vector<1x1x32xf32> to vector<1x32xf32>
    %cst_158 = arith.constant dense<0.000000e+00> : vector<8x32xf32>
    %358 = tpu.matmul %345, %347, %cst_158 {dimension_numbers = #tpu.dot_dimension_numbers<[1], [0], [0], [1], [0, 0, 1, 1], [], []>} : vector<8x32xbf16>, vector<32x32xbf16>, vector<8x32xf32> -> vector<8x32xf32>
    %359 = vector.broadcast %349 : vector<1x32xf32> to vector<8x32xf32>
    %360 = arith.addf %358, %359 : vector<8x32xf32>
    %cst_159 = arith.constant dense<0.000000e+00> : vector<16x32xf32>
    %361 = tpu.matmul %4, %351, %cst_159 {dimension_numbers = #tpu.dot_dimension_numbers<[1], [0], [0], [1], [0, 0, 1, 1], [], []>} : vector<16x32xbf16>, vector<32x32xbf16>, vector<16x32xf32> -> vector<16x32xf32>
    %cst_160 = arith.constant dense<0.000000e+00> : vector<16x32xf32>
    %362 = tpu.matmul %4, %353, %cst_160 {dimension_numbers = #tpu.dot_dimension_numbers<[1], [0], [0], [1], [0, 0, 1, 1], [], []>} : vector<16x32xbf16>, vector<32x32xbf16>, vector<16x32xf32> -> vector<16x32xf32>
    %363 = vector.extract_strided_slice %360 {offsets = [0, 0], sizes = [8, 8], strides = [1, 1]} : vector<8x32xf32> to vector<8x8xf32>
    %364 = vector.extract_strided_slice %360 {offsets = [0, 8], sizes = [8, 8], strides = [1, 1]} : vector<8x32xf32> to vector<8x8xf32>
    %365 = vector.extract_strided_slice %360 {offsets = [0, 16], sizes = [8, 8], strides = [1, 1]} : vector<8x32xf32> to vector<8x8xf32>
    %366 = vector.extract_strided_slice %360 {offsets = [0, 24], sizes = [8, 8], strides = [1, 1]} : vector<8x32xf32> to vector<8x8xf32>
    %367 = vector.shape_cast %363 : vector<8x8xf32> to vector<1x8x8xf32>
    %368 = vector.shape_cast %364 : vector<8x8xf32> to vector<1x8x8xf32>
    %369 = vector.shape_cast %365 : vector<8x8xf32> to vector<1x8x8xf32>
    %370 = vector.shape_cast %366 : vector<8x8xf32> to vector<1x8x8xf32>
    %371 = tpu.concatenate %367, %368, %369, %370 in 0 : vector<1x8x8xf32>, vector<1x8x8xf32>, vector<1x8x8xf32>, vector<1x8x8xf32> -> vector<4x8x8xf32>
    %372 = arith.truncf %371 : vector<4x8x8xf32> to vector<4x8x8xbf16>
    %373 = vector.extract_strided_slice %361 {offsets = [0, 0], sizes = [16, 8], strides = [1, 1]} : vector<16x32xf32> to vector<16x8xf32>
    %374 = vector.extract_strided_slice %361 {offsets = [0, 8], sizes = [16, 8], strides = [1, 1]} : vector<16x32xf32> to vector<16x8xf32>
    %375 = vector.extract_strided_slice %361 {offsets = [0, 16], sizes = [16, 8], strides = [1, 1]} : vector<16x32xf32> to vector<16x8xf32>
    %376 = vector.extract_strided_slice %361 {offsets = [0, 24], sizes = [16, 8], strides = [1, 1]} : vector<16x32xf32> to vector<16x8xf32>
    %377 = vector.shape_cast %373 : vector<16x8xf32> to vector<1x16x8xf32>
    %378 = vector.shape_cast %374 : vector<16x8xf32> to vector<1x16x8xf32>
    %379 = vector.shape_cast %375 : vector<16x8xf32> to vector<1x16x8xf32>
    %380 = vector.shape_cast %376 : vector<16x8xf32> to vector<1x16x8xf32>
    %381 = tpu.concatenate %377, %378, %379, %380 in 0 : vector<1x16x8xf32>, vector<1x16x8xf32>, vector<1x16x8xf32>, vector<1x16x8xf32> -> vector<4x16x8xf32>
    %382 = arith.truncf %381 : vector<4x16x8xf32> to vector<4x16x8xbf16>
    %383 = vector.extract_strided_slice %362 {offsets = [0, 0], sizes = [16, 8], strides = [1, 1]} : vector<16x32xf32> to vector<16x8xf32>
    %384 = vector.extract_strided_slice %362 {offsets = [0, 8], sizes = [16, 8], strides = [1, 1]} : vector<16x32xf32> to vector<16x8xf32>
    %385 = vector.extract_strided_slice %362 {offsets = [0, 16], sizes = [16, 8], strides = [1, 1]} : vector<16x32xf32> to vector<16x8xf32>
    %386 = vector.extract_strided_slice %362 {offsets = [0, 24], sizes = [16, 8], strides = [1, 1]} : vector<16x32xf32> to vector<16x8xf32>
    %387 = vector.shape_cast %383 : vector<16x8xf32> to vector<1x16x8xf32>
    %388 = vector.shape_cast %384 : vector<16x8xf32> to vector<1x16x8xf32>
    %389 = vector.shape_cast %385 : vector<16x8xf32> to vector<1x16x8xf32>
    %390 = vector.shape_cast %386 : vector<16x8xf32> to vector<1x16x8xf32>
    %391 = tpu.concatenate %387, %388, %389, %390 in 0 : vector<1x16x8xf32>, vector<1x16x8xf32>, vector<1x16x8xf32>, vector<1x16x8xf32> -> vector<4x16x8xf32>
    %392 = arith.truncf %391 : vector<4x16x8xf32> to vector<4x16x8xbf16>
    "tpu.trace_start"() <{level = 10 : i32, message = "hsd,hmd->hsm"}> : () -> ()
    %cst_161 = arith.constant dense<0.000000e+00> : vector<4x8x16xf32>
    %393 = tpu.matmul %372, %382, %cst_161 {dimension_numbers = #tpu.dot_dimension_numbers<[2], [2], [1], [1], [0, 0, 0, 1, 1, 1], [0], [0]>} : vector<4x8x8xbf16>, vector<4x16x8xbf16>, vector<4x8x16xf32> -> vector<4x8x16xf32>
    "tpu.trace_stop"() : () -> ()
    %cst_162 = arith.constant dense<0xFF800000> : vector<4x8xf32>
    %394 = vector.multi_reduction <maximumf>, %393, %cst_162 [2] : vector<4x8x16xf32> to vector<4x8xf32>
    %395 = vector.shape_cast %394 : vector<4x8xf32> to vector<4x8x1xf32>
    %396 = vector.broadcast %395 : vector<4x8x1xf32> to vector<4x8x16xf32>
    %397 = arith.subf %393, %396 : vector<4x8x16xf32>
    %398 = math.exp %397 : vector<4x8x16xf32>
    %cst_163 = arith.constant dense<0.000000e+00> : vector<4x8xf32>
    %399 = vector.multi_reduction <add>, %398, %cst_163 [2] : vector<4x8x16xf32> to vector<4x8xf32>
    %400 = vector.shape_cast %399 : vector<4x8xf32> to vector<4x8x1xf32>
    %401 = tpu.reciprocal %400 {approx = true} : vector<4x8x1xf32> -> vector<4x8x1xf32>
    %402 = vector.broadcast %401 : vector<4x8x1xf32> to vector<4x8x16xf32>
    %403 = arith.mulf %398, %402 : vector<4x8x16xf32>
    %404 = arith.truncf %403 : vector<4x8x16xf32> to vector<4x8x16xbf16>
    "tpu.trace_start"() <{level = 10 : i32, message = "hsm,hmd->hsd"}> : () -> ()
    %cst_164 = arith.constant dense<0.000000e+00> : vector<4x8x8xf32>
    %405 = tpu.matmul %404, %392, %cst_164 {dimension_numbers = #tpu.dot_dimension_numbers<[2], [1], [1], [2], [0, 0, 0, 1, 1, 2], [0], [0]>} : vector<4x8x16xbf16>, vector<4x16x8xbf16>, vector<4x8x8xf32> -> vector<4x8x8xf32>
    "tpu.trace_stop"() : () -> ()
    %406 = vector.extract_strided_slice %405 {offsets = [0, 0, 0], sizes = [1, 8, 8], strides = [1, 1, 1]} : vector<4x8x8xf32> to vector<1x8x8xf32>
    %407 = vector.shape_cast %406 : vector<1x8x8xf32> to vector<8x8xf32>
    %408 = vector.extract_strided_slice %405 {offsets = [1, 0, 0], sizes = [1, 8, 8], strides = [1, 1, 1]} : vector<4x8x8xf32> to vector<1x8x8xf32>
    %409 = vector.shape_cast %408 : vector<1x8x8xf32> to vector<8x8xf32>
    %410 = vector.extract_strided_slice %405 {offsets = [2, 0, 0], sizes = [1, 8, 8], strides = [1, 1, 1]} : vector<4x8x8xf32> to vector<1x8x8xf32>
    %411 = vector.shape_cast %410 : vector<1x8x8xf32> to vector<8x8xf32>
    %412 = vector.extract_strided_slice %405 {offsets = [3, 0, 0], sizes = [1, 8, 8], strides = [1, 1, 1]} : vector<4x8x8xf32> to vector<1x8x8xf32>
    %413 = vector.shape_cast %412 : vector<1x8x8xf32> to vector<8x8xf32>
    %414 = tpu.concatenate %407, %409, %411, %413 in 1 : vector<8x8xf32>, vector<8x8xf32>, vector<8x8xf32>, vector<8x8xf32> -> vector<8x32xf32>
    %415 = arith.truncf %414 : vector<8x32xf32> to vector<8x32xbf16>
    %cst_165 = arith.constant dense<0.000000e+00> : vector<8x32xf32>
    %416 = tpu.matmul %415, %355, %cst_165 {dimension_numbers = #tpu.dot_dimension_numbers<[1], [0], [0], [1], [0, 0, 1, 1], [], []>} : vector<8x32xbf16>, vector<32x32xbf16>, vector<8x32xf32> -> vector<8x32xf32>
    %417 = vector.broadcast %357 : vector<1x32xf32> to vector<8x32xf32>
    %418 = arith.addf %416, %417 : vector<8x32xf32>
    %419 = arith.addf %344, %418 : vector<8x32xf32>
    %c1_166 = arith.constant 1 : index
    %c0_167 = arith.constant 0 : index
    %c0_168 = arith.constant 0 : index
    %420 = vector.load %arg17[%c1_166, %c0_167, %c0_168] : memref<2x1x32xf32, #tpu.memory_space<vmem>>, vector<1x1x32xf32>
    %421 = vector.shape_cast %420 : vector<1x1x32xf32> to vector<1x32xf32>
    %c1_169 = arith.constant 1 : index
    %c0_170 = arith.constant 0 : index
    %c0_171 = arith.constant 0 : index
    %422 = vector.load %arg18[%c1_169, %c0_170, %c0_171] : memref<2x1x32xf32, #tpu.memory_space<vmem>>, vector<1x1x32xf32>
    %423 = vector.shape_cast %422 : vector<1x1x32xf32> to vector<1x32xf32>
    %cst_172 = arith.constant dense<0.000000e+00> : vector<8xf32>
    %424 = vector.multi_reduction <add>, %419, %cst_172 [1] : vector<8x32xf32> to vector<8xf32>
    %425 = vector.shape_cast %424 : vector<8xf32> to vector<8x1xf32>
    %cst_173 = arith.constant 3.200000e+01 : f32
    %426 = vector.broadcast %cst_173 : f32 to vector<8x1xf32>
    %427 = arith.divf %425, %426 : vector<8x1xf32>
    %428 = vector.broadcast %427 : vector<8x1xf32> to vector<8x32xf32>
    %429 = arith.subf %419, %428 : vector<8x32xf32>
    %430 = arith.mulf %429, %429 : vector<8x32xf32>
    %cst_174 = arith.constant dense<0.000000e+00> : vector<8xf32>
    %431 = vector.multi_reduction <add>, %430, %cst_174 [1] : vector<8x32xf32> to vector<8xf32>
    %432 = vector.shape_cast %431 : vector<8xf32> to vector<8x1xf32>
    %cst_175 = arith.constant 3.200000e+01 : f32
    %433 = vector.broadcast %cst_175 : f32 to vector<8x1xf32>
    %434 = arith.divf %432, %433 : vector<8x1xf32>
    %cst_176 = arith.constant 9.99999974E-6 : f32
    %435 = vector.broadcast %cst_176 : f32 to vector<8x1xf32>
    %436 = arith.addf %434, %435 : vector<8x1xf32>
    %437 = math.rsqrt %436 : vector<8x1xf32>
    %438 = vector.broadcast %437 : vector<8x1xf32> to vector<8x32xf32>
    %439 = arith.mulf %429, %438 : vector<8x32xf32>
    %440 = vector.broadcast %421 : vector<1x32xf32> to vector<8x32xf32>
    %441 = arith.mulf %439, %440 : vector<8x32xf32>
    %442 = vector.broadcast %423 : vector<1x32xf32> to vector<8x32xf32>
    %443 = arith.addf %441, %442 : vector<8x32xf32>
    %444 = arith.truncf %443 : vector<8x32xf32> to vector<8x32xbf16>
    %c1_177 = arith.constant 1 : index
    %c0_178 = arith.constant 0 : index
    %c0_179 = arith.constant 0 : index
    %445 = vector.load %arg19[%c1_177, %c0_178, %c0_179] : memref<2x32x64xbf16, #tpu.memory_space<vmem>>, vector<1x32x64xbf16>
    %446 = vector.shape_cast %445 : vector<1x32x64xbf16> to vector<32x64xbf16>
    %cst_180 = arith.constant dense<0.000000e+00> : vector<8x64xf32>
    %447 = tpu.matmul %444, %446, %cst_180 {dimension_numbers = #tpu.dot_dimension_numbers<[1], [0], [0], [1], [0, 0, 1, 1], [], []>} : vector<8x32xbf16>, vector<32x64xbf16>, vector<8x64xf32> -> vector<8x64xf32>
    %c1_181 = arith.constant 1 : index
    %c0_182 = arith.constant 0 : index
    %c0_183 = arith.constant 0 : index
    %448 = vector.load %arg20[%c1_181, %c0_182, %c0_183] : memref<2x1x64xf32, #tpu.memory_space<vmem>>, vector<1x1x64xf32>
    %449 = vector.shape_cast %448 : vector<1x1x64xf32> to vector<1x64xf32>
    %450 = vector.broadcast %449 : vector<1x64xf32> to vector<8x64xf32>
    %451 = arith.addf %447, %450 : vector<8x64xf32>
    %cst_184 = arith.constant 0.000000e+00 : f32
    %452 = vector.broadcast %cst_184 : f32 to vector<8x64xf32>
    %453 = arith.maximumf %451, %452 : vector<8x64xf32>
    %454 = arith.truncf %453 : vector<8x64xf32> to vector<8x64xbf16>
    %c1_185 = arith.constant 1 : index
    %c0_186 = arith.constant 0 : index
    %c0_187 = arith.constant 0 : index
    %455 = vector.load %arg21[%c1_185, %c0_186, %c0_187] : memref<2x64x32xbf16, #tpu.memory_space<vmem>>, vector<1x64x32xbf16>
    %456 = vector.shape_cast %455 : vector<1x64x32xbf16> to vector<64x32xbf16>
    %cst_188 = arith.constant dense<0.000000e+00> : vector<8x32xf32>
    %457 = tpu.matmul %454, %456, %cst_188 {dimension_numbers = #tpu.dot_dimension_numbers<[1], [0], [0], [1], [0, 0, 1, 1], [], []>} : vector<8x64xbf16>, vector<64x32xbf16>, vector<8x32xf32> -> vector<8x32xf32>
    %c1_189 = arith.constant 1 : index
    %c0_190 = arith.constant 0 : index
    %c0_191 = arith.constant 0 : index
    %458 = vector.load %arg22[%c1_189, %c0_190, %c0_191] : memref<2x1x32xf32, #tpu.memory_space<vmem>>, vector<1x1x32xf32>
    %459 = vector.shape_cast %458 : vector<1x1x32xf32> to vector<1x32xf32>
    %460 = vector.broadcast %459 : vector<1x32xf32> to vector<8x32xf32>
    %461 = arith.addf %457, %460 : vector<8x32xf32>
    %462 = arith.addf %443, %461 : vector<8x32xf32>
    %c1_192 = arith.constant 1 : index
    %c0_193 = arith.constant 0 : index
    %c0_194 = arith.constant 0 : index
    %463 = vector.load %arg23[%c1_192, %c0_193, %c0_194] : memref<2x1x32xf32, #tpu.memory_space<vmem>>, vector<1x1x32xf32>
    %464 = vector.shape_cast %463 : vector<1x1x32xf32> to vector<1x32xf32>
    %c1_195 = arith.constant 1 : index
    %c0_196 = arith.constant 0 : index
    %c0_197 = arith.constant 0 : index
    %465 = vector.load %arg24[%c1_195, %c0_196, %c0_197] : memref<2x1x32xf32, #tpu.memory_space<vmem>>, vector<1x1x32xf32>
    %466 = vector.shape_cast %465 : vector<1x1x32xf32> to vector<1x32xf32>
    %cst_198 = arith.constant dense<0.000000e+00> : vector<8xf32>
    %467 = vector.multi_reduction <add>, %462, %cst_198 [1] : vector<8x32xf32> to vector<8xf32>
    %468 = vector.shape_cast %467 : vector<8xf32> to vector<8x1xf32>
    %cst_199 = arith.constant 3.200000e+01 : f32
    %469 = vector.broadcast %cst_199 : f32 to vector<8x1xf32>
    %470 = arith.divf %468, %469 : vector<8x1xf32>
    %471 = vector.broadcast %470 : vector<8x1xf32> to vector<8x32xf32>
    %472 = arith.subf %462, %471 : vector<8x32xf32>
    %473 = arith.mulf %472, %472 : vector<8x32xf32>
    %cst_200 = arith.constant dense<0.000000e+00> : vector<8xf32>
    %474 = vector.multi_reduction <add>, %473, %cst_200 [1] : vector<8x32xf32> to vector<8xf32>
    %475 = vector.shape_cast %474 : vector<8xf32> to vector<8x1xf32>
    %cst_201 = arith.constant 3.200000e+01 : f32
    %476 = vector.broadcast %cst_201 : f32 to vector<8x1xf32>
    %477 = arith.divf %475, %476 : vector<8x1xf32>
    %cst_202 = arith.constant 9.99999974E-6 : f32
    %478 = vector.broadcast %cst_202 : f32 to vector<8x1xf32>
    %479 = arith.addf %477, %478 : vector<8x1xf32>
    %480 = math.rsqrt %479 : vector<8x1xf32>
    %481 = vector.broadcast %480 : vector<8x1xf32> to vector<8x32xf32>
    %482 = arith.mulf %472, %481 : vector<8x32xf32>
    %483 = vector.broadcast %464 : vector<1x32xf32> to vector<8x32xf32>
    %484 = arith.mulf %482, %483 : vector<8x32xf32>
    %485 = vector.broadcast %466 : vector<1x32xf32> to vector<8x32xf32>
    %486 = arith.addf %484, %485 : vector<8x32xf32>
    %487 = arith.truncf %486 : vector<8x32xf32> to vector<8x32xbf16>
    %c0_203 = arith.constant 0 : index
    %c0_204 = arith.constant 0 : index
    %488 = vector.load %arg25[%c0_203, %c0_204] : memref<32x128xbf16, #tpu.memory_space<vmem>>, vector<32x128xbf16>
    %cst_205 = arith.constant dense<0.000000e+00> : vector<8x128xf32>
    %489 = tpu.matmul %487, %488, %cst_205 {dimension_numbers = #tpu.dot_dimension_numbers<[1], [0], [0], [1], [0, 0, 1, 1], [], []>} : vector<8x32xbf16>, vector<32x128xbf16>, vector<8x128xf32> -> vector<8x128xf32>
    %c0_206 = arith.constant 0 : index
    %c0_207 = arith.constant 0 : index
    %490 = vector.load %arg26[%c0_206, %c0_207] : memref<1x128xf32, #tpu.memory_space<vmem>>, vector<1x128xf32>
    %491 = vector.broadcast %490 : vector<1x128xf32> to vector<8x128xf32>
    %492 = arith.addf %489, %491 : vector<8x128xf32>
    %493 = vector.shape_cast %492 : vector<8x128xf32> to vector<1x8x128xf32>
    %c0_208 = arith.constant 0 : index
    %c0_209 = arith.constant 0 : index
    %c0_210 = arith.constant 0 : index
    %494 = vector.load %arg27[%c0_208, %c0_209, %c0_210] : memref<1x8x128xf32, #tpu.memory_space<vmem>>, vector<1x8x128xf32>
    tpu.vector_store %arg27[%c0_208, %c0_209, %c0_210], %493 {strides = array<i32>} : memref<1x8x128xf32, #tpu.memory_space<vmem>>, vector<1x8x128xf32>,
    return
  }
  func.func @transform_0(%arg0: i32) -> (i32, i32, i32) {
    %c0_i32 = arith.constant 0 : i32
    %c0_i32_0 = arith.constant 0 : i32
    %c0_i32_1 = arith.constant 0 : i32
    %c0_i32_2 = arith.constant 0 : i32
    return %c0_i32, %c0_i32_0, %c0_i32_1 : i32, i32, i32
  }
  func.func @transform_1(%arg0: i32) -> (i32, i32, i32) {
    %c0_i32 = arith.constant 0 : i32
    %c0_i32_0 = arith.constant 0 : i32
    %c0_i32_1 = arith.constant 0 : i32
    return %arg0, %c0_i32, %c0_i32_0 : i32, i32, i32
  }
  func.func @transform_2(%arg0: i32) -> (i32, i32, i32) {
    %c0_i32 = arith.constant 0 : i32
    %c0_i32_0 = arith.constant 0 : i32
    %c0_i32_1 = arith.constant 0 : i32
    %c0_i32_2 = arith.constant 0 : i32
    return %c0_i32, %c0_i32_0, %c0_i32_1 : i32, i32, i32
  }
  func.func @transform_3(%arg0: i32) -> (i32, i32, i32) {
    %c0_i32 = arith.constant 0 : i32
    %c0_i32_0 = arith.constant 0 : i32
    %c0_i32_1 = arith.constant 0 : i32
    %c0_i32_2 = arith.constant 0 : i32
    return %c0_i32, %c0_i32_0, %c0_i32_1 : i32, i32, i32
  }
  func.func @transform_4(%arg0: i32) -> (i32, i32, i32) {
    %c0_i32 = arith.constant 0 : i32
    %c0_i32_0 = arith.constant 0 : i32
    %c0_i32_1 = arith.constant 0 : i32
    %c0_i32_2 = arith.constant 0 : i32
    return %c0_i32, %c0_i32_0, %c0_i32_1 : i32, i32, i32
  }
  func.func @transform_5(%arg0: i32) -> (i32, i32, i32) {
    %c0_i32 = arith.constant 0 : i32
    %c0_i32_0 = arith.constant 0 : i32
    %c0_i32_1 = arith.constant 0 : i32
    %c0_i32_2 = arith.constant 0 : i32
    return %c0_i32, %c0_i32_0, %c0_i32_1 : i32, i32, i32
  }
  func.func @transform_6(%arg0: i32) -> (i32, i32, i32) {
    %c0_i32 = arith.constant 0 : i32
    %c0_i32_0 = arith.constant 0 : i32
    %c0_i32_1 = arith.constant 0 : i32
    %c0_i32_2 = arith.constant 0 : i32
    return %c0_i32, %c0_i32_0, %c0_i32_1 : i32, i32, i32
  }
  func.func @transform_7(%arg0: i32) -> (i32, i32, i32) {
    %c0_i32 = arith.constant 0 : i32
    %c0_i32_0 = arith.constant 0 : i32
    %c0_i32_1 = arith.constant 0 : i32
    %c0_i32_2 = arith.constant 0 : i32
    return %c0_i32, %c0_i32_0, %c0_i32_1 : i32, i32, i32
  }
  func.func @transform_8(%arg0: i32) -> (i32, i32, i32) {
    %c0_i32 = arith.constant 0 : i32
    %c0_i32_0 = arith.constant 0 : i32
    %c0_i32_1 = arith.constant 0 : i32
    %c0_i32_2 = arith.constant 0 : i32
    return %c0_i32, %c0_i32_0, %c0_i32_1 : i32, i32, i32
  }
  func.func @transform_9(%arg0: i32) -> (i32, i32, i32) {
    %c0_i32 = arith.constant 0 : i32
    %c0_i32_0 = arith.constant 0 : i32
    %c0_i32_1 = arith.constant 0 : i32
    %c0_i32_2 = arith.constant 0 : i32
    return %c0_i32, %c0_i32_0, %c0_i32_1 : i32, i32, i32
  }
  func.func @transform_10(%arg0: i32) -> (i32, i32, i32) {
    %c0_i32 = arith.constant 0 : i32
    %c0_i32_0 = arith.constant 0 : i32
    %c0_i32_1 = arith.constant 0 : i32
    %c0_i32_2 = arith.constant 0 : i32
    return %c0_i32, %c0_i32_0, %c0_i32_1 : i32, i32, i32
  }
  func.func @transform_11(%arg0: i32) -> (i32, i32, i32) {
    %c0_i32 = arith.constant 0 : i32
    %c0_i32_0 = arith.constant 0 : i32
    %c0_i32_1 = arith.constant 0 : i32
    %c0_i32_2 = arith.constant 0 : i32
    return %c0_i32, %c0_i32_0, %c0_i32_1 : i32, i32, i32
  }
  func.func @transform_12(%arg0: i32) -> (i32, i32, i32) {
    %c0_i32 = arith.constant 0 : i32
    %c0_i32_0 = arith.constant 0 : i32
    %c0_i32_1 = arith.constant 0 : i32
    %c0_i32_2 = arith.constant 0 : i32
    return %c0_i32, %c0_i32_0, %c0_i32_1 : i32, i32, i32
  }
  func.func @transform_13(%arg0: i32) -> (i32, i32, i32) {
    %c0_i32 = arith.constant 0 : i32
    %c0_i32_0 = arith.constant 0 : i32
    %c0_i32_1 = arith.constant 0 : i32
    %c0_i32_2 = arith.constant 0 : i32
    return %c0_i32, %c0_i32_0, %c0_i32_1 : i32, i32, i32
  }
  func.func @transform_14(%arg0: i32) -> (i32, i32, i32) {
    %c0_i32 = arith.constant 0 : i32
    %c0_i32_0 = arith.constant 0 : i32
    %c0_i32_1 = arith.constant 0 : i32
    %c0_i32_2 = arith.constant 0 : i32
    return %c0_i32, %c0_i32_0, %c0_i32_1 : i32, i32, i32
  }
  func.func @transform_15(%arg0: i32) -> (i32, i32, i32) {
    %c0_i32 = arith.constant 0 : i32
    %c0_i32_0 = arith.constant 0 : i32
    %c0_i32_1 = arith.constant 0 : i32
    %c0_i32_2 = arith.constant 0 : i32
    return %c0_i32, %c0_i32_0, %c0_i32_1 : i32, i32, i32
  }
  func.func @transform_16(%arg0: i32) -> (i32, i32, i32) {
    %c0_i32 = arith.constant 0 : i32
    %c0_i32_0 = arith.constant 0 : i32
    %c0_i32_1 = arith.constant 0 : i32
    %c0_i32_2 = arith.constant 0 : i32
    return %c0_i32, %c0_i32_0, %c0_i32_1 : i32, i32, i32
  }
  func.func @transform_17(%arg0: i32) -> (i32, i32, i32) {
    %c0_i32 = arith.constant 0 : i32
    %c0_i32_0 = arith.constant 0 : i32
    %c0_i32_1 = arith.constant 0 : i32
    %c0_i32_2 = arith.constant 0 : i32
    return %c0_i32, %c0_i32_0, %c0_i32_1 : i32, i32, i32
  }
  func.func @transform_18(%arg0: i32) -> (i32, i32, i32) {
    %c0_i32 = arith.constant 0 : i32
    %c0_i32_0 = arith.constant 0 : i32
    %c0_i32_1 = arith.constant 0 : i32
    %c0_i32_2 = arith.constant 0 : i32
    return %c0_i32, %c0_i32_0, %c0_i32_1 : i32, i32, i32
  }
  func.func @transform_19(%arg0: i32) -> (i32, i32, i32) {
    %c0_i32 = arith.constant 0 : i32
    %c0_i32_0 = arith.constant 0 : i32
    %c0_i32_1 = arith.constant 0 : i32
    %c0_i32_2 = arith.constant 0 : i32
    return %c0_i32, %c0_i32_0, %c0_i32_1 : i32, i32, i32
  }
  func.func @transform_20(%arg0: i32) -> (i32, i32, i32) {
    %c0_i32 = arith.constant 0 : i32
    %c0_i32_0 = arith.constant 0 : i32
    %c0_i32_1 = arith.constant 0 : i32
    %c0_i32_2 = arith.constant 0 : i32
    return %c0_i32, %c0_i32_0, %c0_i32_1 : i32, i32, i32
  }
  func.func @transform_21(%arg0: i32) -> (i32, i32, i32) {
    %c0_i32 = arith.constant 0 : i32
    %c0_i32_0 = arith.constant 0 : i32
    %c0_i32_1 = arith.constant 0 : i32
    %c0_i32_2 = arith.constant 0 : i32
    return %c0_i32, %c0_i32_0, %c0_i32_1 : i32, i32, i32
  }
  func.func @transform_22(%arg0: i32) -> (i32, i32, i32) {
    %c0_i32 = arith.constant 0 : i32
    %c0_i32_0 = arith.constant 0 : i32
    %c0_i32_1 = arith.constant 0 : i32
    %c0_i32_2 = arith.constant 0 : i32
    return %c0_i32, %c0_i32_0, %c0_i32_1 : i32, i32, i32
  }
  func.func @transform_23(%arg0: i32) -> (i32, i32, i32) {
    %c0_i32 = arith.constant 0 : i32
    %c0_i32_0 = arith.constant 0 : i32
    %c0_i32_1 = arith.constant 0 : i32
    %c0_i32_2 = arith.constant 0 : i32
    return %c0_i32, %c0_i32_0, %c0_i32_1 : i32, i32, i32
  }
  func.func @transform_24(%arg0: i32) -> (i32, i32) {
    %c0_i32 = arith.constant 0 : i32
    %c0_i32_0 = arith.constant 0 : i32
    %c0_i32_1 = arith.constant 0 : i32
    return %c0_i32, %c0_i32_0 : i32, i32
  }
  func.func @transform_25(%arg0: i32) -> (i32, i32) {
    %c0_i32 = arith.constant 0 : i32
    %c0_i32_0 = arith.constant 0 : i32
    %c0_i32_1 = arith.constant 0 : i32
    return %c0_i32, %c0_i32_0 : i32, i32
  }
  func.func @transform_26(%arg0: i32) -> (i32, i32, i32) {
    %c0_i32 = arith.constant 0 : i32
    %c0_i32_0 = arith.constant 0 : i32
    %c0_i32_1 = arith.constant 0 : i32
    return %arg0, %c0_i32, %c0_i32_0 : i32, i32, i32
  }
}

</mosaic_0001>

<bundles_post_ra>
// kernel: tpu_custom_call.1
= control target key start
LH: loop header
LB: loop body
LE: loop exit
PB: predicated region body
PF: predicated region fallthrough
CT: control target
= control target key end

     0   :  { %s7519_s0 = inlined_call_operand.hbm [shape: f32[1,8,32], index: 0, kind: input, shape index: {}]   ;;  %s7520_s1 = inlined_call_operand.vmem [shape: f32[2,16,32], index: 1, kind: input, shape index: {}]   ;;  %s7521_s2 = inlined_call_operand.vmem [shape: bf16[2,32,32], index: 2, kind: input, shape index: {}]   ;;  %s7522_s3 = inlined_call_operand.hbm [shape: f32[2,1,32], index: 3, kind: input, shape index: {}]   ;;  %s7523_s4 = inlined_call_operand.vmem [shape: bf16[2,32,32], index: 4, kind: input, shape index: {}]   ;;  %s7524_s5 = inlined_call_operand.hbm [shape: bf16[2,32,32], index: 5, kind: input, shape index: {}]   ;;  %s7525_s6 = inlined_call_operand.hbm [shape: bf16[2,32,32], index: 6, kind: input, shape index: {}]   ;;  %s7526_s7 = inlined_call_operand.hbm [shape: f32[2,1,32], index: 7, kind: input, shape index: {}]   ;;  %s7527_s8 = inlined_call_operand.hbm [shape: f32[2,1,32], index: 8, kind: input, shape index: {}]   ;;  %s7528_s9 = inlined_call_operand.hbm [shape: f32[2,1,32], index: 9, kind: input, shape index: {}]   ;;  %s7529_s10 = inlined_call_operand.vmem [shape: bf16[2,32,32], index: 10, kind: input, shape index: {}]   ;;  %s7530_s11 = inlined_call_operand.hbm [shape: f32[2,1,32], index: 11, kind: input, shape index: {}]   ;;  %s7531_s12 = inlined_call_operand.hbm [shape: bf16[2,32,32], index: 12, kind: input, shape index: {}]   ;;  %s7532_s13 = inlined_call_operand.hbm [shape: bf16[2,32,32], index: 13, kind: input, shape index: {}]   ;;  %s7533_s14 = inlined_call_operand.hbm [shape: bf16[2,32,32], index: 14, kind: input, shape index: {}]   ;;  %s7534_s15 = inlined_call_operand.hbm [shape: f32[2,1,32], index: 15, kind: input, shape index: {}]   ;;  %s7535_s16 = inlined_call_operand.hbm [shape: f32[2,1,32], index: 16, kind: input, shape index: {}]   ;;  %s7536_s17 = inlined_call_operand.hbm [shape: f32[2,1,32], index: 17, kind: input, shape index: {}]   ;;  %s7537_s18 = inlined_call_operand.vmem [shape: bf16[2,32,64], index: 18, kind: input, shape index: {}]   ;;  %s7538_s19 = inlined_call_operand.vmem [shape: f32[2,1,64], index: 19, kind: input, shape index: {}]   ;;  %s7539_s20 = inlined_call_operand.vmem [shape: bf16[2,64,32], index: 20, kind: input, shape index: {}]   ;;  %s7540_s21 = inlined_call_operand.hbm [shape: f32[2,1,32], index: 21, kind: input, shape index: {}]   ;;  %s7541_s22 = inlined_call_operand.hbm [shape: f32[2,1,32], index: 22, kind: input, shape index: {}]   ;;  %s7542_s23 = inlined_call_operand.vmem [shape: f32[2,1,32], index: 23, kind: input, shape index: {}]   ;;  %s7543_s24 = inlined_call_operand.vmem [shape: bf16[32,128], index: 24, kind: input, shape index: {}]   ;;  %s7544_s25 = inlined_call_operand.vmem [shape: f32[1,128], index: 25, kind: input, shape index: {}]   ;;  %s7545_s26 = inlined_call_operand.hbm [shape: f32[2,8,128], index: 26, kind: output, shape index: {}]  }
   0x1   :  { %7585 = sst [smem:[#allocation47_spill]] %s7519_s0 }
   0x2   :  { %7586 = sst [smem:[#allocation48_spill]] %s7520_s1 }
   0x3   :  { %7587 = sst [smem:[#allocation49_spill]] %s7521_s2 }
   0x4   :  { %7588 = sst [smem:[#allocation50_spill]] %s7522_s3 }
   0x5   :  { %7589 = sst [smem:[#allocation51_spill]] %s7523_s4 }
   0x6   :  { %7590 = sst [smem:[#allocation52_spill]] %s7524_s5 }
   0x7   :  { %7591 = sst [smem:[#allocation53_spill]] %s7525_s6 }
   0x8   :  { %7592 = sst [smem:[#allocation54_spill]] %s7526_s7 }
   0x9   :  { %7593 = sst [smem:[#allocation55_spill]] %s7527_s8 }
   0xa   :  { %7594 = sst [smem:[#allocation56_spill]] %s7528_s9 }
   0xb   :  { %7595 = sst [smem:[#allocation57_spill]] %s7529_s10 }
   0xc   :  { %7596 = sst [smem:[#allocation58_spill]] %s7530_s11 }
   0xd   :  { %7597 = sst [smem:[#allocation59_spill]] %s7532_s13 }
   0xe   :  { %7598 = sst [smem:[#allocation60_spill]] %s7534_s15 }
   0xf   :  { %7599 = sst [smem:[#allocation61_spill]] %s7536_s17 }
  0x10   :  { %7600 = sst [smem:[#allocation62_spill]] %s7538_s19 }
  0x11   :  { %7601 = sst [smem:[#allocation63_spill]] %s7539_s20 }
  0x12   :  { %7602 = sst [smem:[#allocation64_spill]] %s7542_s23 }
  0x13   :  { %7603 = sst [smem:[#allocation65_spill]] %s7543_s24 }
  0x14   :  { %7604 = sst [smem:[#allocation66_spill]] %s7544_s25 }
  0x15   :  { %7605 = sst [smem:[#allocation67_spill]] %s7545_s26 }
  0x16   :  { %31 = vsyncpa [#allocation3], 0 }
  0x17   :  { %32 = vsyncpa [#allocation6], 0 }
  0x18   :  { %33 = vsyncpa [#allocation9], 0 }
  0x19   :  { %34 = vsyncpa [#allocation12], 0 }
  0x1a   :  { %35 = vsyncpa [#allocation15], 0 }
  0x1b   :  { %36 = vsyncpa [#allocation18], 0 }
  0x1c   :  { %37 = vsyncpa [#allocation21], 0 }
  0x1d   :  { %38 = vsyncpa [#allocation24], 0 }
  0x1e   :  { %39 = vsyncpa [#allocation27], 0 }
  0x1f   :  { %40 = vsyncpa [#allocation4], 0 }
  0x20   :  { %42 = vsyncpa [#allocation4 + $0x1], 0  ;;  %s6531_s27 = smov 0   ;;  %s6533_s3 = smov 0  }
  0x21   :  { %s6535_s7 = smov 0   ;;  %s6537_s28 = smov 0  }
  0x22 LB: > { %7606 = sst [smem:[#allocation39_spill]] %s6353_s27  ;;  %s6552_s8 = sadd.s32 4294967295, %s6365_s28   ;;  %s6365_s28 = sphi %s6537_s28, %s7673_s28   ;;  %s6361_s7 = sphi %s6535_s7, %s7676_s7   ;;  %s6357_s3 = sphi %s6533_s3, %s7675_s3   ;;  %s6353_s27 = sphi %s6531_s27, %s7674_s27  }
  0x23   : > { %7607 = sst [smem:[#allocation40_spill]] %s6357_s3  ;;  %s4732_s4 = sadd.s32 4294967294, %s6365_s28  }
  0x24   : > { %7608 = sst [smem:[#allocation41_spill]] %s6361_s7  ;;  %s6556_s29 = sadd.s32 1, %s6365_s28  }
  0x25   : > { %7609 = sst [smem:[#allocation42_spill]] %s6365_s28  ;;  %s606_s0 = sadd.s32 1, %s6361_s7 }
  0x26   : > { %7610 = sst [smem:[#allocation43_spill]] %s6556_s29  ;;  %s603_s9 = ssub.s32 %s6365_s28, %s6556_s29 }
  0x27   : > { %p616_p0 = scmp.ne.s32.totalorder %s6361_s7, %s6357_s3  ;;  %p604_p1 = scmp.eq.s32.totalorder %s603_s9, 0 }
  0x28   : > { %p617_p2 = scmp.eq.s32.totalorder %s6552_s8, 1  ;;  %p622_p3 = scmp.ne.s32.totalorder %s6357_s3, %s6353_s27 }
  0x29   : > { %p623_p4 = scmp.eq.s32.totalorder %s4732_s4, 1  ;;  %p4733_p7 = scmp.ge.s32.totalorder %s6365_s28, 1 }
  0x2a   : > { %s6567_s30 = scalar_select %p604_p1, %s6361_s7, %s606_s0  }
  0x2b   : > { %p6569_p5 = por %p617_p2, %p616_p0  ;;  %p6573_p6 = por %p623_p4, %p622_p3 }
  0x2c   : > { %7611 = sst [smem:[#allocation44_spill]] %s6567_s30  ;;  %p630_p8 = scmp.lt.s32.totalorder %s6365_s28, 3 }
  0x2d   : > { %s7612_s2 = scalar_select %p6569_p5, 1, 0 }
  0x2e   : > { %s7614_s5 = scalar_select %p6573_p6, 1, 0 }
  0x2f   : > { %7613 = sst [smem:[#allocation45_spill]] %s7612_s2  ;;  %p7565_p9 = scmp.eq.s32.totalorder %s6552_s8, 0 }
  0x30   : > { %7615 = sst [smem:[#allocation46_spill]] %s7614_s5  ;;  %p6580_p10 = pnand %p4733_p7, %p630_p8 }
  0x31   : > { %s6367_s6 = smov [#allocation5]   ;;  %s6368_s0 = smov [#allocation8]  }
  0x32   : > { %s7616_s10 = scalar_select %p6580_p10, 1, 0 }
  0x33   : > { %s656_s1 = sshll.u32 %s6367_s6, 4  ;;  %p5491_p11 = pneg %p6580_p10  ;;  %s657_s1 = int_to_ptr.vmem [resolvable:$true] %s656_s1 }
  0x34   : > { %s685_s9 = sshll.u32 %s6368_s0, 4  ;;  %s7618_s29 = sld [smem:[#allocation50_spill]]  ;;  %s686_s9 = int_to_ptr.vmem [resolvable:$true] %s685_s9 }
  0x35   : > { %p6588_p12 = pnand %p7565_p9, %p5491_p11 }
  0x37   : > { %p6600_p0 = pneg %p6588_p12 }
  0x3a   : > { %s5819_s5 = scalar_lea.hbm %s7618_s29, 32 }
  0x3b   : > { %p5820_p13 = scmp.ne.s32.totalorder %s7618_s29, %s5819_s5  ;;  %p5826_p3 = scmp.lt.u32.totalorder %s5819_s5, %s7618_s29 }
  0x3d   : > { %p5822_p1 = pnand %p6600_p0, %p5820_p13 }
  0x3f   : > { %p5823_p2 = pneg %p5822_p1 }
  0x41   : > { %p5828_p4 = pnand %p5826_p3, %p5823_p2 }
  0x43   : > { %5831 = shalt.err (!%p5828_p4)
}
  0x44   : > { %s5832_s7 = scalar_lea.vmem %s657_s1, 32  ;;  %p5840_p9 = scmp.lt.s32.totalorder %s657_s1, %s657_s1 }
  0x45   : > { %p5833_p7 = scmp.ne.s32.totalorder %s657_s1, %s5832_s7  ;;  %p5841_p6 = scmp.lt.s32.totalorder %s5832_s7, %s5832_s7 }
  0x47   : > { %p5835_p8 = pnand %p5833_p7, %p6600_p0  ;;  %p5842_p5 = por %p5841_p6, %p5840_p9 }
  0x49   : > { %p5836_p11 = pneg %p5835_p8 }
  0x4b   : > { %p5843_p10 = pnand %p5842_p5, %p5836_p11 }
  0x4d   : > { %5846 = shalt.err (!%p5843_p10)
}
  0x4e   : > { %s7573_s27 = smov 16   ;;  %s7580_s28 = smov 1  }
  0x4f   : > { %5497 = dma.hbm_to_vmem [thread:$0]  (!%p6588_p12), %s7618_s29, 32, %s657_s1, [#allocation6], %s7573_s27, %s7573_s27, %s7580_s28  }
  0x50   : > { %s6371_s2 = smov [#allocation11]   ;;  %s7620_s25 = sld [smem:[#allocation53_spill]] }
  0x51   : > { %s711_s5 = sshll.u32 %s6371_s2, 4  ;;  %s712_s5 = int_to_ptr.vmem [resolvable:$true] %s711_s5 }
  0x56   : > { %s5847_s3 = scalar_lea.hbm %s7620_s25, 512 }
  0x57   : > { %p5848_p5 = scmp.ne.s32.totalorder %s7620_s25, %s5847_s3  ;;  %p5854_p10 = scmp.lt.u32.totalorder %s5847_s3, %s7620_s25 }
  0x59   : > { %p5850_p6 = pnand %p5848_p5, %p6600_p0 }
  0x5b   : > { %p5851_p9 = pneg %p5850_p6 }
  0x5d   : > { %p5856_p13 = pnand %p5854_p10, %p5851_p9 }
  0x5f   : > { %5859 = shalt.err (!%p5856_p13)
}
  0x60   : > { %s5860_s1 = scalar_lea.vmem %s686_s9, 512  ;;  %p5868_p4 = scmp.lt.s32.totalorder %s686_s9, %s686_s9 }
  0x61   : > { %p5861_p1 = scmp.ne.s32.totalorder %s686_s9, %s5860_s1  ;;  %p5869_p7 = scmp.lt.s32.totalorder %s5860_s1, %s5860_s1 }
  0x63   : > { %p5863_p2 = pnand %p5861_p1, %p6600_p0  ;;  %p5870_p8 = por %p5869_p7, %p5868_p4 }
  0x65   : > { %p5864_p3 = pneg %p5863_p2 }
  0x67   : > { %p5871_p11 = pnand %p5870_p8, %p5864_p3 }
  0x69   : > { %5874 = shalt.err (!%p5871_p11)
}
  0x6a   : > { %s7575_s23 = smov 64   ;;  %s7577_s24 = smov 4  }
  0x6b   : > { %5503 = dma.hbm_to_vmem [thread:$0]  (!%p6588_p12), %s7620_s25, 512, %s686_s9, [#allocation9], %s7575_s23, %s7575_s23, %s7577_s24  }
  0x6c   : > { %s7621_s30 = sld [smem:[#allocation55_spill]] }
  0x72   : > { %s5875_s2 = scalar_lea.hbm %s7621_s30, 32 }
  0x73   : > { %p5876_p5 = scmp.ne.s32.totalorder %s7621_s30, %s5875_s2  ;;  %p5882_p10 = scmp.lt.u32.totalorder %s5875_s2, %s7621_s30 }
  0x75   : > { %p5878_p6 = pnand %p5876_p5, %p6600_p0 }
  0x77   : > { %p5879_p9 = pneg %p5878_p6 }
  0x79   : > { %p5884_p13 = pnand %p5882_p10, %p5879_p9 }
  0x7b   : > { %5887 = shalt.err (!%p5884_p13)
}
  0x7c   : > { %s5888_s19 = scalar_lea.vmem %s712_s5, 32  ;;  %p5896_p4 = scmp.lt.s32.totalorder %s712_s5, %s712_s5 }
  0x7d   : > { %p5889_p1 = scmp.ne.s32.totalorder %s712_s5, %s5888_s19  ;;  %p5897_p7 = scmp.lt.s32.totalorder %s5888_s19, %s5888_s19 }
  0x7f   : > { %p5891_p2 = pnand %p5889_p1, %p6600_p0  ;;  %p5898_p8 = por %p5897_p7, %p5896_p4 }
  0x81   : > { %p5892_p3 = pneg %p5891_p2 }
  0x83   : > { %p5899_p11 = pnand %p5898_p8, %p5892_p3 }
  0x85   : > { %5902 = shalt.err (!%p5899_p11)
}
  0x86   : > { %s7622_s9 = smov 16   ;;  %s6374_s3 = smov [#allocation14]  }
  0x87   : > { %5509 = dma.hbm_to_vmem [thread:$0]  (!%p6588_p12), %s7621_s30, 32, %s712_s5, [#allocation12], %s7622_s9, %s7622_s9, %s7580_s28  }
  0x88   : > { %s740_s26 = sshll.u32 %s6374_s3, 4  ;;  %s6375_s2 = smov [#allocation17]   ;;  %s741_s26 = int_to_ptr.vmem [resolvable:$true] %s740_s26 }
  0x89   : > { %s766_s0 = sshll.u32 %s6375_s2, 4  ;;  %s7623_s11 = sld [smem:[#allocation58_spill]]  ;;  %s767_s0 = int_to_ptr.vmem [resolvable:$true] %s766_s0 }
  0x8f   : > { %s5903_s19 = scalar_lea.hbm %s7623_s11, 32 }
  0x90   : > { %p5904_p5 = scmp.ne.s32.totalorder %s7623_s11, %s5903_s19  ;;  %p5910_p10 = scmp.lt.u32.totalorder %s5903_s19, %s7623_s11 }
  0x92   : > { %p5906_p6 = pnand %p5904_p5, %p6600_p0 }
  0x94   : > { %p5907_p9 = pneg %p5906_p6 }
  0x96   : > { %p5912_p13 = pnand %p5910_p10, %p5907_p9 }
  0x98   : > { %5915 = shalt.err (!%p5912_p13)
}
  0x99   : > { %s5916_s5 = scalar_lea.vmem %s741_s26, 32  ;;  %p5924_p4 = scmp.lt.s32.totalorder %s741_s26, %s741_s26 }
  0x9a   : > { %p5917_p1 = scmp.ne.s32.totalorder %s741_s26, %s5916_s5  ;;  %p5925_p7 = scmp.lt.s32.totalorder %s5916_s5, %s5916_s5 }
  0x9c   : > { %p5919_p2 = pnand %p5917_p1, %p6600_p0  ;;  %p5926_p8 = por %p5925_p7, %p5924_p4 }
  0x9e   : > { %p5920_p3 = pneg %p5919_p2 }
  0xa0   : > { %p5927_p11 = pnand %p5926_p8, %p5920_p3 }
  0xa2   : > { %5930 = shalt.err (!%p5927_p11)
}
  0xa3   : > { %5515 = dma.hbm_to_vmem [thread:$0]  (!%p6588_p12), %s7623_s11, 32, %s741_s26, [#allocation15], %s7622_s9, %s7622_s9, %s7580_s28  }
  0xa4   : > { %s7624_s13 = sld [smem:[#allocation59_spill]] }
  0xaa   : > { %s5931_s3 = scalar_lea.hbm %s7624_s13, 512 }
  0xab   : > { %p5932_p5 = scmp.ne.s32.totalorder %s7624_s13, %s5931_s3  ;;  %p5938_p10 = scmp.lt.u32.totalorder %s5931_s3, %s7624_s13 }
  0xad   : > { %p5934_p6 = pnand %p5932_p5, %p6600_p0 }
  0xaf   : > { %p5935_p9 = pneg %p5934_p6 }
  0xb1   : > { %p5940_p13 = pnand %p5938_p10, %p5935_p9 }
  0xb3   : > { %5943 = shalt.err (!%p5940_p13)
}
  0xb4   : > { %s5944_s27 = scalar_lea.vmem %s767_s0, 512  ;;  %p5952_p4 = scmp.lt.s32.totalorder %s767_s0, %s767_s0 }
  0xb5   : > { %p5945_p1 = scmp.ne.s32.totalorder %s767_s0, %s5944_s27  ;;  %p5953_p7 = scmp.lt.s32.totalorder %s5944_s27, %s5944_s27 }
  0xb7   : > { %p5947_p2 = pnand %p5945_p1, %p6600_p0  ;;  %p5954_p8 = por %p5953_p7, %p5952_p4 }
  0xb9   : > { %p5948_p3 = pneg %p5947_p2 }
  0xbb   : > { %p5955_p11 = pnand %p5954_p8, %p5948_p3 }
  0xbd   : > { %5958 = shalt.err (!%p5955_p11)
}
  0xbe   : > { %s7625_s26 = smov 4   ;;  %s7626_s5 = smov 64  }
  0xbf   : > { %5521 = dma.hbm_to_vmem [thread:$0]  (!%p6588_p12), %s7624_s13, 512, %s767_s0, [#allocation18], %s7626_s5, %s7626_s5, %s7625_s26  }
  0xc0   : > { %s6376_s24 = smov [#allocation20]   ;;  %s6377_s3 = smov [#allocation23]  }
  0xc1   : > { %s792_s20 = sshll.u32 %s6376_s24, 4  ;;  %s818_s2 = sshll.u32 %s6377_s3, 4  ;;  %s793_s20 = int_to_ptr.vmem [resolvable:$true] %s792_s20  ;;  %s819_s2 = int_to_ptr.vmem [resolvable:$true] %s818_s2 }
  0xc2   : > { %s7627_s15 = sld [smem:[#allocation60_spill]] }
  0xc8   : > { %s5959_s19 = scalar_lea.hbm %s7627_s15, 32 }
  0xc9   : > { %p5960_p5 = scmp.ne.s32.totalorder %s7627_s15, %s5959_s19  ;;  %p5966_p10 = scmp.lt.u32.totalorder %s5959_s19, %s7627_s15 }
  0xcb   : > { %p5962_p6 = pnand %p5960_p5, %p6600_p0 }
  0xcd   : > { %p5963_p9 = pneg %p5962_p6 }
  0xcf   : > { %p5968_p13 = pnand %p5966_p10, %p5963_p9 }
  0xd1   : > { %5971 = shalt.err (!%p5968_p13)
}
  0xd2   : > { %s5972_s0 = scalar_lea.vmem %s793_s20, 32  ;;  %p5980_p4 = scmp.lt.s32.totalorder %s793_s20, %s793_s20 }
  0xd3   : > { %p5973_p1 = scmp.ne.s32.totalorder %s793_s20, %s5972_s0  ;;  %p5981_p7 = scmp.lt.s32.totalorder %s5972_s0, %s5972_s0 }
  0xd5   : > { %p5975_p2 = pnand %p5973_p1, %p6600_p0  ;;  %p5982_p8 = por %p5981_p7, %p5980_p4 }
  0xd7   : > { %p5976_p3 = pneg %p5975_p2 }
  0xd9   : > { %p5983_p11 = pnand %p5982_p8, %p5976_p3 }
  0xdb   : > { %5986 = shalt.err (!%p5983_p11)
}
  0xdc   : > { %s7628_s28 = smov 1   ;;  %s7629_s17 = sld [smem:[#allocation61_spill]] }
  0xdd   : > { %5527 = dma.hbm_to_vmem [thread:$0]  (!%p6588_p12), %s7627_s15, 32, %s793_s20, [#allocation21], %s7622_s9, %s7622_s9, %s7628_s28  }
  0xe2   : > { %s5987_s7 = scalar_lea.hbm %s7629_s17, 32 }
  0xe3   : > { %p5988_p5 = scmp.ne.s32.totalorder %s7629_s17, %s5987_s7  ;;  %p5994_p10 = scmp.lt.u32.totalorder %s5987_s7, %s7629_s17 }
  0xe5   : > { %p5990_p6 = pnand %p5988_p5, %p6600_p0 }
  0xe7   : > { %p5991_p9 = pneg %p5990_p6 }
  0xe9   : > { %p5996_p13 = pnand %p5994_p10, %p5991_p9 }
  0xeb   : > { %5999 = shalt.err (!%p5996_p13)
}
  0xec   : > { %s6000_s0 = scalar_lea.vmem %s819_s2, 32  ;;  %p6008_p4 = scmp.lt.s32.totalorder %s819_s2, %s819_s2 }
  0xed   : > { %p6001_p1 = scmp.ne.s32.totalorder %s819_s2, %s6000_s0  ;;  %p6009_p7 = scmp.lt.s32.totalorder %s6000_s0, %s6000_s0 }
  0xef   : > { %p6003_p2 = pnand %p6001_p1, %p6600_p0  ;;  %p6010_p8 = por %p6009_p7, %p6008_p4 }
  0xf1   : > { %p6004_p3 = pneg %p6003_p2 }
  0xf3   : > { %p6011_p11 = pnand %p6010_p8, %p6004_p3 }
  0xf5   : > { %6014 = shalt.err (!%p6011_p11)
}
  0xf6   : > { %5533 = dma.hbm_to_vmem [thread:$0]  (!%p6588_p12), %s7629_s17, 32, %s819_s2, [#allocation24], %s7622_s9, %s7622_s9, %s7628_s28  }
  0xf7   : > { %s6378_s23 = smov [#allocation2]   ;;  %s6379_s3 = smov [#allocation7]  }
  0xf8   : > { %s643_s24 = sshll.u32 %s6378_s23, 4  ;;  %s672_s7 = sshll.u32 %s6379_s3, 4  ;;  %s644_s24 = int_to_ptr.vmem [resolvable:$true] %s643_s24  ;;  %s673_s7 = int_to_ptr.vmem [resolvable:$true] %s672_s7 }
  0xf9   : > { %s7630_s27 = sld [smem:[#allocation47_spill]] }
  0xff   : > { %s7631_s25 = smov %s7630_s27  ;;  %s6015_s0 = scalar_lea.hbm %s7630_s27, 128 }
 0x100   : > { %p6016_p5 = scmp.ne.s32.totalorder %s7631_s25, %s6015_s0  ;;  %p6022_p10 = scmp.lt.u32.totalorder %s6015_s0, %s7631_s25 }
 0x102   : > { %p6018_p6 = pnand %p6016_p5, %p6600_p0 }
 0x104   : > { %p6019_p9 = pneg %p6018_p6 }
 0x106   : > { %p6024_p13 = pnand %p6022_p10, %p6019_p9 }
 0x108   : > { %6027 = shalt.err (!%p6024_p13)
}
 0x109   : > { %s6028_s2 = scalar_lea.vmem %s644_s24, 128  ;;  %p6036_p4 = scmp.lt.s32.totalorder %s644_s24, %s644_s24 }
 0x10a   : > { %p6029_p1 = scmp.ne.s32.totalorder %s644_s24, %s6028_s2  ;;  %p6037_p7 = scmp.lt.s32.totalorder %s6028_s2, %s6028_s2 }
 0x10c   : > { %p6031_p2 = pnand %p6029_p1, %p6600_p0  ;;  %p6038_p8 = por %p6037_p7, %p6036_p4 }
 0x10e   : > { %p6032_p3 = pneg %p6031_p2 }
 0x110   : > { %p6039_p11 = pnand %p6038_p8, %p6032_p3 }
 0x112   : > { %6042 = shalt.err (!%p6039_p11)
}
 0x113   : > { %5494 = dma.hbm_to_vmem [thread:$0]  (!%p6588_p12), %s7631_s25, 128, %s644_s24, [#allocation3]  }
 0x114   : > { %s7632_s23 = sld [smem:[#allocation52_spill]] }
 0x11a   : > { %s6043_s3 = scalar_lea.hbm %s7632_s23, 512 }
 0x11b   : > { %p6044_p5 = scmp.ne.s32.totalorder %s7632_s23, %s6043_s3  ;;  %p6050_p10 = scmp.lt.u32.totalorder %s6043_s3, %s7632_s23 }
 0x11d   : > { %p6046_p6 = pnand %p6044_p5, %p6600_p0 }
 0x11f   : > { %p6047_p9 = pneg %p6046_p6 }
 0x121   : > { %p6052_p13 = pnand %p6050_p10, %p6047_p9 }
 0x123   : > { %6055 = shalt.err (!%p6052_p13)
}
 0x124   : > { %s6056_s20 = scalar_lea.vmem %s673_s7, 512  ;;  %p6064_p4 = scmp.lt.s32.totalorder %s673_s7, %s673_s7 }
 0x125   : > { %p6057_p1 = scmp.ne.s32.totalorder %s673_s7, %s6056_s20  ;;  %p6065_p7 = scmp.lt.s32.totalorder %s6056_s20, %s6056_s20 }
 0x127   : > { %p6059_p2 = pnand %p6057_p1, %p6600_p0  ;;  %p6066_p8 = por %p6065_p7, %p6064_p4 }
 0x129   : > { %p6060_p3 = pneg %p6059_p2 }
 0x12b   : > { %p6067_p11 = pnand %p6066_p8, %p6060_p3 }
 0x12d   : > { %6070 = shalt.err (!%p6067_p11)
}
 0x12e   : > { %5500 = dma.hbm_to_vmem [thread:$0]  (!%p6588_p12), %s7632_s23, 512, %s673_s7, [#allocation6], %s7626_s5, %s7626_s5, %s7625_s26  }
 0x12f   : > { %s6380_s13 = smov [#allocation10]   ;;  %s6381_s29 = smov [#allocation13]  }
 0x130   : > { %s698_s15 = sshll.u32 %s6380_s13, 4  ;;  %s724_s11 = sshll.u32 %s6381_s29, 4  ;;  %s699_s15 = int_to_ptr.vmem [resolvable:$true] %s698_s15  ;;  %s725_s11 = int_to_ptr.vmem [resolvable:$true] %s724_s11 }
 0x131   : > { %s7633_s19 = sld [smem:[#allocation54_spill]] }
 0x137   : > { %s6071_s27 = scalar_lea.hbm %s7633_s19, 32 }
 0x138   : > { %p6072_p5 = scmp.ne.s32.totalorder %s7633_s19, %s6071_s27  ;;  %p6078_p10 = scmp.lt.u32.totalorder %s6071_s27, %s7633_s19 }
 0x13a   : > { %p6074_p6 = pnand %p6072_p5, %p6600_p0 }
 0x13c   : > { %p6075_p9 = pneg %p6074_p6 }
 0x13e   : > { %p6080_p13 = pnand %p6078_p10, %p6075_p9 }
 0x140   : > { %6083 = shalt.err (!%p6080_p13)
}
 0x141   : > { %s6084_s7 = scalar_lea.vmem %s699_s15, 32  ;;  %p6092_p4 = scmp.lt.s32.totalorder %s699_s15, %s699_s15 }
 0x142   : > { %p6085_p1 = scmp.ne.s32.totalorder %s699_s15, %s6084_s7  ;;  %p6093_p7 = scmp.lt.s32.totalorder %s6084_s7, %s6084_s7 }
 0x144   : > { %p6087_p2 = pnand %p6085_p1, %p6600_p0  ;;  %p6094_p8 = por %p6093_p7, %p6092_p4 }
 0x146   : > { %p6088_p3 = pneg %p6087_p2 }
 0x148   : > { %p6095_p11 = pnand %p6094_p8, %p6088_p3 }
 0x14a   : > { %6098 = shalt.err (!%p6095_p11)
}
 0x14b   : > { %5506 = dma.hbm_to_vmem [thread:$0]  (!%p6588_p12), %s7633_s19, 32, %s699_s15, [#allocation9], %s7622_s9, %s7622_s9, %s7628_s28  }
 0x14c   : > { %s7634_s3 = sld [smem:[#allocation56_spill]] }
 0x152   : > { %s7635_s1 = smov %s7634_s3  ;;  %s6099_s27 = scalar_lea.hbm %s7634_s3, 32 }
 0x153   : > { %p6100_p5 = scmp.ne.s32.totalorder %s7635_s1, %s6099_s27  ;;  %p6106_p10 = scmp.lt.u32.totalorder %s6099_s27, %s7635_s1 }
 0x155   : > { %p6102_p6 = pnand %p6100_p5, %p6600_p0 }
 0x157   : > { %p6103_p9 = pneg %p6102_p6 }
 0x159   : > { %p6108_p13 = pnand %p6106_p10, %p6103_p9 }
 0x15b   : > { %6111 = shalt.err (!%p6108_p13)
}
 0x15c   : > { %s6112_s17 = scalar_lea.vmem %s725_s11, 32  ;;  %p6120_p4 = scmp.lt.s32.totalorder %s725_s11, %s725_s11 }
 0x15d   : > { %p6113_p1 = scmp.ne.s32.totalorder %s725_s11, %s6112_s17  ;;  %p6121_p7 = scmp.lt.s32.totalorder %s6112_s17, %s6112_s17 }
 0x15f   : > { %p6115_p2 = pnand %p6113_p1, %p6600_p0  ;;  %p6122_p8 = por %p6121_p7, %p6120_p4 }
 0x161   : > { %p6116_p3 = pneg %p6115_p2 }
 0x163   : > { %p6123_p11 = pnand %p6122_p8, %p6116_p3 }
 0x165   : > { %6126 = shalt.err (!%p6123_p11)
}
 0x166   : > { %5512 = dma.hbm_to_vmem [thread:$0]  (!%p6588_p12), %s7635_s1, 32, %s725_s11, [#allocation12], %s7622_s9, %s7622_s9, %s7628_s28  }
 0x167   : > { %s6382_s13 = smov [#allocation16]   ;;  %s6383_s3 = smov [#allocation19]  }
 0x168   : > { %s753_s29 = sshll.u32 %s6382_s13, 4  ;;  %s779_s27 = sshll.u32 %s6383_s3, 4  ;;  %s754_s29 = int_to_ptr.vmem [resolvable:$true] %s753_s29  ;;  %s780_s27 = int_to_ptr.vmem [resolvable:$true] %s779_s27 }
 0x169   : > { %s6127_s24 = scalar_lea.hbm %s7531_s12, 512 }
 0x16a   : > { %p6128_p5 = scmp.ne.s32.totalorder %s7531_s12, %s6127_s24  ;;  %p6134_p10 = scmp.lt.u32.totalorder %s6127_s24, %s7531_s12 }
 0x16c   : > { %p6130_p6 = pnand %p6128_p5, %p6600_p0 }
 0x16e   : > { %p6131_p9 = pneg %p6130_p6 }
 0x170   : > { %p6136_p13 = pnand %p6134_p10, %p6131_p9 }
 0x172   : > { %6139 = shalt.err (!%p6136_p13)
}
 0x173   : > { %s6140_s11 = scalar_lea.vmem %s754_s29, 512  ;;  %p6148_p4 = scmp.lt.s32.totalorder %s754_s29, %s754_s29 }
 0x174   : > { %p6141_p1 = scmp.ne.s32.totalorder %s754_s29, %s6140_s11  ;;  %p6149_p7 = scmp.lt.s32.totalorder %s6140_s11, %s6140_s11 }
 0x176   : > { %p6143_p2 = pnand %p6141_p1, %p6600_p0  ;;  %p6150_p8 = por %p6149_p7, %p6148_p4 }
 0x178   : > { %p6144_p3 = pneg %p6143_p2 }
 0x17a   : > { %p6151_p11 = pnand %p6150_p8, %p6144_p3 }
 0x17c   : > { %6154 = shalt.err (!%p6151_p11)
}
 0x17d   : > { %5518 = dma.hbm_to_vmem [thread:$0]  (!%p6588_p12), %s7531_s12, 512, %s754_s29, [#allocation15], %s7626_s5, %s7626_s5, %s7625_s26  }
 0x17e   : > { %s6155_s0 = scalar_lea.hbm %s7533_s14, 512 }
 0x17f   : > { %p6156_p5 = scmp.ne.s32.totalorder %s7533_s14, %s6155_s0  ;;  %p6162_p10 = scmp.lt.u32.totalorder %s6155_s0, %s7533_s14 }
 0x181   : > { %p6158_p6 = pnand %p6156_p5, %p6600_p0 }
 0x183   : > { %p6159_p9 = pneg %p6158_p6 }
 0x185   : > { %p6164_p13 = pnand %p6162_p10, %p6159_p9 }
 0x187   : > { %6167 = shalt.err (!%p6164_p13)
}
 0x188   : > { %s6168_s15 = scalar_lea.vmem %s780_s27, 512  ;;  %p6176_p4 = scmp.lt.s32.totalorder %s780_s27, %s780_s27 }
 0x189   : > { %p6169_p1 = scmp.ne.s32.totalorder %s780_s27, %s6168_s15  ;;  %p6177_p7 = scmp.lt.s32.totalorder %s6168_s15, %s6168_s15 }
 0x18b   : > { %p6171_p2 = pnand %p6169_p1, %p6600_p0  ;;  %p6178_p8 = por %p6177_p7, %p6176_p4 }
 0x18d   : > { %p6172_p3 = pneg %p6171_p2 }
 0x18f   : > { %p6179_p11 = pnand %p6178_p8, %p6172_p3 }
 0x191   : > { %6182 = shalt.err (!%p6179_p11)
}
 0x192   : > { %5524 = dma.hbm_to_vmem [thread:$0]  (!%p6588_p12), %s7533_s14, 512, %s780_s27, [#allocation18], %s7626_s5, %s7626_s5, %s7625_s26  }
 0x193   : > { %s6384_s19 = smov [#allocation22]   ;;  %s6385_s13 = smov [#allocation25]  }
 0x194   : > { %s805_s2 = sshll.u32 %s6384_s19, 4  ;;  %s840_s3 = sshll.u32 %s6385_s13, 4  ;;  %s806_s2 = int_to_ptr.vmem [resolvable:$true] %s805_s2  ;;  %s841_s3 = int_to_ptr.vmem [resolvable:$true] %s840_s3 }
 0x195   : > { %s6183_s24 = scalar_lea.hbm %s7535_s16, 32 }
 0x196   : > { %p6184_p5 = scmp.ne.s32.totalorder %s7535_s16, %s6183_s24  ;;  %p6190_p10 = scmp.lt.u32.totalorder %s6183_s24, %s7535_s16 }
 0x198   : > { %p6186_p6 = pnand %p6184_p5, %p6600_p0 }
 0x19a   : > { %p6187_p9 = pneg %p6186_p6 }
 0x19c   : > { %p6192_p13 = pnand %p6190_p10, %p6187_p9 }
 0x19e   : > { %6195 = shalt.err (!%p6192_p13)
}
 0x19f   : > { %s6196_s26 = scalar_lea.vmem %s806_s2, 32  ;;  %p6204_p4 = scmp.lt.s32.totalorder %s806_s2, %s806_s2 }
 0x1a0   : > { %p6197_p1 = scmp.ne.s32.totalorder %s806_s2, %s6196_s26  ;;  %p6205_p7 = scmp.lt.s32.totalorder %s6196_s26, %s6196_s26 }
 0x1a2   : > { %p6199_p2 = pnand %p6197_p1, %p6600_p0  ;;  %p6206_p8 = por %p6205_p7, %p6204_p4 }
 0x1a4   : > { %p6200_p3 = pneg %p6199_p2 }
 0x1a6   : > { %p6207_p11 = pnand %p6206_p8, %p6200_p3 }
 0x1a8   : > { %6210 = shalt.err (!%p6207_p11)
}
 0x1a9   : > { %5530 = dma.hbm_to_vmem [thread:$0]  (!%p6588_p12), %s7535_s16, 32, %s806_s2, [#allocation21], %s7622_s9, %s7622_s9, %s7628_s28  }
 0x1aa   : > { %s6211_s13 = scalar_lea.hbm %s7540_s21, 32 }
 0x1ab   : > { %p6212_p5 = scmp.ne.s32.totalorder %s7540_s21, %s6211_s13  ;;  %p6218_p10 = scmp.lt.u32.totalorder %s6211_s13, %s7540_s21 }
 0x1ad   : > { %p6214_p6 = pnand %p6212_p5, %p6600_p0 }
 0x1af   : > { %p6215_p9 = pneg %p6214_p6 }
 0x1b1   : > { %p6220_p13 = pnand %p6218_p10, %p6215_p9 }
 0x1b3   : > { %6223 = shalt.err (!%p6220_p13)
}
 0x1b4   : > { %s6224_s17 = scalar_lea.vmem %s841_s3, 32  ;;  %p6232_p4 = scmp.lt.s32.totalorder %s841_s3, %s841_s3 }
 0x1b5   : > { %p6225_p1 = scmp.ne.s32.totalorder %s841_s3, %s6224_s17  ;;  %p6233_p7 = scmp.lt.s32.totalorder %s6224_s17, %s6224_s17 }
 0x1b7   : > { %p6227_p2 = pnand %p6225_p1, %p6600_p0  ;;  %p6234_p8 = por %p6233_p7, %p6232_p4 }
 0x1b9   : > { %p6228_p3 = pneg %p6227_p2 }
 0x1bb   : > { %p6235_p11 = pnand %p6234_p8, %p6228_p3 }
 0x1bd   : > { %6238 = shalt.err (!%p6235_p11)
}
 0x1be   : > { %5536 = dma.hbm_to_vmem [thread:$0]  (!%p6588_p12), %s7540_s21, 32, %s841_s3, [#allocation24], %s7622_s9, %s7622_s9, %s7628_s28  }
 0x1bf   : > { %s6386_s29 = smov [#allocation26]   ;;  %s6239_s11 = scalar_lea.hbm %s7541_s22, 32 }
 0x1c0   : > { %s853_s26 = sshll.u32 %s6386_s29, 4  ;;  %p6240_p5 = scmp.ne.s32.totalorder %s7541_s22, %s6239_s11  ;;  %s854_s26 = int_to_ptr.vmem [resolvable:$true] %s853_s26 }
 0x1c1   : > { %p6246_p10 = scmp.lt.u32.totalorder %s6239_s11, %s7541_s22 }
 0x1c2   : > { %p6242_p6 = pnand %p6240_p5, %p6600_p0 }
 0x1c4   : > { %p6243_p9 = pneg %p6242_p6 }
 0x1c6   : > { %p6248_p13 = pnand %p6246_p10, %p6243_p9 }
 0x1c8   : > { %6251 = shalt.err (!%p6248_p13)
}
 0x1c9   : > { %s6252_s3 = scalar_lea.vmem %s854_s26, 32  ;;  %p6260_p4 = scmp.lt.s32.totalorder %s854_s26, %s854_s26 }
 0x1ca   : > { %p6253_p1 = scmp.ne.s32.totalorder %s854_s26, %s6252_s3  ;;  %p6261_p7 = scmp.lt.s32.totalorder %s6252_s3, %s6252_s3 }
 0x1cc   : > { %p6255_p2 = pnand %p6253_p1, %p6600_p0  ;;  %p6262_p8 = por %p6261_p7, %p6260_p4 }
 0x1ce   : > { %p6256_p3 = pneg %p6255_p2 }
 0x1d0   : > { %p6263_p11 = pnand %p6262_p8, %p6256_p3 }
 0x1d2   : > { %6266 = shalt.err (!%p6263_p11)
}
 0x1d3   : > { %5539 = dma.hbm_to_vmem [thread:$0]  (!%p6588_p12), %s7541_s22, 32, %s854_s26, [#allocation27], %s7622_s9, %s7622_s9, %s7628_s28  }
 0x1d4   : > { %p7636_p5 = scmp.ne.s32.totalorder %s7616_s10, 0 }
 0x1d5   : > { %p7637_p0 = scmp.eq.s32.totalorder (!%p7636_p5), %s6552_s8, 0 }
 0x1d6   : > { %886 = sbr.rel (%p7636_p5) target bundleno = 9175 (0x23d7), region = 124 }
 0x1dd   : > { %6312 = dma.done.wait (%p7637_p0), [#allocation3], 128   ;;  %p7638_p6 = pmov %p7637_p0 }
 0x1de   : > { %p7639_p9 = pmov %p7637_p0 }
 0x1df   : > { %6314 = vsyncadd (%p7638_p6), [#allocation3], 4294967168 }
 0x1e0   : > { %6316 = dma.done.wait (%p7639_p9), [#allocation6], 544   ;;  %p7640_p10 = pmov %p7637_p0 }
 0x1e1   : > { %p7641_p13 = pmov %p7637_p0 }
 0x1e2   : > { %6318 = vsyncadd (%p7640_p10), [#allocation6], 4294966752 }
 0x1e3   : > { %6320 = dma.done.wait (%p7641_p13), [#allocation9], 544   ;;  %p7642_p12 = pmov %p7637_p0 }
 0x1e4   : > { %p7643_p1 = pmov %p7637_p0 }
 0x1e5   : > { %6322 = vsyncadd (%p7642_p12), [#allocation9], 4294966752 }
 0x1e6   : > { %6324 = dma.done.wait (%p7643_p1), [#allocation12], 64   ;;  %p7644_p2 = pmov %p7637_p0 }
 0x1e7   : > { %p7645_p3 = pmov %p7637_p0 }
 0x1e8   : > { %6326 = vsyncadd (%p7644_p2), [#allocation12], 4294967232 }
 0x1e9   : > { %6328 = dma.done.wait (%p7645_p3), [#allocation15], 544   ;;  %p7646_p4 = pmov %p7637_p0 }
 0x1ea   : > { %p7647_p7 = pmov %p7637_p0 }
 0x1eb   : > { %6330 = vsyncadd (%p7646_p4), [#allocation15], 4294966752 }
 0x1ec   : > { %6332 = dma.done.wait (%p7647_p7), [#allocation18], 1024   ;;  %p7648_p8 = pmov %p7637_p0 }
 0x1ed   : > { %p7649_p11 = pmov %p7637_p0 }
 0x1ee   : > { %6334 = vsyncadd (%p7648_p8), [#allocation18], 4294966272 }
 0x1ef   : > { %6336 = dma.done.wait (%p7649_p11), [#allocation21], 64   ;;  %p7650_p5 = pmov %p7637_p0 }
 0x1f1   : > { %6338 = vsyncadd (%p7650_p5), [#allocation21], 4294967232 }
 0x1f2   : > { %6340 = dma.done.wait (%p7637_p0), [#allocation24], 64   ;;  %p7651_p6 = pmov %p7637_p0 }
 0x1f3   : > { %p7652_p9 = pmov %p7637_p0 }
 0x1f4   : > { %6342 = vsyncadd (%p7651_p6), [#allocation24], 4294967232 }
 0x1f5   : > { %6344 = dma.done.wait (%p7652_p9), [#allocation27], 32   ;;  %p7653_p10 = pmov %p7637_p0 }
 0x1f6   : > { %v6387_v0 = vmov 0.0   ;;  %vm6388_vm0 = vmmov 0   ;;  %s7654_s6 = sld [smem:[#allocation49_spill]]  ;;  %s7655_s17 = sld [smem:[#allocation51_spill]]  ;;  %v6989_v5 = vld [vmem:[#allocation2] sm:$0xff]  ;;  %vm1063_vm1 = vcmask 261120  }
 0x1f7   : > { %6346 = vsyncadd (%p7653_p10), [#allocation27], 4294967264  ;;  %5057 = vmatprep.subr.bf16.mxu0 %v6387_v0  ;;  %5065 = vmatprep.subr.bf16.mxu1 %v6387_v0  ;;  %v1026_v6 = vpack.c.bf16 %v6989_v5, %v6989_v5  ;;  %v5701_v7 = vld [vmem:[#allocation7] sm:$0xff]   ;;  %v5702_v8 = vld [vmem:[#allocation7 + $0x8] sm:$0xff]   ;;  %vm1253_vm2 = vcmask 64512   ;;  %s6389_s5 = smov 120  }
 0x1f8   : > { %5061 = vmatprep.mubr.msk.bf16.mxu0 %vm6388_vm0, %v6387_v0  ;;  %5069 = vmatprep.mubr.msk.bf16.mxu1 %vm6388_vm0, %v6387_v0  ;;  %v4771_v9 = vld [vmem:[#allocation5] ss:$0 sm:$0xff]  ;;  %s6390_s27 = smov 112   ;;  %s6391_s11 = smov 104   ;;  %vm1489_vm3 = vcmask 1043456   ;;  %vm1684_vm4 = vcmask 130048  }
 0x1f9   : > { %s6392_s19 = smov 8   ;;  %s6393_s13 = smov 16   ;;  %vm1686_vm5 = vcmask 195584   ;;  %vm2651_vm6 = vcmask 523264  }
 0x1fa   : > { %s6394_s0 = smov 24   ;;  %p1016_p13 = scmp.lt.s32.totalorder %s6552_s8, 1 }
 0x1fb   : > { %s7656_s10 = sld [smem:[#allocation48_spill]]  ;;  %s7657_s2 = sld [smem:[#allocation57_spill]] }
 0x1fc   : > { %v5697_v1 = vld [vmem:[%s7654_s6] sm:$0xff]   ;;  %v5699_v3 = vld [vmem:[%s7654_s6 + $0x8] sm:$0xff]   ;;  %s1017_s20 = scalar_select %p1016_p13, %s6552_s8, 1 }
 0x1fd   : > { %v5698_v2 = vld [vmem:[%s7655_s17] sm:$0xff]   ;;  %5058 = vmatpush3.bf16.msra.mxu0 %v5697_v1  ;;  %v5700_v4 = vld [vmem:[%s7655_s17 + $0x8] sm:$0xff]   ;;  %s7659_s7 = sld [smem:[#allocation62_spill]]  ;;  %s7667_s9 = sld [smem:[#allocation67_spill]] }
 0x1fe   : > { %5066 = vmatpush3.bf16.msra.mxu1 %v5698_v2  ;;  %5059 = vmatprep.subr.bf16.mxu0 %v6387_v0  ;;  %s4925_s3 = sshll.u32 %s1017_s20, 4  ;;  %s7665_s20 = sld [smem:[#allocation66_spill]] }
 0x1ff   : > { %5067 = vmatprep.subr.bf16.mxu1 %v6387_v0 }
 0x201   : > { %5060 = vmatpush3.bf16.msra.mxu0 %v5699_v3  ;;  %s1020_s4 = scalar_lea.vmem %s7656_s10, %s4925_s3  ;;  %s7661_s3 = sld [smem:[#allocation64_spill]] }
 0x202   : > { %5068 = vmatpush3.bf16.msra.mxu1 %v5700_v4  ;;  %5073 = vmatprep.subr.bf16.mxu0 %v6387_v0 }
 0x203   : > { %5081 = vmatprep.subr.bf16.mxu1 %v6387_v0  ;;  %s7660_s10 = smov %s7659_s7 }
 0x204   : > { %5062 = vmatmul.mubr.msk.bf16.vlgmr.msra.gmra.mrb[0].mxu0 %vm1063_vm1, %v1026_v6 }
 0x205   : > { %5070 = vmatmul.mubr.msk.bf16.vlgmr.msra.gmra.mrb[0].mxu1 %vm1063_vm1, %v1026_v6  ;;  %5077 = vmatprep.mubr.msk.bf16.mxu0 %vm6388_vm0, %v6387_v0 }
 0x206   : > { %5083 = vmatprep.mubr.msk.bf16.mxu1 %vm6388_vm0, %v6387_v0  ;;  %5074 = vmatpush3.bf16.msra.mxu0 %v5701_v7 }
 0x207   : > { %5075 = vmatprep.subr.bf16.mxu0 %v6387_v0  ;;  %s7662_s24 = smov %s7661_s3 }
 0x20a   : > { %5076 = vmatpush3.bf16.msra.mxu0 %v5702_v8 }
 0x20b   : > { %5087 = vmatprep.subr.bf16.mxu0 %v6387_v0 }
 0x20d   : > { %5078 = vmatmul.mubr.msk.bf16.vlgmr.msra.gmra.mrb[4].mxu0 %vm1063_vm1, %v1026_v6 }
 0x20e   : > { %5089 = vmatprep.mubr.msk.bf16.mxu0 %vm6388_vm0, %v6387_v0 }
 0x2d7   : > { %v1101_v10 = vpop.f32.mrb[0].mxu0 }
 0x2d8   : > { %v1102_v11 = vadd.f32 %v4771_v9, %v1101_v10  ;;  %v1153_v12 = vpop.f32.mrb[0].mxu1  ;;  %v5063_v13 = vpop.f32.mrb[1].mxu0 }
 0x2d9   : > { %1226 = vrot.lane.b32.xlu0 %v1153_v12, %s6389_s5  ;;  %v5071_v14 = vpop.f32.mrb[1].mxu1  ;;  %v1104_v15 = vpop.f32.mrb[2].mxu0  ;;  %v1235_v16 = vpack.c.bf16 %v1153_v12, %v1153_v12 }
 0x2da   : > { %v1156_v17 = vpop.f32.mrb[2].mxu1  ;;  %1212 = vrot.lane.b32.xlu1 %v1102_v11, %s6389_s5  ;;  %v5064_v18 = vpop.f32.mrb[3].mxu0  ;;  %v1221_v21 = vpack.c.bf16 %v1102_v11, %v1102_v11 }
 0x2db   : > { %v5072_v19 = vpop.f32.mrb[3].mxu1  ;;  %v1258_v20 = vsel %vm1253_vm2, %v1235_v16, 0 }
 0x2dc   : > { %5082 = vmatpush3.bf16.xpose.msra.mxu1 %v1258_v20 }
 0x2dd   : > { %1229 = vrot.lane.b32.xlu0 %v1153_v12, %s6390_s27  ;;  %5093 = vmatprep.subr.bf16.mxu1 %v6387_v0 }
 0x2de   : > { %1232 = vrot.lane.b32.xlu1 %v1153_v12, %s6391_s11 }
 0x2e0   : > { %v7017_v22 = vpop.f32.mrb[4].mxu0 }
 0x2e1   : > { %1215 = vrot.lane.b32.xlu0 %v1102_v11, %s6390_s27  ;;  %v5079_v23 = vpop.f32.mrb[5].mxu0  ;;  %v1249_v36 = vpack.c.bf16 %v7017_v22, %v7017_v22 }
 0x2e2   : > { %1218 = vrot.lane.b32.xlu1 %v1102_v11, %s6391_s11  ;;  %v1208_v24 = vpop.f32.mrb[6].mxu0 }
 0x2e3   : > { %5084 = vmatmul.mubr.msk.bf16.vlgmr.msra.gmra.mrb[4].mxu1 %vm1253_vm2, %v1221_v21  ;;  %v5080_v25 = vpop.f32.mrb[7].mxu0  ;;  %v1491_v40 = vsel %vm1489_vm3, %v1249_v36, 0 }
 0x2e4   : > { %5095 = vmatprep.mubr.msk.bf16.mxu1 %vm6388_vm0, %v6387_v0 }
 0x34b   : > { %v1227_v26 = vpop.permute.xlu0 %1226 }
 0x34c   : > { %v1236_v27 = vpack.c.bf16 %v1227_v26, %v1227_v26  ;;  %v1213_v28 = vpop.permute.xlu1 %1212 }
 0x34d   : > { %v1222_v35 = vpack.c.bf16 %v1213_v28, %v1213_v28 }
 0x34e   : > { %v1304_v29 = vsel %vm1253_vm2, %v1236_v27, 0 }
 0x34f   : > { %v1230_v30 = vpop.permute.xlu0 %1229  ;;  %5088 = vmatpush3.bf16.xpose.msra.mxu0 %v1304_v29 }
 0x350   : > { %v1237_v31 = vpack.c.bf16 %v1230_v30, %v1230_v30  ;;  %v1233_v32 = vpop.permute.xlu1 %1232  ;;  %5099 = vmatprep.subr.bf16.mxu0 %v6387_v0 }
 0x351   : > { %v1238_v34 = vpack.c.bf16 %v1233_v32, %v1233_v32 }
 0x352   : > { %v1350_v33 = vsel %vm1253_vm2, %v1237_v31, 0 }
 0x353   : > { %5094 = vmatpush3.bf16.xpose.msra.mxu1 %v1350_v33  ;;  %v1216_v37 = vpop.permute.xlu0 %1215  ;;  %v1396_v38 = vsel %vm1253_vm2, %v1238_v34, 0 }
 0x354   : > { %5105 = vmatprep.subr.bf16.mxu1 %v6387_v0  ;;  %v1223_v39 = vpack.c.bf16 %v1216_v37, %v1216_v37  ;;  %v1219_v41 = vpop.permute.xlu1 %1218 }
 0x355   : > { %v1224_v42 = vpack.c.bf16 %v1219_v41, %v1219_v41 }
 0x356   : > { %5090 = vmatmul.mubr.msk.bf16.vlgmr.msra.gmra.mrb[8].mxu0 %vm1253_vm2, %v1222_v35 }
 0x357   : > { %5100 = vmatpush3.bf16.xpose.msra.mxu0 %v1396_v38  ;;  %5101 = vmatprep.mubr.msk.bf16.mxu0 %vm6388_vm0, %v6387_v0 }
 0x358   : > { %5111 = vmatprep.subr.bf16.mxu0 %v6387_v0 }
 0x35a   : > { %5096 = vmatmul.mubr.msk.bf16.vlgmr.msra.gmra.mrb[8].mxu1 %vm1253_vm2, %v1223_v39 }
 0x35b   : > { %5106 = vmatpush3.bf16.msra.mxu1 %v1491_v40  ;;  %5107 = vmatprep.mubr.msk.bf16.mxu1 %vm6388_vm0, %v6387_v0 }
 0x35c   : > { %5117 = vmatprep.subr.bf16.mxu1 %v6387_v0 }
 0x35e   : > { %5102 = vmatmul.mubr.msk.bf16.vlgmr.msra.gmra.mrb[12].mxu0 %vm1253_vm2, %v1224_v42 }
 0x35f   : > { %5113 = vmatprep.mubr.msk.bf16.mxu0 %vm6388_vm0, %v6387_v0 }
 0x3b6   : > { %v1294_v43 = vpop.f32.mrb[4].mxu1 }
 0x3b7   : > { %v5085_v44 = vpop.f32.mrb[5].mxu1  ;;  %v1438_v45 = vsel %vm1253_vm2, %v1294_v43, -inf }
 0x3b8   : > { %1439 = vmax.xlane.f32.xlu0 %v1438_v45  ;;  %v1297_v46 = vpop.f32.mrb[6].mxu1 }
 0x3b9   : > { %v5086_v47 = vpop.f32.mrb[7].mxu1 }
 0x429   : > { %v1340_v48 = vpop.f32.mrb[8].mxu0 }
 0x42a   : > { %v5091_v49 = vpop.f32.mrb[9].mxu0  ;;  %v1441_v50 = vsel %vm1253_vm2, %v1340_v48, -inf }
 0x42b   : > { %1442 = vmax.xlane.f32.xlu1 %v1441_v50  ;;  %v1343_v51 = vpop.f32.mrb[10].mxu0  ;;  %v5703_v50 = vld [vmem:[#allocation8] sm:$0xff]  }
 0x42c   : > { %v5092_v52 = vpop.f32.mrb[11].mxu0  ;;  %v5704_v51 = vld [vmem:[#allocation8 + $0x8] sm:$0xff]  }
 0x42d   : > { %v1386_v53 = vpop.f32.mrb[8].mxu1 }
 0x42e   : > { %v5097_v54 = vpop.f32.mrb[9].mxu1  ;;  %v1444_v55 = vsel %vm1253_vm2, %v1386_v53, -inf }
 0x42f   : > { %1445 = vmax.xlane.f32.xlu0 %v1444_v55  ;;  %v1389_v56 = vpop.f32.mrb[10].mxu1 }
 0x430   : > { %v5098_v57 = vpop.f32.mrb[11].mxu1 }
 0x431   : > { %v1432_v58 = vpop.f32.mrb[12].mxu0 }
 0x432   : > { %v5103_v59 = vpop.f32.mrb[13].mxu0  ;;  %v1447_v60 = vsel %vm1253_vm2, %v1432_v58, -inf }
 0x433   : > { %1448 = vmax.xlane.f32.xlu0 %v1447_v60  ;;  %v1435_v61 = vpop.f32.mrb[14].mxu0 }
 0x434   : > { %v5104_v62 = vpop.f32.mrb[15].mxu0 }
 0x43c   : > { %1240 = vrot.lane.b32.xlu1 %v7017_v22, %s6389_s5 }
 0x445   : > { %v1440_v63 = vpop.xlane.xlu0 %1439 }
 0x446   : > { %v1450_v1 = vsub.f32 %v1294_v43, %v1440_v63 }
 0x448   : > { %v1454_v2 = vmul.f32 1.442695, %v1450_v1 }
 0x44a   : > { %5743 = vpow2.f32 %v1454_v2 }
 0x454   : > { %v5744_v3 = vpop.eup %5743 }
 0x455   : > { %v1462_v4 = vsel %vm1253_vm2, %v5744_v3, 0.0 }
 0x460   : > { %1463 = vadd.xlane.f32.xlu1 %v1462_v4 }
 0x4b8   : > { %v1443_v6 = vpop.xlane.xlu1 %1442 }
 0x4b9   : > { %v1451_v7 = vsub.f32 %v1340_v48, %v1443_v6 }
 0x4bb   : > { %v1456_v8 = vmul.f32 1.442695, %v1451_v7 }
 0x4bc   : > { %v1446_v9 = vpop.xlane.xlu0 %1445  ;;  %v1241_v10 = vpop.permute.xlu1 %1240 }
 0x4bd   : > { %5745 = vpow2.f32 %v1456_v8  ;;  %v1452_v11 = vsub.f32 %v1386_v53, %v1446_v9  ;;  %v1250_v12 = vpack.c.bf16 %v1241_v10, %v1241_v10  ;;  %v4789_v9 = vld [vmem:[#allocation10] ss:$0 sm:$0xff] }
 0x4bf   : > { %v1458_v13 = vmul.f32 1.442695, %v1452_v11  ;;  %v1537_v14 = vsel %vm1489_vm3, %v1250_v12, 0 }
 0x4c0   : > { %5112 = vmatpush3.bf16.msra.mxu0 %v1537_v14  ;;  %v1449_v15 = vpop.xlane.xlu0 %1448 }
 0x4c1   : > { %5747 = vpow2.f32 %v1458_v13  ;;  %v1453_v16 = vsub.f32 %v1432_v58, %v1449_v15  ;;  %5123 = vmatprep.subr.bf16.mxu0 %v6387_v0 }
 0x4c3   : > { %v1460_v17 = vmul.f32 1.442695, %v1453_v16 }
 0x4c5   : > { %5749 = vpow2.f32 %v1460_v17  ;;  %v5705_v17 = vld [vmem:[#allocation16] sm:$0xff]  }
 0x4c7   : > { %v5746_v18 = vpop.eup %5745 }
 0x4c8   : > { %v1465_v19 = vsel %vm1253_vm2, %v5746_v18, 0.0 }
 0x4c9   : > { %1466 = vadd.xlane.f32.xlu0 %v1465_v19 }
 0x4cb   : > { %v5748_v20 = vpop.eup %5747 }
 0x4cc   : > { %v1468_v21 = vsel %vm1253_vm2, %v5748_v20, 0.0 }
 0x4cd   : > { %1469 = vadd.xlane.f32.xlu1 %v1468_v21 }
 0x4cf   : > { %v5750_v23 = vpop.eup %5749 }
 0x4d0   : > { %v1471_v24 = vsel %vm1253_vm2, %v5750_v23, 0.0 }
 0x4d1   : > { %1472 = vadd.xlane.f32.xlu0 %v1471_v24  ;;  %v5706_v24 = vld [vmem:[#allocation16 + $0x8] sm:$0xff]  }
 0x4de   : > { %1246 = vrot.lane.b32.xlu1 %v7017_v22, %s6391_s11 }
 0x4e7   : > { %1243 = vrot.lane.b32.xlu0 %v7017_v22, %s6390_s27 }
 0x4ed   : > { %v1464_v25 = vpop.xlane.xlu1 %1463 }
 0x4ee   : > { %5751 = vrcp.f32 %v1464_v25  ;;  %v1024_v25 = vld [vmem:[%s1020_s4 + $0x8] sm:$0xff] }
 0x4f8   : > { %v5752_v26 = vpop.eup %5751 }
 0x4f9   : > { %v1478_v27 = vmul.f32 %v5752_v26, %v5744_v3 }
 0x4fb   : > { %v1482_v28 = vpack.c.bf16 %v1478_v27, %v1478_v27  ;;  %v5707_v27 = vld [vmem:[%s7657_s2] sm:$0xff]  }
 0x4fd   : > { %5108 = vmatmul.mubr.msk.bf16.vlgmr.msra.gmra.mrb[12].mxu1 %vm1253_vm2, %v1482_v28  ;;  %v5708_v28 = vld [vmem:[%s7657_s2 + $0x8] sm:$0xff]  }
 0x4fe   : > { %5119 = vmatprep.mubr.msk.bf16.mxu1 %vm6388_vm0, %v6387_v0 }
 0x556   : > { %v1467_v29 = vpop.xlane.xlu0 %1466 }
 0x557   : > { %5753 = vrcp.f32 %v1467_v29 }
 0x55a   : > { %v1470_v30 = vpop.xlane.xlu1 %1469 }
 0x55b   : > { %5755 = vrcp.f32 %v1470_v30 }
 0x55e   : > { %v1473_v31 = vpop.xlane.xlu0 %1472  ;;  %v1247_v32 = vpop.permute.xlu1 %1246 }
 0x55f   : > { %5757 = vrcp.f32 %v1473_v31  ;;  %v1252_v22 = vpack.c.bf16 %v1247_v32, %v1247_v32 }
 0x561   : > { %v5754_v33 = vpop.eup %5753  ;;  %v1629_v41 = vsel %vm1489_vm3, %v1252_v22, 0  ;;  %v4794_v22 = vld [vmem:[#allocation13] ss:$0 sm:$0xff] }
 0x562   : > { %v1479_v34 = vmul.f32 %v5754_v33, %v5746_v18  ;;  %v1244_v35 = vpop.permute.xlu0 %1243  ;;  %v4793_v33 = vld [vmem:[#allocation11] ss:$0 sm:$0xff] }
 0x563   : > { %v1251_v36 = vpack.c.bf16 %v1244_v35, %v1244_v35 }
 0x564   : > { %v1483_v37 = vpack.c.bf16 %v1479_v34, %v1479_v34 }
 0x565   : > { %v5756_v38 = vpop.eup %5755  ;;  %v1583_v39 = vsel %vm1489_vm3, %v1251_v36, 0 }
 0x566   : > { %v1480_v40 = vmul.f32 %v5756_v38, %v5748_v20  ;;  %5114 = vmatmul.mubr.msk.bf16.vlgmr.msra.gmra.mrb[16].mxu0 %vm1253_vm2, %v1483_v37  ;;  %5118 = vmatpush3.bf16.msra.mxu1 %v1583_v39 }
 0x567   : > { %5124 = vmatpush3.bf16.msra.mxu0 %v1629_v41  ;;  %5125 = vmatprep.mubr.msk.bf16.mxu0 %vm6388_vm0, %v6387_v0 }
 0x568   : > { %v1484_v42 = vpack.c.bf16 %v1480_v40, %v1480_v40  ;;  %5129 = vmatprep.subr.bf16.mxu1 %v6387_v0  ;;  %5137 = vmatprep.subr.bf16.mxu0 %v6387_v0 }
 0x569   : > { %v5758_v43 = vpop.eup %5757 }
 0x56a   : > { %v1481_v44 = vmul.f32 %v5758_v43, %v5750_v23  ;;  %5120 = vmatmul.mubr.msk.bf16.vlgmr.msra.gmra.mrb[16].mxu1 %vm1253_vm2, %v1484_v42 }
 0x56b   : > { %5133 = vmatprep.mubr.msk.bf16.mxu1 %vm6388_vm0, %v6387_v0  ;;  %5130 = vmatpush3.bf16.msra.mxu1 %v5703_v50 }
 0x56c   : > { %v1485_v45 = vpack.c.bf16 %v1481_v44, %v1481_v44  ;;  %5131 = vmatprep.subr.bf16.mxu1 %v6387_v0 }
 0x56e   : > { %5126 = vmatmul.mubr.msk.bf16.vlgmr.msra.gmra.mrb[20].mxu0 %vm1253_vm2, %v1485_v45  ;;  %v5709_v45 = vld [vmem:[#allocation17] sm:$0xff]  }
 0x56f   : > { %5141 = vmatprep.mubr.msk.bf16.mxu0 %vm6388_vm0, %v6387_v0  ;;  %5132 = vmatpush3.bf16.msra.mxu1 %v5704_v51 }
 0x570   : > { %5145 = vmatprep.subr.bf16.mxu1 %v6387_v0  ;;  %5138 = vmatpush3.bf16.msra.mxu0 %v5707_v27 }
 0x571   : > { %5139 = vmatprep.subr.bf16.mxu0 %v6387_v0 }
 0x574   : > { %5140 = vmatpush3.bf16.msra.mxu0 %v5708_v28 }
 0x575   : > { %5153 = vmatprep.subr.bf16.mxu0 %v6387_v0 }
 0x5d0   : > { %v1527_v46 = vpop.f32.mrb[12].mxu1 }
 0x5d1   : > { %v5109_v47 = vpop.f32.mrb[13].mxu1 }
 0x5d2   : > { %v1530_v48 = vpop.f32.mrb[14].mxu1 }
 0x5d3   : > { %v5110_v49 = vpop.f32.mrb[15].mxu1 }
 0x639   : > { %v1573_v52 = vpop.f32.mrb[16].mxu0 }
 0x63a   : > { %1672 = vrot.lane.b32.xlu1 %v1573_v52, %s6392_s19  ;;  %v5115_v53 = vpop.f32.mrb[17].mxu0 }
 0x63b   : > { %v1576_v54 = vpop.f32.mrb[18].mxu0 }
 0x63c   : > { %v5116_v55 = vpop.f32.mrb[19].mxu0 }
 0x63d   : > { %v1619_v56 = vpop.f32.mrb[16].mxu1  ;;  %v4795_v55 = vld [vmem:[#allocation14] ss:$0 sm:$0xff] }
 0x63e   : > { %1676 = vrot.lane.b32.xlu0 %v1619_v56, %s6393_s13  ;;  %v5121_v57 = vpop.f32.mrb[17].mxu1 }
 0x63f   : > { %v1622_v58 = vpop.f32.mrb[18].mxu1 }
 0x640   : > { %v5122_v59 = vpop.f32.mrb[19].mxu1 }
 0x641   : > { %v1665_v60 = vpop.f32.mrb[20].mxu0 }
 0x642   : > { %1680 = vrot.lane.b32.xlu1 %v1665_v60, %s6394_s0  ;;  %v5127_v61 = vpop.f32.mrb[21].mxu0 }
 0x643   : > { %v1668_v62 = vpop.f32.mrb[22].mxu0 }
 0x644   : > { %v5128_v63 = vpop.f32.mrb[23].mxu0 }
 0x6ac   : > { %v1673_v1 = vpop.permute.xlu1 %1672 }
 0x6ad   : > { %v1683_v3 = vsel %vm1253_vm2, %v1527_v46, %v1673_v1  ;;  %v5710_v46 = vld [vmem:[#allocation17 + $0x8] sm:$0xff]  }
 0x6b0   : > { %v1677_v2 = vpop.permute.xlu0 %1676 }
 0x6b1   : > { %v1685_v4 = vsel %vm1684_vm4, %v1683_v3, %v1677_v2 }
 0x6b4   : > { %v1681_v6 = vpop.permute.xlu1 %1680 }
 0x6b5   : > { %v1687_v7 = vsel %vm1686_vm5, %v1685_v4, %v1681_v6 }
 0x6b6   : > { %v1688_v8 = vpack.c.bf16 %v1687_v7, %v1687_v7 }
 0x6b8   : > { %5134 = vmatmul.mubr.msk.bf16.vlgmr.msra.gmra.mrb[20].mxu1 %vm1063_vm1, %v1688_v8 }
 0x6b9   : > { %5149 = vmatprep.mubr.msk.bf16.mxu1 %vm6388_vm0, %v6387_v0  ;;  %5146 = vmatpush3.bf16.msra.mxu1 %v5705_v17 }
 0x6ba   : > { %5147 = vmatprep.subr.bf16.mxu1 %v6387_v0 }
 0x6bd   : > { %5148 = vmatpush3.bf16.msra.mxu1 %v5706_v24 }
 0x6be   : > { %5161 = vmatprep.subr.bf16.mxu1 %v6387_v0 }
 0x78b   : > { %v1744_v10 = vpop.f32.mrb[20].mxu1 }
 0x78c   : > { %v1745_v11 = vadd.f32 %v4789_v9, %v1744_v10  ;;  %v5135_v12 = vpop.f32.mrb[21].mxu1 }
 0x78d   : > { %v1747_v13 = vpop.f32.mrb[22].mxu1 }
 0x78e   : > { %v5136_v14 = vpop.f32.mrb[23].mxu1  ;;  %v1750_v15 = vadd.f32 %v1745_v11, %v6989_v5  ;;  %v1023_v5 = vld [vmem:[%s1020_s4] sm:$0xff]  ;;  %s7658_s4 = sld [smem:[#allocation63_spill]] }
 0x78f   : > { %v7090_v26 = vpack.c.bf16 %v1024_v25, %v1023_v5 }
 0x790   : > { %v1753_v16 = vsel %vm1063_vm1, %v1750_v15, 0.0 }
 0x791   : > { %1754 = vadd.xlane.f32.xlu0 %v1753_v16  ;;  %5150 = vmatmul.mubr.msk.bf16.vlgmr.msra.gmra.mrb[24].mxu1 %vm1063_vm1, %v7090_v26 }
 0x792   : > { %5163 = vmatprep.mubr.msk.bf16.mxu1 %vm6388_vm0, %v6387_v0 }
 0x81e   : > { %v1755_v18 = vpop.xlane.xlu0 %1754 }
 0x81f   : > { %v1757_v19 = vmul.f32 0.03125, %v1755_v18 }
 0x821   : > { %v1758_v20 = vsub.f32 %v1750_v15, %v1757_v19 }
 0x823   : > { %v1759_v21 = vmul.f32 %v1758_v20, %v1758_v20 }
 0x825   : > { %v1760_v23 = vsel %vm1063_vm1, %v1759_v21, 0.0 }
 0x826   : > { %1761 = vadd.xlane.f32.xlu1 %v1760_v23 }
 0x864   : > { %v1910_v38 = vpop.f32.mrb[24].mxu1 }
 0x865   : > { %v5151_v39 = vpop.f32.mrb[25].mxu1 }
 0x866   : > { %v1913_v40 = vpop.f32.mrb[26].mxu1 }
 0x867   : > { %v5642_v41 = vpack.i.bf16 %v1913_v40, %v1910_v38  ;;  %v5152_v42 = vpop.f32.mrb[27].mxu1  ;;  %v2004_v43 = vpack.c.bf16 %v1913_v40, %v1910_v38 }
 0x869   : > { %5643 = vrot.lane.b32.xlu1 %v5642_v41, %s6390_s27  ;;  %5638 = vrot.lane.b32.xlu0 %v5642_v41, %s6389_s5  ;;  %v2036_v44 = vsel %vm1253_vm2, %v2004_v43, 0 }
 0x86a   : > { %5162 = vmatpush3.bf16.xpose.msra.mxu1 %v2036_v44 }
 0x86b   : > { %5173 = vmatprep.subr.bf16.mxu1 %v6387_v0 }
 0x86d   : > { %5648 = vrot.lane.b32.xlu1 %v5642_v41, %s6391_s11 }
 0x8b3   : > { %v1762_v29 = vpop.xlane.xlu1 %1761 }
 0x8b4   : > { %v1763_v30 = vmul.f32 0.03125, %v1762_v29 }
 0x8b6   : > { %v1764_v31 = vadd.f32 1e-05, %v1763_v30 }
 0x8b8   : > { %5759 = vrsqrt.f32 %v1764_v31 }
 0x8c2   : > { %v5760_v32 = vpop.eup %5759 }
 0x8c3   : > { %v1766_v34 = vmul.f32 %v5760_v32, %v1758_v20 }
 0x8c5   : > { %v1773_v35 = vmul.f32 %v4793_v33, %v1766_v34 }
 0x8c7   : > { %v7105_v36 = vadd.f32 %v4794_v22, %v1773_v35 }
 0x8c9   : > { %v1781_v37 = vpack.c.bf16 %v7105_v36, %v7105_v36 }
 0x8cb   : > { %5142 = vmatmul.mubr.msk.bf16.vlgmr.msra.gmra.mrb[24].mxu0 %vm1063_vm1, %v1781_v37 }
 0x8cc   : > { %5157 = vmatprep.mubr.msk.bf16.mxu0 %vm6388_vm0, %v6387_v0  ;;  %5154 = vmatpush3.bf16.msra.mxu0 %v5709_v45 }
 0x8cd   : > { %5155 = vmatprep.subr.bf16.mxu0 %v6387_v0 }
 0x8d0   : > { %5156 = vmatpush3.bf16.msra.mxu0 %v5710_v46 }
 0x8d1   : > { %5167 = vmatprep.subr.bf16.mxu0 %v6387_v0 }
 0x8d3   : > { %5158 = vmatmul.mubr.msk.bf16.vlgmr.msra.gmra.mrb[28].mxu0 %vm1063_vm1, %v7090_v26 }
 0x8d4   : > { %5169 = vmatprep.mubr.msk.bf16.mxu0 %vm6388_vm0, %v6387_v0 }
 0x8db   : > { %v5639_v47 = vpop.permute.xlu0 %5638  ;;  %v5644_v52 = vpop.permute.xlu1 %5643 }
 0x8dc   : > { %v5641_v48 = vunpack.i.h.bf16 %v5639_v47  ;;  %v5640_v49 = vunpack.i.l.bf16 %v5639_v47  ;;  %v5646_v53 = vunpack.i.h.bf16 %v5644_v52  ;;  %v5645_v54 = vunpack.i.l.bf16 %v5644_v52 }
 0x8de   : > { %v2005_v50 = vpack.c.bf16 %v5641_v48, %v5640_v49  ;;  %v2006_v56 = vpack.c.bf16 %v5646_v53, %v5645_v54 }
 0x8df   : > { %v5649_v7 = vpop.permute.xlu1 %5648 }
 0x8e0   : > { %v2082_v51 = vsel %vm1253_vm2, %v2005_v50, 0  ;;  %v2128_v63 = vsel %vm1253_vm2, %v2006_v56, 0  ;;  %v5651_v8 = vunpack.i.h.bf16 %v5649_v7  ;;  %v5650_v9 = vunpack.i.l.bf16 %v5649_v7 }
 0x8e1   : > { %5168 = vmatpush3.bf16.xpose.msra.mxu0 %v2082_v51 }
 0x8e2   : > { %5179 = vmatprep.subr.bf16.mxu0 %v6387_v0  ;;  %v2007_v10 = vpack.c.bf16 %v5651_v8, %v5650_v9 }
 0x8e4   : > { %v2174_v13 = vsel %vm1253_vm2, %v2007_v10, 0 }
 0x99e   : > { %v1855_v57 = vpop.f32.mrb[24].mxu0 }
 0x99f   : > { %v1856_v58 = vadd.f32 %v4795_v55, %v1855_v57  ;;  %v5143_v59 = vpop.f32.mrb[25].mxu0 }
 0x9a0   : > { %v1858_v60 = vpop.f32.mrb[26].mxu0 }
 0x9a1   : > { %v1980_v61 = vpack.c.bf16 %v1856_v58, %v1856_v58  ;;  %1977 = vrot.lane.b32.xlu1 %v1856_v58, %s6391_s11  ;;  %1971 = vrot.lane.b32.xlu0 %v1856_v58, %s6389_s5  ;;  %v5144_v62 = vpop.f32.mrb[27].mxu0 }
 0x9a3   : > { %5164 = vmatmul.mubr.msk.bf16.vlgmr.msra.gmra.mrb[28].mxu1 %vm1253_vm2, %v1980_v61 }
 0x9a4   : > { %5174 = vmatpush3.bf16.xpose.msra.mxu1 %v2128_v63  ;;  %5175 = vmatprep.mubr.msk.bf16.mxu1 %vm6388_vm0, %v6387_v0 }
 0x9a5   : > { %1974 = vrot.lane.b32.xlu0 %v1856_v58, %s6390_s27  ;;  %5185 = vmatprep.subr.bf16.mxu1 %v6387_v0 }
 0x9a6   : > { %v1963_v1 = vpop.f32.mrb[28].mxu0 }
 0x9a7   : > { %v5159_v2 = vpop.f32.mrb[29].mxu0 }
 0x9a8   : > { %v1966_v3 = vpop.f32.mrb[30].mxu0 }
 0x9a9   : > { %v2028_v4 = vpack.c.bf16 %v1966_v3, %v1963_v1  ;;  %v5160_v6 = vpop.f32.mrb[31].mxu0  ;;  %v5652_v18 = vpack.i.bf16 %v1966_v3, %v1963_v1 }
 0xa13   : > { %v1972_v11 = vpop.permute.xlu0 %1971  ;;  %v1978_v16 = vpop.permute.xlu1 %1977 }
 0xa14   : > { %v1981_v12 = vpack.c.bf16 %v1972_v11, %v1972_v11  ;;  %v1983_v17 = vpack.c.bf16 %v1978_v16, %v1978_v16 }
 0xa16   : > { %5170 = vmatmul.mubr.msk.bf16.vlgmr.msra.gmra.mrb[32].mxu0 %vm1253_vm2, %v1981_v12 }
 0xa17   : > { %5180 = vmatpush3.bf16.xpose.msra.mxu0 %v2174_v13  ;;  %v1975_v14 = vpop.permute.xlu0 %1974  ;;  %5181 = vmatprep.mubr.msk.bf16.mxu0 %vm6388_vm0, %v6387_v0 }
 0xa18   : > { %v1982_v15 = vpack.c.bf16 %v1975_v14, %v1975_v14  ;;  %5191 = vmatprep.subr.bf16.mxu0 %v6387_v0 }
 0xa1a   : > { %5176 = vmatmul.mubr.msk.bf16.vlgmr.msra.gmra.mrb[32].mxu1 %vm1253_vm2, %v1982_v15 }
 0xa1b   : > { %5186 = vmatpush3.bf16.msra.mxu1 %v2028_v4  ;;  %5187 = vmatprep.mubr.msk.bf16.mxu1 %vm6388_vm0, %v6387_v0 }
 0xa1c   : > { %5197 = vmatprep.subr.bf16.mxu1 %v6387_v0 }
 0xa1e   : > { %5182 = vmatmul.mubr.msk.bf16.vlgmr.msra.gmra.mrb[36].mxu0 %vm1253_vm2, %v1983_v17 }
 0xa1f   : > { %5193 = vmatprep.mubr.msk.bf16.mxu0 %vm6388_vm0, %v6387_v0 }
 0xa76   : > { %v2072_v19 = vpop.f32.mrb[28].mxu1 }
 0xa77   : > { %v5165_v20 = vpop.f32.mrb[29].mxu1  ;;  %v2216_v21 = vsel %vm1684_vm4, %v2072_v19, -inf }
 0xa78   : > { %2217 = vmax.xlane.f32.xlu0 %v2216_v21  ;;  %v2075_v23 = vpop.f32.mrb[30].mxu1 }
 0xa79   : > { %v5166_v24 = vpop.f32.mrb[31].mxu1 }
 0xae9   : > { %v2118_v5 = vpop.f32.mrb[32].mxu0 }
 0xaea   : > { %v5171_v25 = vpop.f32.mrb[33].mxu0  ;;  %v2219_v27 = vsel %vm1684_vm4, %v2118_v5, -inf }
 0xaeb   : > { %2220 = vmax.xlane.f32.xlu1 %v2219_v27  ;;  %v2121_v28 = vpop.f32.mrb[34].mxu0 }
 0xaec   : > { %v5172_v29 = vpop.f32.mrb[35].mxu0 }
 0xaed   : > { %v2164_v30 = vpop.f32.mrb[32].mxu1 }
 0xaee   : > { %v5177_v31 = vpop.f32.mrb[33].mxu1  ;;  %v2222_v32 = vsel %vm1684_vm4, %v2164_v30, -inf }
 0xaef   : > { %2223 = vmax.xlane.f32.xlu0 %v2222_v32  ;;  %v2167_v33 = vpop.f32.mrb[34].mxu1  ;;  %v5711_v31 = vld [vmem:[#allocation19] sm:$0xff]   ;;  %v5712_v32 = vld [vmem:[#allocation19 + $0x8] sm:$0xff]  }
 0xaf0   : > { %v5178_v34 = vpop.f32.mrb[35].mxu1 }
 0xaf1   : > { %v2210_v22 = vpop.f32.mrb[36].mxu0 }
 0xaf2   : > { %v5183_v35 = vpop.f32.mrb[37].mxu0  ;;  %v2225_v37 = vsel %vm1684_vm4, %v2210_v22, -inf }
 0xaf3   : > { %2226 = vmax.xlane.f32.xlu0 %v2225_v37  ;;  %v2213_v38 = vpop.f32.mrb[38].mxu0 }
 0xaf4   : > { %v5184_v39 = vpop.f32.mrb[39].mxu0 }
 0xafc   : > { %5653 = vrot.lane.b32.xlu1 %v5652_v18, %s6389_s5 }
 0xb05   : > { %v2218_v40 = vpop.xlane.xlu0 %2217 }
 0xb06   : > { %v2228_v41 = vsub.f32 %v2072_v19, %v2218_v40 }
 0xb08   : > { %v2232_v42 = vmul.f32 1.442695, %v2228_v41 }
 0xb0a   : > { %5761 = vpow2.f32 %v2232_v42 }
 0xb14   : > { %v5762_v43 = vpop.eup %5761 }
 0xb15   : > { %v2240_v44 = vsel %vm1684_vm4, %v5762_v43, 0.0 }
 0xb20   : > { %2241 = vadd.xlane.f32.xlu1 %v2240_v44 }
 0xb78   : > { %v2221_v45 = vpop.xlane.xlu1 %2220 }
 0xb79   : > { %v2229_v46 = vsub.f32 %v2118_v5, %v2221_v45 }
 0xb7b   : > { %v2234_v47 = vmul.f32 1.442695, %v2229_v46 }
 0xb7c   : > { %v2224_v48 = vpop.xlane.xlu0 %2223  ;;  %v5654_v49 = vpop.permute.xlu1 %5653 }
 0xb7d   : > { %5763 = vpow2.f32 %v2234_v47  ;;  %v2230_v50 = vsub.f32 %v2164_v30, %v2224_v48  ;;  %v5656_v51 = vunpack.i.h.bf16 %v5654_v49  ;;  %v5655_v52 = vunpack.i.l.bf16 %v5654_v49 }
 0xb7f   : > { %v2236_v53 = vmul.f32 1.442695, %v2230_v50  ;;  %v2029_v54 = vpack.c.bf16 %v5656_v51, %v5655_v52  ;;  %v4813_v52 = vld [vmem:[#allocation20] ss:$0 sm:$0xff] }
 0xb80   : > { %v2227_v55 = vpop.xlane.xlu0 %2226 }
 0xb81   : > { %5765 = vpow2.f32 %v2236_v53  ;;  %v2231_v56 = vsub.f32 %v2210_v22, %v2227_v55  ;;  %5192 = vmatpush3.bf16.msra.mxu0 %v2029_v54 }
 0xb82   : > { %5203 = vmatprep.subr.bf16.mxu0 %v6387_v0 }
 0xb83   : > { %v2238_v57 = vmul.f32 1.442695, %v2231_v56 }
 0xb85   : > { %5767 = vpow2.f32 %v2238_v57 }
 0xb87   : > { %v5764_v58 = vpop.eup %5763 }
 0xb88   : > { %v2243_v59 = vsel %vm1684_vm4, %v5764_v58, 0.0 }
 0xb89   : > { %2244 = vadd.xlane.f32.xlu0 %v2243_v59 }
 0xb8b   : > { %v5766_v60 = vpop.eup %5765 }
 0xb8c   : > { %v2246_v61 = vsel %vm1684_vm4, %v5766_v60, 0.0 }
 0xb8d   : > { %2247 = vadd.xlane.f32.xlu1 %v2246_v61 }
 0xb8f   : > { %v5768_v62 = vpop.eup %5767 }
 0xb90   : > { %v2249_v63 = vsel %vm1684_vm4, %v5768_v62, 0.0 }
 0xb91   : > { %2250 = vadd.xlane.f32.xlu0 %v2249_v63 }
 0xb9e   : > { %5663 = vrot.lane.b32.xlu1 %v5652_v18, %s6391_s11 }
 0xba7   : > { %5658 = vrot.lane.b32.xlu0 %v5652_v18, %s6390_s27 }
 0xbad   : > { %v2242_v1 = vpop.xlane.xlu1 %2241 }
 0xbae   : > { %5769 = vrcp.f32 %v2242_v1 }
 0xbb8   : > { %v5770_v2 = vpop.eup %5769 }
 0xbb9   : > { %v2256_v3 = vmul.f32 %v5770_v2, %v5762_v43  ;;  %v5713_v2 = vld [vmem:[%s7537_s18] sm:$0xff]  }
 0xbbb   : > { %v2260_v4 = vpack.c.bf16 %v2256_v3, %v2256_v3  ;;  %v5714_v3 = vld [vmem:[%s7537_s18 + $0x8] sm:$0xff]  }
 0xbbd   : > { %5188 = vmatmul.mubr.msk.bf16.vlgmr.msra.gmra.mrb[36].mxu1 %vm1684_vm4, %v2260_v4  ;;  %v5716_v4 = vld [vmem:[%s7658_s4 + $0x8] sm:$0xff]  }
 0xbbe   : > { %5199 = vmatprep.mubr.msk.bf16.mxu1 %vm6388_vm0, %v6387_v0 }
 0xc16   : > { %v2245_v6 = vpop.xlane.xlu0 %2244 }
 0xc17   : > { %5771 = vrcp.f32 %v2245_v6 }
 0xc1a   : > { %v2248_v7 = vpop.xlane.xlu1 %2247 }
 0xc1b   : > { %5773 = vrcp.f32 %v2248_v7 }
 0xc1e   : > { %v5664_v8 = vpop.permute.xlu1 %5663  ;;  %v2251_v9 = vpop.xlane.xlu0 %2250 }
 0xc1f   : > { %5775 = vrcp.f32 %v2251_v9  ;;  %v5666_v11 = vunpack.i.h.bf16 %v5664_v8  ;;  %v5665_v12 = vunpack.i.l.bf16 %v5664_v8 }
 0xc21   : > { %v5772_v10 = vpop.eup %5771  ;;  %v2031_v19 = vpack.c.bf16 %v5666_v11, %v5665_v12  ;;  %v4818_v12 = vld [vmem:[#allocation23] ss:$0 sm:$0xff] }
 0xc22   : > { %v2257_v13 = vmul.f32 %v5772_v10, %v5764_v58  ;;  %v5659_v14 = vpop.permute.xlu0 %5658  ;;  %v4817_v10 = vld [vmem:[#allocation22] ss:$0 sm:$0xff] }
 0xc23   : > { %v5661_v15 = vunpack.i.h.bf16 %v5659_v14  ;;  %v5660_v16 = vunpack.i.l.bf16 %v5659_v14 }
 0xc24   : > { %v2261_v17 = vpack.c.bf16 %v2257_v13, %v2257_v13 }
 0xc25   : > { %v5774_v18 = vpop.eup %5773  ;;  %v2030_v20 = vpack.c.bf16 %v5661_v15, %v5660_v16  ;;  %v5717_v16 = vld [vmem:[%s7658_s4 + $0x10] sm:$0xff]  }
 0xc26   : > { %v2258_v21 = vmul.f32 %v5774_v18, %v5766_v60  ;;  %5194 = vmatmul.mubr.msk.bf16.vlgmr.msra.gmra.mrb[40].mxu0 %vm1684_vm4, %v2261_v17  ;;  %v5718_v17 = vld [vmem:[%s7658_s4 + $0x18] sm:$0xff]   ;;  %v4819_v18 = vld [vmem:[%s7659_s7] ss:$0 sm:$0xff] }
 0xc27   : > { %5204 = vmatpush3.bf16.msra.mxu0 %v2031_v19  ;;  %5198 = vmatpush3.bf16.msra.mxu1 %v2030_v20 }
 0xc28   : > { %v2262_v23 = vpack.c.bf16 %v2258_v21, %v2258_v21  ;;  %5205 = vmatprep.mubr.msk.bf16.mxu0 %vm6388_vm0, %v6387_v0  ;;  %5209 = vmatprep.subr.bf16.mxu1 %v6387_v0 }
 0xc29   : > { %v5776_v24 = vpop.eup %5775  ;;  %5217 = vmatprep.subr.bf16.mxu0 %v6387_v0 }
 0xc2a   : > { %v2259_v5 = vmul.f32 %v5776_v24, %v5768_v62  ;;  %5200 = vmatmul.mubr.msk.bf16.vlgmr.msra.gmra.mrb[40].mxu1 %vm1684_vm4, %v2262_v23 }
 0xc2b   : > { %5213 = vmatprep.mubr.msk.bf16.mxu1 %vm6388_vm0, %v6387_v0  ;;  %5210 = vmatpush3.bf16.msra.mxu1 %v5711_v31 }
 0xc2c   : > { %v2263_v25 = vpack.c.bf16 %v2259_v5, %v2259_v5  ;;  %5211 = vmatprep.subr.bf16.mxu1 %v6387_v0 }
 0xc2e   : > { %5206 = vmatmul.mubr.msk.bf16.vlgmr.msra.gmra.mrb[44].mxu0 %vm1684_vm4, %v2263_v25 }
 0xc2f   : > { %5221 = vmatprep.mubr.msk.bf16.mxu0 %vm6388_vm0, %v6387_v0  ;;  %5212 = vmatpush3.bf16.msra.mxu1 %v5712_v32 }
 0xc30   : > { %5225 = vmatprep.subr.bf16.mxu1 %v6387_v0  ;;  %5218 = vmatpush3.bf16.msra.mxu0 %v5713_v2 }
 0xc31   : > { %5219 = vmatprep.subr.bf16.mxu0 %v6387_v0 }
 0xc34   : > { %5220 = vmatpush3.bf16.msra.mxu0 %v5714_v3 }
 0xc35   : > { %5237 = vmatprep.subr.bf16.mxu0 %v6387_v0 }
 0xc90   : > { %v2301_v27 = vpop.f32.mrb[36].mxu1 }
 0xc91   : > { %v5189_v28 = vpop.f32.mrb[37].mxu1 }
 0xc92   : > { %v2304_v29 = vpop.f32.mrb[38].mxu1 }
 0xc93   : > { %v5190_v30 = vpop.f32.mrb[39].mxu1 }
 0xcf9   : > { %v2344_v33 = vpop.f32.mrb[40].mxu0 }
 0xcfa   : > { %2437 = vrot.lane.b32.xlu1 %v2344_v33, %s6392_s19  ;;  %v5195_v34 = vpop.f32.mrb[41].mxu0 }
 0xcfb   : > { %v2347_v22 = vpop.f32.mrb[42].mxu0 }
 0xcfc   : > { %v5196_v35 = vpop.f32.mrb[43].mxu0 }
 0xcfd   : > { %v2387_v37 = vpop.f32.mrb[40].mxu1 }
 0xcfe   : > { %2441 = vrot.lane.b32.xlu0 %v2387_v37, %s6393_s13  ;;  %v5201_v38 = vpop.f32.mrb[41].mxu1 }
 0xcff   : > { %v2390_v39 = vpop.f32.mrb[42].mxu1 }
 0xd00   : > { %v5202_v40 = vpop.f32.mrb[43].mxu1 }
 0xd01   : > { %v2430_v41 = vpop.f32.mrb[44].mxu0  ;;  %v5719_v40 = vld [vmem:[%s7654_s6 + $0x10] sm:$0xff]  }
 0xd02   : > { %2445 = vrot.lane.b32.xlu1 %v2430_v41, %s6394_s0  ;;  %v5207_v42 = vpop.f32.mrb[45].mxu0  ;;  %v5720_v41 = vld [vmem:[#allocation7 + $0x10] sm:$0xff]  }
 0xd03   : > { %v2433_v43 = vpop.f32.mrb[46].mxu0  ;;  %v5721_v42 = vld [vmem:[%s7654_s6 + $0x18] sm:$0xff]  }
 0xd04   : > { %v5208_v44 = vpop.f32.mrb[47].mxu0  ;;  %v5722_v43 = vld [vmem:[#allocation7 + $0x18] sm:$0xff]  }
 0xd6c   : > { %v2438_v45 = vpop.permute.xlu1 %2437 }
 0xd6d   : > { %v2448_v47 = vsel %vm1253_vm2, %v2301_v27, %v2438_v45  ;;  %v4823_v27 = vld [vmem:[#allocation25] ss:$0 sm:$0xff] }
 0xd70   : > { %v2442_v46 = vpop.permute.xlu0 %2441 }
 0xd71   : > { %v2449_v48 = vsel %vm1684_vm4, %v2448_v47, %v2442_v46 }
 0xd74   : > { %v2446_v49 = vpop.permute.xlu1 %2445 }
 0xd75   : > { %v2450_v50 = vsel %vm1686_vm5, %v2449_v48, %v2446_v49  ;;  %v4829_v48 = vld [vmem:[#allocation26] ss:$0 sm:$0xff] }
 0xd76   : > { %v2451_v51 = vpack.c.bf16 %v2450_v50, %v2450_v50  ;;  %v4830_v50 = vld [vmem:[%s7661_s3] ss:$0 sm:$0xff]  ;;  %s7666_s3 = sld [smem:[#allocation45_spill]] }
 0xd78   : > { %5214 = vmatmul.mubr.msk.bf16.vlgmr.msra.gmra.mrb[44].mxu1 %vm1063_vm1, %v2451_v51 }
 0xd79   : > { %5233 = vmatprep.mubr.msk.bf16.mxu1 %vm6388_vm0, %v6387_v0 }
 0xd7c   : > { %p7668_p1 = scmp.ne.s32.totalorder %s7666_s3, 0 }
 0xe4b   : > { %v2507_v53 = vpop.f32.mrb[44].mxu1 }
 0xe4c   : > { %v2508_v54 = vadd.f32 %v4813_v52, %v2507_v53  ;;  %v5215_v55 = vpop.f32.mrb[45].mxu1  ;;  %v5723_v53 = vld [vmem:[%s7655_s17 + $0x10] sm:$0xff]  }
 0xe4d   : > { %v2510_v56 = vpop.f32.mrb[46].mxu1  ;;  %v5724_v55 = vld [vmem:[%s7655_s17 + $0x18] sm:$0xff]  }
 0xe4e   : > { %v5216_v57 = vpop.f32.mrb[47].mxu1  ;;  %v2513_v58 = vadd.f32 %v2508_v54, %v7105_v36  ;;  %v5715_v36 = vld [vmem:[%s7658_s4] sm:$0xff]  }
 0xe4f   : > { %5226 = vmatpush3.bf16.msra.mxu1 %v5715_v36 }
 0xe50   : > { %v2516_v59 = vsel %vm1063_vm1, %v2513_v58, 0.0  ;;  %5227 = vmatprep.subr.bf16.mxu1 %v6387_v0 }
 0xe51   : > { %2517 = vadd.xlane.f32.xlu0 %v2516_v59 }
 0xe53   : > { %5228 = vmatpush3.bf16.msra.mxu1 %v5716_v4 }
 0xe54   : > { %5229 = vmatprep.subr.bf16.mxu1 %v6387_v0 }
 0xe57   : > { %5230 = vmatpush3.bf16.msra.mxu1 %v5717_v16 }
 0xe58   : > { %5231 = vmatprep.subr.bf16.mxu1 %v6387_v0 }
 0xe5b   : > { %5232 = vmatpush3.bf16.msra.mxu1 %v5718_v17 }
 0xe5c   : > { %5253 = vmatprep.subr.bf16.mxu1 %v6387_v0 }
 0xede   : > { %v2518_v60 = vpop.xlane.xlu0 %2517 }
 0xedf   : > { %v2519_v61 = vmul.f32 0.03125, %v2518_v60 }
 0xee1   : > { %v2520_v62 = vsub.f32 %v2513_v58, %v2519_v61 }
 0xee3   : > { %v2521_v63 = vmul.f32 %v2520_v62, %v2520_v62 }
 0xee5   : > { %v2522_v1 = vsel %vm1063_vm1, %v2521_v63, 0.0 }
 0xee6   : > { %2523 = vadd.xlane.f32.xlu1 %v2522_v1  ;;  %v4839_v1 = vld [vmem:[#allocation5 + $0x1] ss:$0 sm:$0xff] }
 0xf73   : > { %v2524_v6 = vpop.xlane.xlu1 %2523 }
 0xf74   : > { %v2525_v7 = vmul.f32 0.03125, %v2524_v6 }
 0xf76   : > { %v2526_v8 = vadd.f32 1e-05, %v2525_v7 }
 0xf78   : > { %5777 = vrsqrt.f32 %v2526_v8 }
 0xf82   : > { %v5778_v9 = vpop.eup %5777 }
 0xf83   : > { %v2528_v11 = vmul.f32 %v5778_v9, %v2520_v62 }
 0xf85   : > { %v2535_v13 = vmul.f32 %v4817_v10, %v2528_v11 }
 0xf87   : > { %v2542_v14 = vadd.f32 %v4818_v12, %v2535_v13 }
 0xf89   : > { %v2543_v15 = vpack.c.bf16 %v2542_v14, %v2542_v14 }
 0xf8b   : > { %5222 = vmatmul.mubr.msk.bf16.vlgmr.msra.gmra.mrb[48].mxu0 %vm1063_vm1, %v2543_v15 }
 0xf8c   : > { %5241 = vmatprep.mubr.msk.bf16.mxu0 %vm6388_vm0, %v6387_v0  ;;  %5238 = vmatpush3.bf16.msra.mxu0 %v5719_v40 }
 0xf8d   : > { %5239 = vmatprep.subr.bf16.mxu0 %v6387_v0 }
 0xf90   : > { %5240 = vmatpush3.bf16.msra.mxu0 %v5721_v42 }
 0xf91   : > { %5245 = vmatprep.subr.bf16.mxu0 %v6387_v0 }
0x105e   : > { %v2604_v19 = vpop.f32.mrb[48].mxu0 }
0x105f   : > { %v2605_v20 = vadd.f32 %v4819_v18, %v2604_v19  ;;  %v5223_v21 = vpop.f32.mrb[49].mxu0 }
0x1060   : > { %v2607_v23 = vpop.f32.mrb[50].mxu0 }
0x1061   : > { %v2610_v24 = vmax.f32 %v2605_v20, 0.0  ;;  %v5224_v5 = vpop.f32.mrb[51].mxu0 }
0x1063   : > { %v2611_v25 = vpack.c.bf16 %v2610_v24, %v2610_v24 }
0x1065   : > { %5234 = vmatmul.mubr.msk.bf16.vlgmr.msra.gmra.mrb[48].mxu1 %vm2651_vm6, %v2611_v25 }
0x1066   : > { %5257 = vmatprep.mubr.msk.bf16.mxu1 %vm6388_vm0, %v6387_v0  ;;  %5254 = vmatpush3.bf16.msra.mxu1 %v5720_v41 }
0x1067   : > { %5255 = vmatprep.subr.bf16.mxu1 %v6387_v0 }
0x106a   : > { %5256 = vmatpush3.bf16.msra.mxu1 %v5722_v43 }
0x106b   : > { %5267 = vmatprep.subr.bf16.mxu1 %v6387_v0 }
0x1138   : > { %v2689_v28 = vpop.f32.mrb[48].mxu1 }
0x1139   : > { %v2690_v29 = vadd.f32 %v4823_v27, %v2689_v28  ;;  %v5235_v30 = vpop.f32.mrb[49].mxu1 }
0x113a   : > { %v2692_v31 = vpop.f32.mrb[50].mxu1 }
0x113b   : > { %v5236_v32 = vpop.f32.mrb[51].mxu1  ;;  %v2695_v33 = vadd.f32 %v2690_v29, %v2542_v14 }
0x113d   : > { %v2698_v34 = vsel %vm1063_vm1, %v2695_v33, 0.0 }
0x113e   : > { %2699 = vadd.xlane.f32.xlu0 %v2698_v34 }
0x11cb   : > { %v2700_v22 = vpop.xlane.xlu0 %2699 }
0x11cc   : > { %v2701_v35 = vmul.f32 0.03125, %v2700_v22 }
0x11ce   : > { %v2702_v37 = vsub.f32 %v2695_v33, %v2701_v35 }
0x11d0   : > { %v2703_v38 = vmul.f32 %v2702_v37, %v2702_v37 }
0x11d2   : > { %v2704_v39 = vsel %vm1063_vm1, %v2703_v38, 0.0 }
0x11d3   : > { %2705 = vadd.xlane.f32.xlu0 %v2704_v39 }
0x1260   : > { %v2706_v44 = vpop.xlane.xlu0 %2705 }
0x1261   : > { %v2707_v45 = vmul.f32 0.03125, %v2706_v44 }
0x1263   : > { %v2708_v46 = vadd.f32 1e-05, %v2707_v45 }
0x1265   : > { %5779 = vrsqrt.f32 %v2708_v46 }
0x126f   : > { %v5780_v47 = vpop.eup %5779 }
0x1270   : > { %v2710_v49 = vmul.f32 %v5780_v47, %v2702_v37 }
0x1272   : > { %v2717_v51 = vmul.f32 %v4829_v48, %v2710_v49 }
0x1274   : > { %v7233_v52 = vadd.f32 %v4830_v50, %v2717_v51 }
0x1276   : > { %v2725_v54 = vpack.c.bf16 %v7233_v52, %v7233_v52 }
0x1278   : > { %5242 = vmatmul.mubr.msk.bf16.vlgmr.msra.gmra.mrb[52].mxu0 %vm1063_vm1, %v2725_v54  ;;  %5258 = vmatmul.mubr.msk.bf16.vlgmr.msra.gmra.mrb[52].mxu1 %vm1063_vm1, %v2725_v54 }
0x1279   : > { %5246 = vmatpush3.bf16.msra.mxu0 %v5723_v53  ;;  %5249 = vmatprep.mubr.msk.bf16.mxu0 %vm6388_vm0, %v6387_v0 }
0x127a   : > { %5247 = vmatprep.subr.bf16.mxu0 %v6387_v0  ;;  %5269 = vmatprep.mubr.msk.bf16.mxu1 %vm6388_vm0, %v6387_v0 }
0x127d   : > { %5248 = vmatpush3.bf16.msra.mxu0 %v5724_v55 }
0x127e   : > { %5261 = vmatprep.subr.bf16.mxu0 %v6387_v0 }
0x1280   : > { %5250 = vmatmul.mubr.msk.bf16.vlgmr.msra.gmra.mrb[56].mxu0 %vm1063_vm1, %v2725_v54 }
0x1281   : > { %5263 = vmatprep.mubr.msk.bf16.mxu0 %vm6388_vm0, %v6387_v0 }
0x134b   : > { %v2805_v56 = vpop.f32.mrb[52].mxu0  ;;  %v7254_v57 = vpop.f32.mrb[52].mxu1 }
0x134c   : > { %v5243_v58 = vpop.f32.mrb[53].mxu0  ;;  %v5259_v59 = vpop.f32.mrb[53].mxu1  ;;  %v2806_v6 = vadd.f32 %v4839_v1, %v2805_v56  ;;  %v2953_v18 = vpack.c.bf16 %v7254_v57, %v7254_v57 }
0x134d   : > { %v2808_v60 = vpop.f32.mrb[54].mxu0  ;;  %v2912_v61 = vpop.f32.mrb[54].mxu1 }
0x134e   : > { %v5244_v62 = vpop.f32.mrb[55].mxu0  ;;  %v5260_v63 = vpop.f32.mrb[55].mxu1  ;;  %v2925_v9 = vpack.c.bf16 %v2806_v6, %v2806_v6  ;;  %v3193_v5 = vsel %vm1489_vm3, %v2953_v18, 0 }
0x1353   : > { %v2857_v2 = vpop.f32.mrb[56].mxu0 }
0x1354   : > { %2933 = vrot.lane.b32.xlu0 %v2857_v2, %s6390_s27  ;;  %2930 = vrot.lane.b32.xlu1 %v2857_v2, %s6389_s5  ;;  %v5251_v3 = vpop.f32.mrb[57].mxu0  ;;  %v2939_v36 = vpack.c.bf16 %v2857_v2, %v2857_v2 }
0x1355   : > { %v2860_v4 = vpop.f32.mrb[58].mxu0 }
0x1356   : > { %v5252_v7 = vpop.f32.mrb[59].mxu0  ;;  %v2961_v8 = vsel %vm1253_vm2, %v2939_v36, 0 }
0x1357   : > { %5262 = vmatpush3.bf16.xpose.msra.mxu0 %v2961_v8 }
0x1358   : > { %2919 = vrot.lane.b32.xlu0 %v2806_v6, %s6390_s27  ;;  %2916 = vrot.lane.b32.xlu1 %v2806_v6, %s6389_s5 }
0x1359   : > { %5273 = vmatprep.subr.bf16.mxu0 %v6387_v0 }
0x135c   : > { %2936 = vrot.lane.b32.xlu1 %v2857_v2, %s6391_s11 }
0x135e   : > { %5264 = vmatmul.mubr.msk.bf16.vlgmr.msra.gmra.mrb[60].mxu0 %vm1253_vm2, %v2925_v9 }
0x135f   : > { %5275 = vmatprep.mubr.msk.bf16.mxu0 %vm6388_vm0, %v6387_v0 }
0x1360   : > { %2922 = vrot.lane.b32.xlu1 %v2806_v6, %s6391_s11 }
0x13c6   : > { %v2934_v10 = vpop.permute.xlu0 %2933  ;;  %v2931_v11 = vpop.permute.xlu1 %2930 }
0x13c7   : > { %v2941_v12 = vpack.c.bf16 %v2934_v10, %v2934_v10  ;;  %v2940_v13 = vpack.c.bf16 %v2931_v11, %v2931_v11 }
0x13c9   : > { %v3053_v14 = vsel %vm1253_vm2, %v2941_v12, 0  ;;  %v3007_v15 = vsel %vm1253_vm2, %v2940_v13, 0 }
0x13ca   : > { %5268 = vmatpush3.bf16.xpose.msra.mxu1 %v3007_v15  ;;  %v2917_v16 = vpop.permute.xlu1 %2916  ;;  %5274 = vmatpush3.bf16.xpose.msra.mxu0 %v3053_v14  ;;  %v2920_v17 = vpop.permute.xlu0 %2919 }
0x13cb   : > { %5279 = vmatprep.subr.bf16.mxu1 %v6387_v0  ;;  %5285 = vmatprep.subr.bf16.mxu0 %v6387_v0  ;;  %v2927_v20 = vpack.c.bf16 %v2920_v17, %v2920_v17  ;;  %v2926_v21 = vpack.c.bf16 %v2917_v16, %v2917_v16 }
0x13ce   : > { %v2937_v19 = vpop.permute.xlu1 %2936 }
0x13cf   : > { %v2942_v23 = vpack.c.bf16 %v2937_v19, %v2937_v19 }
0x13d1   : > { %v3099_v24 = vsel %vm1253_vm2, %v2942_v23, 0  ;;  %5270 = vmatmul.mubr.msk.bf16.vlgmr.msra.gmra.mrb[56].mxu1 %vm1253_vm2, %v2926_v21  ;;  %5276 = vmatmul.mubr.msk.bf16.vlgmr.msra.gmra.mrb[64].mxu0 %vm1253_vm2, %v2927_v20 }
0x13d2   : > { %5280 = vmatpush3.bf16.xpose.msra.mxu1 %v3099_v24  ;;  %5286 = vmatpush3.bf16.msra.mxu0 %v3193_v5  ;;  %v2923_v25 = vpop.permute.xlu1 %2922 }
0x13d3   : > { %5281 = vmatprep.mubr.msk.bf16.mxu1 %vm6388_vm0, %v6387_v0  ;;  %5291 = vmatprep.subr.bf16.mxu1 %v6387_v0  ;;  %v2928_v27 = vpack.c.bf16 %v2923_v25, %v2923_v25 }
0x13d4   : > { %5287 = vmatprep.mubr.msk.bf16.mxu0 %vm6388_vm0, %v6387_v0  ;;  %5297 = vmatprep.subr.bf16.mxu0 %v6387_v0 }
0x13d9   : > { %5282 = vmatmul.mubr.msk.bf16.vlgmr.msra.gmra.mrb[60].mxu1 %vm1253_vm2, %v2928_v27 }
0x13da   : > { %5293 = vmatprep.mubr.msk.bf16.mxu1 %vm6388_vm0, %v6387_v0 }
0x1431   : > { %v2997_v28 = vpop.f32.mrb[60].mxu0 }
0x1432   : > { %v5265_v29 = vpop.f32.mrb[61].mxu0  ;;  %v3141_v30 = vsel %vm1253_vm2, %v2997_v28, -inf }
0x1433   : > { %3142 = vmax.xlane.f32.xlu0 %v3141_v30  ;;  %v3000_v31 = vpop.f32.mrb[62].mxu0 }
0x1434   : > { %v5266_v32 = vpop.f32.mrb[63].mxu0 }
0x14a4   : > { %v3043_v33 = vpop.f32.mrb[56].mxu1  ;;  %v3089_v34 = vpop.f32.mrb[64].mxu0 }
0x14a5   : > { %v5271_v22 = vpop.f32.mrb[57].mxu1  ;;  %v5277_v35 = vpop.f32.mrb[65].mxu0  ;;  %v3144_v37 = vsel %vm1253_vm2, %v3043_v33, -inf  ;;  %v3147_v38 = vsel %vm1253_vm2, %v3089_v34, -inf }
0x14a6   : > { %3145 = vmax.xlane.f32.xlu1 %v3144_v37  ;;  %v3046_v39 = vpop.f32.mrb[58].mxu1  ;;  %3148 = vmax.xlane.f32.xlu0 %v3147_v38  ;;  %v3092_v40 = vpop.f32.mrb[66].mxu0  ;;  %v5725_v35 = vld [vmem:[#allocation8 + $0x10] sm:$0xff]   ;;  %v5726_v37 = vld [vmem:[#allocation8 + $0x18] sm:$0xff]  }
0x14a7   : > { %v5272_v41 = vpop.f32.mrb[59].mxu1  ;;  %v5278_v42 = vpop.f32.mrb[67].mxu0 }
0x14ac   : > { %v3135_v43 = vpop.f32.mrb[60].mxu1 }
0x14ad   : > { %v5283_v44 = vpop.f32.mrb[61].mxu1  ;;  %v3150_v45 = vsel %vm1253_vm2, %v3135_v43, -inf }
0x14ae   : > { %v3138_v46 = vpop.f32.mrb[62].mxu1  ;;  %3151 = vmax.xlane.f32.xlu0 %v3150_v45 }
0x14af   : > { %v5284_v47 = vpop.f32.mrb[63].mxu1 }
0x14b7   : > { %2944 = vrot.lane.b32.xlu1 %v7254_v57, %s6389_s5 }
0x14c0   : > { %v3143_v48 = vpop.xlane.xlu0 %3142 }
0x14c1   : > { %v3153_v49 = vsub.f32 %v2997_v28, %v3143_v48 }
0x14c3   : > { %v3157_v50 = vmul.f32 1.442695, %v3153_v49 }
0x14c5   : > { %5781 = vpow2.f32 %v3157_v50 }
0x14cf   : > { %v5782_v51 = vpop.eup %5781 }
0x14d0   : > { %v3165_v53 = vsel %vm1253_vm2, %v5782_v51, 0.0 }
0x14db   : > { %3166 = vadd.xlane.f32.xlu1 %v3165_v53 }
0x1533   : > { %v3146_v54 = vpop.xlane.xlu1 %3145  ;;  %v3149_v55 = vpop.xlane.xlu0 %3148 }
0x1534   : > { %v3154_v56 = vsub.f32 %v3043_v33, %v3146_v54  ;;  %v3155_v58 = vsub.f32 %v3089_v34, %v3149_v55 }
0x1536   : > { %v3159_v59 = vmul.f32 1.442695, %v3154_v56  ;;  %v3161_v60 = vmul.f32 1.442695, %v3155_v58 }
0x1537   : > { %v2945_v61 = vpop.permute.xlu1 %2944 }
0x1538   : > { %5783 = vpow2.f32 %v3159_v59  ;;  %v2954_v62 = vpack.c.bf16 %v2945_v61, %v2945_v61  ;;  %v4857_v59 = vld [vmem:[#allocation10 + $0x1] ss:$0 sm:$0xff] }
0x1539   : > { %5785 = vpow2.f32 %v3161_v60 }
0x153a   : > { %v3239_v63 = vsel %vm1489_vm3, %v2954_v62, 0 }
0x153b   : > { %5292 = vmatpush3.bf16.msra.mxu1 %v3239_v63  ;;  %v3152_v1 = vpop.xlane.xlu0 %3151 }
0x153c   : > { %v3156_v2 = vsub.f32 %v3135_v43, %v3152_v1  ;;  %5303 = vmatprep.subr.bf16.mxu1 %v6387_v0 }
0x153e   : > { %v3163_v3 = vmul.f32 1.442695, %v3156_v2 }
0x1540   : > { %5787 = vpow2.f32 %v3163_v3 }
0x1542   : > { %v5784_v36 = vpop.eup %5783 }
0x1543   : > { %v5786_v4 = vpop.eup %5785  ;;  %v3168_v6 = vsel %vm1253_vm2, %v5784_v36, 0.0 }
0x1544   : > { %3169 = vadd.xlane.f32.xlu0 %v3168_v6  ;;  %v3171_v7 = vsel %vm1253_vm2, %v5786_v4, 0.0 }
0x1545   : > { %3172 = vadd.xlane.f32.xlu1 %v3171_v7 }
0x154a   : > { %v5788_v8 = vpop.eup %5787 }
0x154b   : > { %v3174_v9 = vsel %vm1253_vm2, %v5788_v8, 0.0 }
0x154c   : > { %3175 = vadd.xlane.f32.xlu0 %v3174_v9 }
0x1556   : > { %2950 = vrot.lane.b32.xlu1 %v7254_v57, %s6391_s11 }
0x1562   : > { %2947 = vrot.lane.b32.xlu0 %v7254_v57, %s6390_s27 }
0x1568   : > { %v3167_v10 = vpop.xlane.xlu1 %3166 }
0x1569   : > { %5789 = vrcp.f32 %v3167_v10  ;;  %v5728_v10 = vld [vmem:[#allocation16 + $0x18] sm:$0xff]  }
0x1573   : > { %v5790_v11 = vpop.eup %5789 }
0x1574   : > { %v3181_v12 = vmul.f32 %v5790_v11, %v5782_v51  ;;  %v5730_v11 = vld [vmem:[%s7657_s2 + $0x18] sm:$0xff]  }
0x1576   : > { %v3185_v13 = vpack.c.bf16 %v3181_v12, %v3181_v12 }
0x1578   : > { %5288 = vmatmul.mubr.msk.bf16.vlgmr.msra.gmra.mrb[68].mxu0 %vm1253_vm2, %v3185_v13 }
0x1579   : > { %5299 = vmatprep.mubr.msk.bf16.mxu0 %vm6388_vm0, %v6387_v0 }
0x15d1   : > { %v3170_v14 = vpop.xlane.xlu0 %3169 }
0x15d2   : > { %v3173_v15 = vpop.xlane.xlu1 %3172  ;;  %5791 = vrcp.f32 %v3170_v14 }
0x15d3   : > { %5793 = vrcp.f32 %v3173_v15 }
0x15d6   : > { %v2951_v17 = vpop.permute.xlu1 %2950 }
0x15d7   : > { %v2956_v20 = vpack.c.bf16 %v2951_v17, %v2951_v17 }
0x15d9   : > { %v3176_v16 = vpop.xlane.xlu0 %3175  ;;  %v3331_v27 = vsel %vm1489_vm3, %v2956_v20, 0 }
0x15da   : > { %5795 = vrcp.f32 %v3176_v16  ;;  %v4861_v16 = vld [vmem:[#allocation11 + $0x1] ss:$0 sm:$0xff] }
0x15dc   : > { %v5792_v18 = vpop.eup %5791 }
0x15dd   : > { %v5794_v19 = vpop.eup %5793  ;;  %v3182_v57 = vmul.f32 %v5792_v18, %v5784_v36  ;;  %v2948_v21 = vpop.permute.xlu0 %2947  ;;  %v5727_v36 = vld [vmem:[#allocation16 + $0x10] sm:$0xff]   ;;  %v4862_v18 = vld [vmem:[#allocation13 + $0x1] ss:$0 sm:$0xff] }
0x15de   : > { %v3183_v23 = vmul.f32 %v5794_v19, %v5786_v4  ;;  %v2955_v24 = vpack.c.bf16 %v2948_v21, %v2948_v21 }
0x15df   : > { %v3186_v5 = vpack.c.bf16 %v3182_v57, %v3182_v57 }
0x15e0   : > { %v3285_v25 = vsel %vm1489_vm3, %v2955_v24, 0  ;;  %v3187_v28 = vpack.c.bf16 %v3183_v23, %v3183_v23 }
0x15e1   : > { %5294 = vmatmul.mubr.msk.bf16.vlgmr.msra.gmra.mrb[64].mxu1 %vm1253_vm2, %v3186_v5  ;;  %5298 = vmatpush3.bf16.msra.mxu0 %v3285_v25 }
0x15e2   : > { %5304 = vmatpush3.bf16.msra.mxu1 %v3331_v27  ;;  %5305 = vmatprep.mubr.msk.bf16.mxu1 %vm6388_vm0, %v6387_v0 }
0x15e3   : > { %5309 = vmatprep.subr.bf16.mxu0 %v6387_v0  ;;  %5317 = vmatprep.subr.bf16.mxu1 %v6387_v0 }
0x15e4   : > { %v5796_v29 = vpop.eup %5795  ;;  %5300 = vmatmul.mubr.msk.bf16.vlgmr.msra.gmra.mrb[72].mxu0 %vm1253_vm2, %v3187_v28 }
0x15e5   : > { %v3184_v30 = vmul.f32 %v5796_v29, %v5788_v8  ;;  %5313 = vmatprep.mubr.msk.bf16.mxu0 %vm6388_vm0, %v6387_v0  ;;  %5310 = vmatpush3.bf16.msra.mxu0 %v5725_v35  ;;  %v5731_v29 = vld [vmem:[#allocation17 + $0x10] sm:$0xff]  }
0x15e6   : > { %5311 = vmatprep.subr.bf16.mxu0 %v6387_v0 }
0x15e7   : > { %v3188_v31 = vpack.c.bf16 %v3184_v30, %v3184_v30  ;;  %v5732_v30 = vld [vmem:[#allocation17 + $0x18] sm:$0xff]  }
0x15e9   : > { %5306 = vmatmul.mubr.msk.bf16.vlgmr.msra.gmra.mrb[68].mxu1 %vm1253_vm2, %v3188_v31  ;;  %5312 = vmatpush3.bf16.msra.mxu0 %v5726_v37 }
0x15ea   : > { %5321 = vmatprep.mubr.msk.bf16.mxu1 %vm6388_vm0, %v6387_v0  ;;  %5325 = vmatprep.subr.bf16.mxu0 %v6387_v0 }
0x164b   : > { %v3229_v32 = vpop.f32.mrb[68].mxu0 }
0x164c   : > { %v5289_v33 = vpop.f32.mrb[69].mxu0 }
0x164d   : > { %v3232_v34 = vpop.f32.mrb[70].mxu0 }
0x164e   : > { %v5290_v22 = vpop.f32.mrb[71].mxu0 }
0x16b4   : > { %v3275_v38 = vpop.f32.mrb[64].mxu1 }
0x16b5   : > { %3374 = vrot.lane.b32.xlu1 %v3275_v38, %s6392_s19  ;;  %v5295_v39 = vpop.f32.mrb[65].mxu1 }
0x16b6   : > { %v3278_v40 = vpop.f32.mrb[66].mxu1  ;;  %v4867_v39 = vld [vmem:[#allocation14 + $0x1] ss:$0 sm:$0xff] }
0x16b7   : > { %v5296_v41 = vpop.f32.mrb[67].mxu1  ;;  %v3321_v42 = vpop.f32.mrb[72].mxu0 }
0x16b8   : > { %3378 = vrot.lane.b32.xlu0 %v3321_v42, %s6393_s13  ;;  %v5301_v43 = vpop.f32.mrb[73].mxu0 }
0x16b9   : > { %v3324_v44 = vpop.f32.mrb[74].mxu0 }
0x16ba   : > { %v5302_v45 = vpop.f32.mrb[75].mxu0 }
0x16bc   : > { %v3367_v46 = vpop.f32.mrb[68].mxu1 }
0x16bd   : > { %3382 = vrot.lane.b32.xlu1 %v3367_v46, %s6394_s0  ;;  %v5307_v47 = vpop.f32.mrb[69].mxu1 }
0x16be   : > { %v3370_v48 = vpop.f32.mrb[70].mxu1 }
0x16bf   : > { %v5308_v49 = vpop.f32.mrb[71].mxu1 }
0x1727   : > { %v3375_v50 = vpop.permute.xlu1 %3374 }
0x1728   : > { %v3385_v53 = vsel %vm1253_vm2, %v3229_v32, %v3375_v50 }
0x172a   : > { %v3379_v51 = vpop.permute.xlu0 %3378 }
0x172b   : > { %v3386_v54 = vsel %vm1684_vm4, %v3385_v53, %v3379_v51 }
0x172f   : > { %v3383_v55 = vpop.permute.xlu1 %3382 }
0x1730   : > { %v3387_v56 = vsel %vm1686_vm5, %v3386_v54, %v3383_v55 }
0x1731   : > { %v3388_v58 = vpack.c.bf16 %v3387_v56, %v3387_v56 }
0x1733   : > { %5314 = vmatmul.mubr.msk.bf16.vlgmr.msra.gmra.mrb[76].mxu0 %vm1063_vm1, %v3388_v58 }
0x1734   : > { %5329 = vmatprep.mubr.msk.bf16.mxu0 %vm6388_vm0, %v6387_v0  ;;  %5326 = vmatpush3.bf16.msra.mxu0 %v5727_v36 }
0x1735   : > { %5327 = vmatprep.subr.bf16.mxu0 %v6387_v0 }
0x1738   : > { %5328 = vmatpush3.bf16.msra.mxu0 %v5728_v10 }
0x1739   : > { %5341 = vmatprep.subr.bf16.mxu0 %v6387_v0 }
0x173b   : > { %5330 = vmatmul.mubr.msk.bf16.vlgmr.msra.gmra.mrb[80].mxu0 %vm1063_vm1, %v7090_v26 }
0x173c   : > { %5343 = vmatprep.mubr.msk.bf16.mxu0 %vm6388_vm0, %v6387_v0 }
0x1806   : > { %v3444_v60 = vpop.f32.mrb[76].mxu0 }
0x1807   : > { %v3445_v61 = vadd.f32 %v4857_v59, %v3444_v60  ;;  %v5315_v62 = vpop.f32.mrb[77].mxu0 }
0x1808   : > { %v3447_v63 = vpop.f32.mrb[78].mxu0 }
0x1809   : > { %v5316_v1 = vpop.f32.mrb[79].mxu0  ;;  %v3450_v2 = vadd.f32 %v3445_v61, %v7233_v52  ;;  %v5729_v52 = vld [vmem:[%s7657_s2 + $0x10] sm:$0xff]  }
0x180a   : > { %5318 = vmatpush3.bf16.msra.mxu1 %v5729_v52 }
0x180b   : > { %v3455_v3 = vsel %vm1063_vm1, %v3450_v2, 0.0  ;;  %5319 = vmatprep.subr.bf16.mxu1 %v6387_v0 }
0x180c   : > { %3456 = vadd.xlane.f32.xlu0 %v3455_v3 }
0x180e   : > { %5320 = vmatpush3.bf16.msra.mxu1 %v5730_v11  ;;  %v3614_v21 = vpop.f32.mrb[80].mxu0 }
0x180f   : > { %5333 = vmatprep.subr.bf16.mxu1 %v6387_v0  ;;  %v5331_v23 = vpop.f32.mrb[81].mxu0 }
0x1810   : > { %v3617_v24 = vpop.f32.mrb[82].mxu0 }
0x1811   : > { %v5672_v5 = vpack.i.bf16 %v3617_v24, %v3614_v21  ;;  %v5332_v25 = vpop.f32.mrb[83].mxu0  ;;  %v3708_v27 = vpack.c.bf16 %v3617_v24, %v3614_v21 }
0x1813   : > { %v3740_v28 = vsel %vm1253_vm2, %v3708_v27, 0 }
0x1814   : > { %5342 = vmatpush3.bf16.xpose.msra.mxu0 %v3740_v28 }
0x1815   : > { %5353 = vmatprep.subr.bf16.mxu0 %v6387_v0 }
0x1822   : > { %5668 = vrot.lane.b32.xlu0 %v5672_v5, %s6389_s5 }
0x1899   : > { %v3457_v4 = vpop.xlane.xlu0 %3456 }
0x189a   : > { %v3458_v6 = vmul.f32 0.03125, %v3457_v4 }
0x189c   : > { %v3459_v7 = vsub.f32 %v3450_v2, %v3458_v6 }
0x189d   : > { %v5669_v31 = vpop.permute.xlu0 %5668 }
0x189e   : > { %v3460_v8 = vmul.f32 %v3459_v7, %v3459_v7  ;;  %v5671_v32 = vunpack.i.h.bf16 %v5669_v31  ;;  %v5670_v33 = vunpack.i.l.bf16 %v5669_v31 }
0x18a0   : > { %v3461_v9 = vsel %vm1063_vm1, %v3460_v8, 0.0  ;;  %v3709_v34 = vpack.c.bf16 %v5671_v32, %v5670_v33 }
0x18a1   : > { %3462 = vadd.xlane.f32.xlu1 %v3461_v9 }
0x18a2   : > { %v3786_v22 = vsel %vm1253_vm2, %v3709_v34, 0 }
0x18b2   : > { %5673 = vrot.lane.b32.xlu1 %v5672_v5, %s6390_s27 }
0x18b6   : > { %5678 = vrot.lane.b32.xlu1 %v5672_v5, %s6391_s11 }
0x192e   : > { %v3463_v12 = vpop.xlane.xlu1 %3462 }
0x192f   : > { %v3464_v13 = vmul.f32 0.03125, %v3463_v12 }
0x1931   : > { %v3465_v14 = vadd.f32 1e-05, %v3464_v13 }
0x1932   : > { %v5674_v35 = vpop.permute.xlu1 %5673 }
0x1933   : > { %5797 = vrsqrt.f32 %v3465_v14  ;;  %v5676_v37 = vunpack.i.h.bf16 %v5674_v35  ;;  %v5675_v38 = vunpack.i.l.bf16 %v5674_v35 }
0x1935   : > { %v3710_v40 = vpack.c.bf16 %v5676_v37, %v5675_v38 }
0x1936   : > { %v5679_v53 = vpop.permute.xlu1 %5678 }
0x1937   : > { %v3832_v46 = vsel %vm1253_vm2, %v3710_v40, 0  ;;  %v5681_v54 = vunpack.i.h.bf16 %v5679_v53  ;;  %v5680_v55 = vunpack.i.l.bf16 %v5679_v53 }
0x1939   : > { %v3711_v56 = vpack.c.bf16 %v5681_v54, %v5680_v55 }
0x193b   : > { %v3878_v60 = vsel %vm1253_vm2, %v3711_v56, 0 }
0x193d   : > { %v5798_v15 = vpop.eup %5797 }
0x193e   : > { %v3467_v17 = vmul.f32 %v5798_v15, %v3459_v7 }
0x1940   : > { %v3474_v19 = vmul.f32 %v4861_v16, %v3467_v17 }
0x1942   : > { %v7346_v57 = vadd.f32 %v4862_v18, %v3474_v19 }
0x1944   : > { %v3482_v20 = vpack.c.bf16 %v7346_v57, %v7346_v57 }
0x1946   : > { %5322 = vmatmul.mubr.msk.bf16.vlgmr.msra.gmra.mrb[72].mxu1 %vm1063_vm1, %v3482_v20 }
0x1947   : > { %5337 = vmatprep.mubr.msk.bf16.mxu1 %vm6388_vm0, %v6387_v0  ;;  %5334 = vmatpush3.bf16.msra.mxu1 %v5731_v29 }
0x1948   : > { %5335 = vmatprep.subr.bf16.mxu1 %v6387_v0 }
0x194b   : > { %5336 = vmatpush3.bf16.msra.mxu1 %v5732_v30 }
0x194c   : > { %5347 = vmatprep.subr.bf16.mxu1 %v6387_v0 }
0x194e   : > { %5338 = vmatmul.mubr.msk.bf16.vlgmr.msra.gmra.mrb[76].mxu1 %vm1063_vm1, %v7090_v26 }
0x194f   : > { %5349 = vmatprep.mubr.msk.bf16.mxu1 %vm6388_vm0, %v6387_v0 }
0x1954   : > { %5348 = vmatpush3.bf16.xpose.msra.mxu1 %v3786_v22 }
0x1955   : > { %5359 = vmatprep.subr.bf16.mxu1 %v6387_v0 }
0x1a19   : > { %v3562_v41 = vpop.f32.mrb[72].mxu1 }
0x1a1a   : > { %v3563_v42 = vadd.f32 %v4867_v39, %v3562_v41  ;;  %v5323_v26 = vpop.f32.mrb[73].mxu1 }
0x1a1b   : > { %v3565_v43 = vpop.f32.mrb[74].mxu1 }
0x1a1c   : > { %v3684_v44 = vpack.c.bf16 %v3563_v42, %v3563_v42  ;;  %v5324_v45 = vpop.f32.mrb[75].mxu1  ;;  %3681 = vrot.lane.b32.xlu1 %v3563_v42, %s6391_s11  ;;  %3675 = vrot.lane.b32.xlu0 %v3563_v42, %s6389_s5 }
0x1a1e   : > { %5344 = vmatmul.mubr.msk.bf16.vlgmr.msra.gmra.mrb[84].mxu0 %vm1253_vm2, %v3684_v44 }
0x1a1f   : > { %5354 = vmatpush3.bf16.xpose.msra.mxu0 %v3832_v46  ;;  %5355 = vmatprep.mubr.msk.bf16.mxu0 %vm6388_vm0, %v6387_v0 }
0x1a20   : > { %3678 = vrot.lane.b32.xlu0 %v3563_v42, %s6390_s27  ;;  %5365 = vmatprep.subr.bf16.mxu0 %v6387_v0 }
0x1a21   : > { %v3667_v47 = vpop.f32.mrb[76].mxu1 }
0x1a22   : > { %v5339_v48 = vpop.f32.mrb[77].mxu1 }
0x1a23   : > { %v3670_v49 = vpop.f32.mrb[78].mxu1 }
0x1a24   : > { %v3732_v50 = vpack.c.bf16 %v3670_v49, %v3667_v47  ;;  %v5340_v51 = vpop.f32.mrb[79].mxu1  ;;  %v5682_v2 = vpack.i.bf16 %v3670_v49, %v3667_v47 }
0x1a8e   : > { %v3676_v58 = vpop.permute.xlu0 %3675  ;;  %v3682_v63 = vpop.permute.xlu1 %3681 }
0x1a8f   : > { %v3685_v59 = vpack.c.bf16 %v3676_v58, %v3676_v58  ;;  %v3687_v1 = vpack.c.bf16 %v3682_v63, %v3682_v63 }
0x1a91   : > { %5350 = vmatmul.mubr.msk.bf16.vlgmr.msra.gmra.mrb[80].mxu1 %vm1253_vm2, %v3685_v59 }
0x1a92   : > { %5360 = vmatpush3.bf16.xpose.msra.mxu1 %v3878_v60  ;;  %v3679_v61 = vpop.permute.xlu0 %3678  ;;  %5361 = vmatprep.mubr.msk.bf16.mxu1 %vm6388_vm0, %v6387_v0 }
0x1a93   : > { %v3686_v62 = vpack.c.bf16 %v3679_v61, %v3679_v61  ;;  %5371 = vmatprep.subr.bf16.mxu1 %v6387_v0 }
0x1a95   : > { %5356 = vmatmul.mubr.msk.bf16.vlgmr.msra.gmra.mrb[88].mxu0 %vm1253_vm2, %v3686_v62 }
0x1a96   : > { %5366 = vmatpush3.bf16.msra.mxu0 %v3732_v50  ;;  %5367 = vmatprep.mubr.msk.bf16.mxu0 %vm6388_vm0, %v6387_v0 }
0x1a97   : > { %5377 = vmatprep.subr.bf16.mxu0 %v6387_v0 }
0x1a99   : > { %5362 = vmatmul.mubr.msk.bf16.vlgmr.msra.gmra.mrb[84].mxu1 %vm1253_vm2, %v3687_v1 }
0x1a9a   : > { %5373 = vmatprep.mubr.msk.bf16.mxu1 %vm6388_vm0, %v6387_v0 }
0x1af1   : > { %v3776_v3 = vpop.f32.mrb[84].mxu0 }
0x1af2   : > { %v5345_v36 = vpop.f32.mrb[85].mxu0  ;;  %v3920_v4 = vsel %vm1684_vm4, %v3776_v3, -inf }
0x1af3   : > { %3921 = vmax.xlane.f32.xlu0 %v3920_v4  ;;  %v3779_v6 = vpop.f32.mrb[86].mxu0 }
0x1af4   : > { %v5346_v7 = vpop.f32.mrb[87].mxu0 }
0x1b64   : > { %v3822_v8 = vpop.f32.mrb[80].mxu1 }
0x1b65   : > { %v5351_v9 = vpop.f32.mrb[81].mxu1  ;;  %v3923_v10 = vsel %vm1684_vm4, %v3822_v8, -inf }
0x1b66   : > { %3924 = vmax.xlane.f32.xlu1 %v3923_v10  ;;  %v3825_v52 = vpop.f32.mrb[82].mxu1 }
0x1b67   : > { %v5352_v11 = vpop.f32.mrb[83].mxu1 }
0x1b68   : > { %v3868_v12 = vpop.f32.mrb[88].mxu0 }
0x1b69   : > { %v5357_v13 = vpop.f32.mrb[89].mxu0  ;;  %v3926_v14 = vsel %vm1684_vm4, %v3868_v12, -inf }
0x1b6a   : > { %3927 = vmax.xlane.f32.xlu0 %v3926_v14  ;;  %v3871_v15 = vpop.f32.mrb[90].mxu0  ;;  %v5734_v13 = vld [vmem:[#allocation19 + $0x18] sm:$0xff]  }
0x1b6b   : > { %v5358_v16 = vpop.f32.mrb[91].mxu0 }
0x1b6c   : > { %v3914_v17 = vpop.f32.mrb[84].mxu1 }
0x1b6d   : > { %v5363_v18 = vpop.f32.mrb[85].mxu1  ;;  %v3929_v19 = vsel %vm1684_vm4, %v3914_v17, -inf }
0x1b6e   : > { %v3917_v20 = vpop.f32.mrb[86].mxu1  ;;  %3930 = vmax.xlane.f32.xlu0 %v3929_v19 }
0x1b6f   : > { %v5364_v21 = vpop.f32.mrb[87].mxu1 }
0x1b77   : > { %5683 = vrot.lane.b32.xlu1 %v5682_v2, %s6389_s5  ;;  %s4922_s5 = sshll.u32 %s6552_s8, 7 }
0x1b78   : > { %s7477_s1 = scalar_lea.hbm %s7667_s9, %s4922_s5 }
0x1b80   : > { %v3922_v23 = vpop.xlane.xlu0 %3921 }
0x1b81   : > { %v3932_v24 = vsub.f32 %v3776_v3, %v3922_v23 }
0x1b83   : > { %v3936_v5 = vmul.f32 1.442695, %v3932_v24 }
0x1b85   : > { %5799 = vpow2.f32 %v3936_v5 }
0x1b8f   : > { %v5800_v25 = vpop.eup %5799 }
0x1b90   : > { %v3944_v27 = vsel %vm1684_vm4, %v5800_v25, 0.0 }
0x1b9b   : > { %3945 = vadd.xlane.f32.xlu1 %v3944_v27 }
0x1bf3   : > { %v3925_v28 = vpop.xlane.xlu1 %3924 }
0x1bf4   : > { %v3933_v29 = vsub.f32 %v3822_v8, %v3925_v28 }
0x1bf6   : > { %v3938_v30 = vmul.f32 1.442695, %v3933_v29 }
0x1bf7   : > { %v5684_v31 = vpop.permute.xlu1 %5683  ;;  %v3928_v32 = vpop.xlane.xlu0 %3927 }
0x1bf8   : > { %5801 = vpow2.f32 %v3938_v30  ;;  %v5686_v33 = vunpack.i.h.bf16 %v5684_v31  ;;  %v5685_v34 = vunpack.i.l.bf16 %v5684_v31  ;;  %v3934_v22 = vsub.f32 %v3868_v12, %v3928_v32  ;;  %v5733_v12 = vld [vmem:[#allocation19 + $0x10] sm:$0xff]  }
0x1bfa   : > { %v3733_v35 = vpack.c.bf16 %v5686_v33, %v5685_v34  ;;  %v3940_v37 = vmul.f32 1.442695, %v3934_v22  ;;  %v4885_v34 = vld [vmem:[#allocation20 + $0x1] ss:$0 sm:$0xff] }
0x1bfb   : > { %v3931_v38 = vpop.xlane.xlu0 %3930 }
0x1bfc   : > { %5803 = vpow2.f32 %v3940_v37  ;;  %v3935_v39 = vsub.f32 %v3914_v17, %v3931_v38  ;;  %5372 = vmatpush3.bf16.msra.mxu1 %v3733_v35 }
0x1bfd   : > { %5383 = vmatprep.subr.bf16.mxu1 %v6387_v0 }
0x1bfe   : > { %v3942_v40 = vmul.f32 1.442695, %v3935_v39 }
0x1c00   : > { %5805 = vpow2.f32 %v3942_v40 }
0x1c02   : > { %v5802_v41 = vpop.eup %5801 }
0x1c03   : > { %v3947_v42 = vsel %vm1684_vm4, %v5802_v41, 0.0 }
0x1c04   : > { %3948 = vadd.xlane.f32.xlu0 %v3947_v42 }
0x1c06   : > { %v5804_v26 = vpop.eup %5803 }
0x1c07   : > { %v3950_v43 = vsel %vm1684_vm4, %v5804_v26, 0.0 }
0x1c08   : > { %3951 = vadd.xlane.f32.xlu1 %v3950_v43 }
0x1c0a   : > { %v5806_v44 = vpop.eup %5805 }
0x1c0b   : > { %v3953_v45 = vsel %vm1684_vm4, %v5806_v44, 0.0 }
0x1c0c   : > { %3954 = vadd.xlane.f32.xlu0 %v3953_v45 }
0x1c19   : > { %5693 = vrot.lane.b32.xlu1 %v5682_v2, %s6391_s11  ;;  %s7663_s11 = sld [smem:[#allocation65_spill]] }
0x1c22   : > { %5688 = vrot.lane.b32.xlu0 %v5682_v2, %s6390_s27 }
0x1c28   : > { %v3946_v46 = vpop.xlane.xlu1 %3945 }
0x1c29   : > { %5807 = vrcp.f32 %v3946_v46  ;;  %v5735_v46 = vld [vmem:[%s7537_s18 + $0x10] sm:$0xff]  }
0x1c33   : > { %v5808_v47 = vpop.eup %5807 }
0x1c34   : > { %v3960_v48 = vmul.f32 %v5808_v47, %v5800_v25  ;;  %v5736_v47 = vld [vmem:[%s7537_s18 + $0x18] sm:$0xff]  }
0x1c36   : > { %v3964_v49 = vpack.c.bf16 %v3960_v48, %v3960_v48  ;;  %v5738_v48 = vld [vmem:[%s7658_s4 + $0x28] sm:$0xff]  }
0x1c38   : > { %5368 = vmatmul.mubr.msk.bf16.vlgmr.msra.gmra.mrb[92].mxu0 %vm1684_vm4, %v3964_v49 }
0x1c39   : > { %5379 = vmatprep.mubr.msk.bf16.mxu0 %vm6388_vm0, %v6387_v0 }
0x1c91   : > { %v3949_v50 = vpop.xlane.xlu0 %3948 }
0x1c92   : > { %5809 = vrcp.f32 %v3949_v50 }
0x1c95   : > { %v3952_v51 = vpop.xlane.xlu1 %3951 }
0x1c96   : > { %5811 = vrcp.f32 %v3952_v51 }
0x1c99   : > { %v5694_v53 = vpop.permute.xlu1 %5693  ;;  %v3955_v54 = vpop.xlane.xlu0 %3954 }
0x1c9a   : > { %5813 = vrcp.f32 %v3955_v54  ;;  %v5696_v56 = vunpack.i.h.bf16 %v5694_v53  ;;  %v5695_v58 = vunpack.i.l.bf16 %v5694_v53  ;;  %v4889_v54 = vld [vmem:[#allocation22 + $0x1] ss:$0 sm:$0xff] }
0x1c9c   : > { %v5810_v55 = vpop.eup %5809  ;;  %v3735_v2 = vpack.c.bf16 %v5696_v56, %v5695_v58  ;;  %v4890_v56 = vld [vmem:[#allocation23 + $0x1] ss:$0 sm:$0xff] }
0x1c9d   : > { %v3961_v59 = vmul.f32 %v5810_v55, %v5802_v41  ;;  %v5689_v60 = vpop.permute.xlu0 %5688 }
0x1c9e   : > { %v5691_v61 = vunpack.i.h.bf16 %v5689_v60  ;;  %v5690_v62 = vunpack.i.l.bf16 %v5689_v60 }
0x1c9f   : > { %v3965_v63 = vpack.c.bf16 %v3961_v59, %v3961_v59 }
0x1ca0   : > { %v5812_v1 = vpop.eup %5811  ;;  %v3734_v3 = vpack.c.bf16 %v5691_v61, %v5690_v62  ;;  %v5739_v61 = vld [vmem:[%s7658_s4 + $0x30] sm:$0xff]   ;;  %v5740_v62 = vld [vmem:[%s7658_s4 + $0x38] sm:$0xff]  }
0x1ca1   : > { %v3962_v36 = vmul.f32 %v5812_v1, %v5804_v26  ;;  %5374 = vmatmul.mubr.msk.bf16.vlgmr.msra.gmra.mrb[88].mxu1 %vm1684_vm4, %v3965_v63  ;;  %v4896_v63 = vld [vmem:[%s7660_s10 + $0x1] ss:$0 sm:$0xff] }
0x1ca2   : > { %5384 = vmatpush3.bf16.msra.mxu1 %v3735_v2  ;;  %5378 = vmatpush3.bf16.msra.mxu0 %v3734_v3 }
0x1ca3   : > { %v3966_v4 = vpack.c.bf16 %v3962_v36, %v3962_v36  ;;  %5385 = vmatprep.mubr.msk.bf16.mxu1 %vm6388_vm0, %v6387_v0  ;;  %5389 = vmatprep.subr.bf16.mxu0 %v6387_v0 }
0x1ca4   : > { %v5814_v6 = vpop.eup %5813  ;;  %5397 = vmatprep.subr.bf16.mxu1 %v6387_v0 }
0x1ca5   : > { %v3963_v7 = vmul.f32 %v5814_v6, %v5806_v44  ;;  %5380 = vmatmul.mubr.msk.bf16.vlgmr.msra.gmra.mrb[96].mxu0 %vm1684_vm4, %v3966_v4 }
0x1ca6   : > { %5393 = vmatprep.mubr.msk.bf16.mxu0 %vm6388_vm0, %v6387_v0  ;;  %5390 = vmatpush3.bf16.msra.mxu0 %v5733_v12 }
0x1ca7   : > { %v3967_v8 = vpack.c.bf16 %v3963_v7, %v3963_v7  ;;  %5391 = vmatprep.subr.bf16.mxu0 %v6387_v0 }
0x1ca9   : > { %5386 = vmatmul.mubr.msk.bf16.vlgmr.msra.gmra.mrb[92].mxu1 %vm1684_vm4, %v3967_v8  ;;  %v4908_v8 = vld [vmem:[#allocation25 + $0x1] ss:$0 sm:$0xff] }
0x1caa   : > { %5401 = vmatprep.mubr.msk.bf16.mxu1 %vm6388_vm0, %v6387_v0  ;;  %5392 = vmatpush3.bf16.msra.mxu0 %v5734_v13 }
0x1cab   : > { %5405 = vmatprep.subr.bf16.mxu0 %v6387_v0  ;;  %5398 = vmatpush3.bf16.msra.mxu1 %v5735_v46 }
0x1cac   : > { %5399 = vmatprep.subr.bf16.mxu1 %v6387_v0 }
0x1caf   : > { %5400 = vmatpush3.bf16.msra.mxu1 %v5736_v47 }
0x1cb0   : > { %5417 = vmatprep.subr.bf16.mxu1 %v6387_v0 }
0x1d0b   : > { %v4005_v9 = vpop.f32.mrb[92].mxu0 }
0x1d0c   : > { %v5369_v10 = vpop.f32.mrb[93].mxu0 }
0x1d0d   : > { %v4008_v52 = vpop.f32.mrb[94].mxu0 }
0x1d0e   : > { %v5370_v11 = vpop.f32.mrb[95].mxu0 }
0x1d74   : > { %v4048_v14 = vpop.f32.mrb[88].mxu1 }
0x1d75   : > { %4141 = vrot.lane.b32.xlu1 %v4048_v14, %s6392_s19  ;;  %v5375_v15 = vpop.f32.mrb[89].mxu1 }
0x1d76   : > { %v4051_v16 = vpop.f32.mrb[90].mxu1 }
0x1d77   : > { %v5376_v17 = vpop.f32.mrb[91].mxu1 }
0x1d78   : > { %v4091_v18 = vpop.f32.mrb[96].mxu0 }
0x1d79   : > { %4145 = vrot.lane.b32.xlu0 %v4091_v18, %s6393_s13  ;;  %v5381_v19 = vpop.f32.mrb[97].mxu0 }
0x1d7a   : > { %v4094_v20 = vpop.f32.mrb[98].mxu0 }
0x1d7b   : > { %v5382_v21 = vpop.f32.mrb[99].mxu0  ;;  %v5741_v20 = vld [vmem:[%s7663_s11] sm:$0xff]  }
0x1d7c   : > { %v4134_v23 = vpop.f32.mrb[92].mxu1  ;;  %v5742_v21 = vld [vmem:[%s7663_s11 + $0x8] sm:$0xff]  }
0x1d7d   : > { %4149 = vrot.lane.b32.xlu1 %v4134_v23, %s6394_s0  ;;  %v5387_v24 = vpop.f32.mrb[93].mxu1  ;;  %s7664_s0 = sld [smem:[#allocation40_spill]] }
0x1d7e   : > { %v4137_v5 = vpop.f32.mrb[94].mxu1 }
0x1d7f   : > { %v5388_v25 = vpop.f32.mrb[95].mxu1 }
0x1d83   : > { %s1013_s28 = sand.u32 1, %s7664_s0  }
0x1d84   : > { %s4768_s15 = sshll.u32 %s1013_s28, 3  ;;  %s4505_s0 = scalar_lea.sflag [#allocation4], %s1013_s28 }
0x1d85   : > { %s1015_s27 = scalar_lea.vmem [#allocation28], %s4768_s15  ;;  %s6395_s15 = smov [#allocation28]  }
0x1d86   : > { %s4518_s19 = sshll.u32 %s1015_s27, 4  ;;  %s6271_s29 = sshll.u32 %s6395_s15, 4  ;;  %s7479_s19 = int_to_ptr.vmem [resolvable:$true] %s4518_s19  ;;  %s6272_s29 = int_to_ptr.vmem [resolvable:$false] %s6271_s29 }
0x1d87   : > { %s6267_s8 = scalar_lea.vmem %s7479_s19, 128  ;;  %s6273_s26 = scalar_lea.vmem %s6272_s29, 256 }
0x1d88   : > { %p6268_p12 = scmp.ne.s32.totalorder %s7479_s19, %s6267_s8  ;;  %p6274_p4 = scmp.lt.s32.totalorder %s7479_s19, %s6272_s29 }
0x1d89   : > { %p6275_p7 = scmp.lt.s32.totalorder %s6273_s26, %s6267_s8 }
0x1d8a   : > { %p6269_p2 = pnand %p6268_p12, %p7668_p1 }
0x1d8b   : > { %p6276_p8 = por %p6275_p7, %p6274_p4 }
0x1d8c   : > { %p6270_p3 = pneg %p6269_p2 }
0x1d8e   : > { %p6277_p11 = pnand %p6276_p8, %p6270_p3 }
0x1de7   : > { %v4142_v27 = vpop.permute.xlu1 %4141 }
0x1de8   : > { %v4152_v29 = vsel %vm1253_vm2, %v4005_v9, %v4142_v27  ;;  %v4915_v27 = vld [vmem:[#allocation26 + $0x1] ss:$0 sm:$0xff] }
0x1deb   : > { %v4146_v28 = vpop.permute.xlu0 %4145 }
0x1dec   : > { %v4153_v30 = vsel %vm1684_vm4, %v4152_v29, %v4146_v28  ;;  %v4916_v29 = vld [vmem:[%s7662_s24 + $0x1] ss:$0 sm:$0xff] }
0x1def   : > { %v4150_v31 = vpop.permute.xlu1 %4149 }
0x1df0   : > { %v4154_v32 = vsel %vm1686_vm5, %v4153_v30, %v4150_v31 }
0x1df1   : > { %v4155_v33 = vpack.c.bf16 %v4154_v32, %v4154_v32 }
0x1df3   : > { %5394 = vmatmul.mubr.msk.bf16.vlgmr.msra.gmra.mrb[100].mxu0 %vm1063_vm1, %v4155_v33 }
0x1df4   : > { %5413 = vmatprep.mubr.msk.bf16.mxu0 %vm6388_vm0, %v6387_v0 }
0x1ec6   : > { %v4211_v22 = vpop.f32.mrb[100].mxu0 }
0x1ec7   : > { %v4212_v35 = vadd.f32 %v4885_v34, %v4211_v22  ;;  %v5395_v37 = vpop.f32.mrb[101].mxu0 }
0x1ec8   : > { %v4214_v38 = vpop.f32.mrb[102].mxu0 }
0x1ec9   : > { %v5396_v39 = vpop.f32.mrb[103].mxu0  ;;  %v4217_v40 = vadd.f32 %v4212_v35, %v7346_v57  ;;  %v5737_v57 = vld [vmem:[%s7658_s4 + $0x20] sm:$0xff]  }
0x1eca   : > { %5406 = vmatpush3.bf16.msra.mxu0 %v5737_v57 }
0x1ecb   : > { %v4222_v41 = vsel %vm1063_vm1, %v4217_v40, 0.0  ;;  %5407 = vmatprep.subr.bf16.mxu0 %v6387_v0 }
0x1ecc   : > { %4223 = vadd.xlane.f32.xlu0 %v4222_v41 }
0x1ece   : > { %5408 = vmatpush3.bf16.msra.mxu0 %v5738_v48 }
0x1ecf   : > { %5409 = vmatprep.subr.bf16.mxu0 %v6387_v0 }
0x1ed2   : > { %5410 = vmatpush3.bf16.msra.mxu0 %v5739_v61 }
0x1ed3   : > { %5411 = vmatprep.subr.bf16.mxu0 %v6387_v0 }
0x1ed6   : > { %5412 = vmatpush3.bf16.msra.mxu0 %v5740_v62 }
0x1f59   : > { %v4224_v42 = vpop.xlane.xlu0 %4223 }
0x1f5a   : > { %v4225_v26 = vmul.f32 0.03125, %v4224_v42 }
0x1f5c   : > { %v4226_v43 = vsub.f32 %v4217_v40, %v4225_v26 }
0x1f5e   : > { %v4227_v44 = vmul.f32 %v4226_v43, %v4226_v43 }
0x1f60   : > { %v4228_v45 = vsel %vm1063_vm1, %v4227_v44, 0.0 }
0x1f61   : > { %4229 = vadd.xlane.f32.xlu1 %v4228_v45 }
0x1fee   : > { %v4230_v49 = vpop.xlane.xlu1 %4229 }
0x1fef   : > { %v4231_v50 = vmul.f32 0.03125, %v4230_v49 }
0x1ff1   : > { %v4232_v51 = vadd.f32 1e-05, %v4231_v50 }
0x1ff3   : > { %5815 = vrsqrt.f32 %v4232_v51 }
0x1ffd   : > { %v5816_v53 = vpop.eup %5815 }
0x1ffe   : > { %v4234_v55 = vmul.f32 %v5816_v53, %v4226_v43 }
0x2000   : > { %v4241_v58 = vmul.f32 %v4889_v54, %v4234_v55 }
0x2002   : > { %v4248_v59 = vadd.f32 %v4890_v56, %v4241_v58 }
0x2004   : > { %v4249_v60 = vpack.c.bf16 %v4248_v59, %v4248_v59 }
0x2006   : > { %5402 = vmatmul.mubr.msk.bf16.vlgmr.msra.gmra.mrb[96].mxu1 %vm1063_vm1, %v4249_v60 }
0x2007   : > { %5421 = vmatprep.mubr.msk.bf16.mxu1 %vm6388_vm0, %v6387_v0  ;;  %5418 = vmatpush3.bf16.msra.mxu1 %v5741_v20 }
0x2008   : > { %5419 = vmatprep.subr.bf16.mxu1 %v6387_v0  ;;  %v4917_v0 = vld [vmem:[%s7665_s20] ss:$0 sm:$0xff] }
0x200b   : > { %5420 = vmatpush3.bf16.msra.mxu1 %v5742_v21 }
0x20d9   : > { %v4312_v1 = vpop.f32.mrb[96].mxu1 }
0x20da   : > { %v4313_v2 = vadd.f32 %v4896_v63, %v4312_v1  ;;  %v5403_v3 = vpop.f32.mrb[97].mxu1 }
0x20db   : > { %v4315_v36 = vpop.f32.mrb[98].mxu1 }
0x20dc   : > { %v4318_v4 = vmax.f32 %v4313_v2, 0.0  ;;  %v5404_v6 = vpop.f32.mrb[99].mxu1 }
0x20de   : > { %v4319_v7 = vpack.c.bf16 %v4318_v4, %v4318_v4 }
0x20e0   : > { %5414 = vmatmul.mubr.msk.bf16.vlgmr.msra.gmra.mrb[104].mxu0 %vm2651_vm6, %v4319_v7 }
0x21b3   : > { %v4398_v9 = vpop.f32.mrb[104].mxu0 }
0x21b4   : > { %v4399_v10 = vadd.f32 %v4908_v8, %v4398_v9  ;;  %v5415_v52 = vpop.f32.mrb[105].mxu0 }
0x21b5   : > { %v4401_v11 = vpop.f32.mrb[106].mxu0 }
0x21b6   : > { %v5416_v12 = vpop.f32.mrb[107].mxu0  ;;  %v4404_v13 = vadd.f32 %v4399_v10, %v4248_v59 }
0x21b8   : > { %v4409_v14 = vsel %vm1063_vm1, %v4404_v13, 0.0 }
0x21b9   : > { %4410 = vadd.xlane.f32.xlu0 %v4409_v14 }
0x2246   : > { %v4411_v15 = vpop.xlane.xlu0 %4410 }
0x2247   : > { %v4412_v16 = vmul.f32 0.03125, %v4411_v15 }
0x2249   : > { %v4413_v17 = vsub.f32 %v4404_v13, %v4412_v16 }
0x224b   : > { %v4414_v18 = vmul.f32 %v4413_v17, %v4413_v17 }
0x224d   : > { %v4415_v19 = vsel %vm1063_vm1, %v4414_v18, 0.0 }
0x224e   : > { %4416 = vadd.xlane.f32.xlu0 %v4415_v19 }
0x22db   : > { %v4417_v23 = vpop.xlane.xlu0 %4416 }
0x22dc   : > { %v4418_v24 = vmul.f32 0.03125, %v4417_v23 }
0x22de   : > { %v4419_v5 = vadd.f32 1e-05, %v4418_v24 }
0x22e0   : > { %5817 = vrsqrt.f32 %v4419_v5 }
0x22ea   : > { %v5818_v25 = vpop.eup %5817 }
0x22eb   : > { %v4421_v28 = vmul.f32 %v5818_v25, %v4413_v17 }
0x22ed   : > { %v4428_v30 = vmul.f32 %v4915_v27, %v4421_v28 }
0x22ef   : > { %v4435_v31 = vadd.f32 %v4916_v29, %v4428_v30 }
0x22f1   : > { %v4436_v32 = vpack.c.bf16 %v4435_v31, %v4435_v31 }
0x22f3   : > { %5422 = vmatmul.mubr.msk.bf16.vlgmr.msra.gmra.mrb[100].mxu1 %vm1063_vm1, %v4436_v32 }
0x23c6   : > { %v4497_v33 = vpop.f32.mrb[100].mxu1 }
0x23c7   : > { %v4498_v34 = vadd.f32 %v4917_v0, %v4497_v33  ;;  %v5423_v22 = vpop.f32.mrb[101].mxu1 }
0x23c8   : > { %v4500_v35 = vpop.f32.mrb[102].mxu1 }
0x23c9   : > { %4503 = vst [vmem:[%s1015_s27] sm:$0xff] %v4498_v34  ;;  %v5424_v37 = vpop.f32.mrb[103].mxu1 }
0x23ca   : > { %6280 = shalt.err (!%p6277_p11)
}
0x23cb   : > { %s6281_s28 = scalar_lea.hbm %s7477_s1, 128  ;;  %s6285_s27 = scalar_lea.hbm %s7667_s9, 256 }
0x23cc   : > { %p6282_p5 = scmp.ne.s32.totalorder %s7477_s1, %s6281_s28  ;;  %p6286_p9 = scmp.lt.u32.totalorder %s7477_s1, %s7667_s9 }
0x23cd   : > { %p6287_p10 = scmp.lt.u32.totalorder %s6285_s27, %s6281_s28  ;;  %p6289_p12 = scmp.lt.u32.totalorder %s6281_s28, %s7477_s1 }
0x23ce   : > { %p6283_p0 = pnand %p6282_p5, %p7668_p1 }
0x23cf   : > { %p6288_p13 = por %p6287_p10, %p6286_p9 }
0x23d0   : > { %p6284_p6 = pneg %p6283_p0 }
0x23d1   : > { %p6290_p2 = por %p6289_p12, %p6288_p13 }
0x23d3   : > { %p6291_p3 = pnand %p6290_p2, %p6284_p6 }
0x23d5   : > { %6294 = shalt.err (!%p6291_p3)
}
0x23d6   : > { %5489 = dma.vmem_to_hbm [thread:$0]  (%p7668_p1), %s7479_s19, 128, %s7477_s1, %s4505_s0  }
0x23d7 PF: > { %s7669_s8 = sld [smem:[#allocation42_spill]]  ;;  %s7670_s15 = sld [smem:[#allocation39_spill]] }
0x23d8   : > { %s7671_s29 = sld [smem:[#allocation46_spill]] }
0x23dd   : > { %p5576_p4 = scmp.ge.s32.totalorder %s7669_s8, 2  ;;  %s4530_s26 = sand.u32 1, %s7670_s15  }
0x23de   : > { %p7672_p7 = scmp.ne.s32.totalorder %s7671_s29, 0  ;;  %s4531_s20 = scalar_lea.sflag [#allocation4], %s4530_s26 }
0x23e0   : > { %p5541_p8 = pnand %p5576_p4, %p7672_p7 }
0x23e2   : > { %6348 = dma.done.wait (!%p5541_p8), %s4531_s20, 128  }
0x23e3   : > { %6350 = vsyncadd (!%p5541_p8), %s4531_s20, 4294967168  ;;  %s7673_s28 = sld [smem:[#allocation43_spill]]  ;;  %s7674_s27 = sld [smem:[#allocation40_spill]] }
0x23e4   : > { %s7675_s3 = sld [smem:[#allocation41_spill]]  ;;  %s7676_s7 = sld [smem:[#allocation44_spill]] }
0x23e9   : > { %p45_p11 = scmp.ge.s32.totalorder %s7673_s28, 4  }
0x23eb   :  { %47 = sbr.rel (!%p45_p11) target bundleno = 34 (0x22), region = 246 }
0x23f2   :  { %4536 = vsyncpa [#allocation3], 1 }
0x23f3   :  { %4538 = vsyncpa [#allocation3 + $0x1], 1 }
0x23f4   :  { %4539 = vsyncpa [#allocation6], 1 }
0x23f5   :  { %4540 = vsyncpa [#allocation9], 1 }
0x23f6   :  { %4541 = vsyncpa [#allocation12], 1 }
0x23f7   :  { %4542 = vsyncpa [#allocation15], 1 }
0x23f8   :  { %4543 = vsyncpa [#allocation18], 1 }
0x23f9   :  { %4544 = vsyncpa [#allocation21], 1 }
0x23fa   :  { %4545 = vsyncpa [#allocation24], 1 }
0x23fb   :  { %4546 = vsyncpa [#allocation27], 1 }
0x23fc   :  { %4547 = vsyncpa [#allocation4], 1 }
0x23fd   :  { %4549 = vsyncpa [#allocation4 + $0x1], 1 }

</bundles_post_ra>
